<compile_context>
chip_gen: v6e
topology: v6e:2x2x1
jax: 0.10.0
libtpu: 0.0.40
codegen_flags: <defaults>
</compile_context>

<pallas_src>
import jax
import jax.numpy as jnp
from jax import lax
from jax.experimental import pallas as pl
from jax.experimental.pallas import tpu as pltpu

F32 = jnp.float32
BF16 = jnp.bfloat16
BN_EPS = 1e-5


def _silu(x):
    return x * jax.nn.sigmoid(x)


def _full_spec(shape):
    # Whole array as a single (grid-invariant) VMEM block: weights, biases, BN scale/shift.
    nd = len(shape)
    return pl.BlockSpec(shape, lambda *_: (0,) * nd)


def _tpu_vmem_capacity():
    try:
        return int(pltpu.get_tpu_info().vmem_capacity_bytes)
    except Exception:
        return 64 << 20  # conservative (v7x-sized) fallback


def _choose_tile_i(N, H, itemsize, budget_bytes):
    """Largest edge-row tile (divisor of N, multiple of 8, or N itself) whose (TILE_I, N, H)
    slab stays under `budget_bytes` (double-buffered in/out tiles + ~5x f32 intermediate
    amplification must fit the generation's VMEM)."""
    if N * N * H * itemsize <= budget_bytes:
        return N
    cands = [t for t in range(8, N, 8) if N % t == 0]
    fits = [t for t in cands if t * N * H * itemsize <= budget_bytes]
    if fits:
        return max(fits)
    return min(cands) if cands else N


def _choose_s_tile(S):
    """Start-chunk size for the decode grid: S itself if small, else the largest
    multiple-of-8 divisor <= 128."""
    if S <= 128:
        return S
    cands = [t for t in range(8, 129, 8) if S % t == 0]
    return max(cands) if cands else S


# ----------------------------------------------------------------------------
# Encoder: one DeepACO anisotropic GNN layer = stats kernel + apply kernel.
# Grid = (B, N // TILE_I); edge tensor tiled (1, TILE_I, N, H) and pipelined.
# ----------------------------------------------------------------------------
def make_gnn_stats_kernel(H, first):
    """Per (batch, row-tile): pre_node tile + partial sum / sum-of-squares of the node and
    edge pre-activations (needed for exact global train-mode BatchNorm).  For the first
    layer the bf16 edge tile is built from the distance tile on the fly (Linear 1->H)."""

    def kernel(*refs):
        n_in = 6 if first else 4
        in_refs = refs[:n_in]
        nstat_ref, estat_ref, pn_ref = refs[n_in:]

        if first:
            d_ref, xp_ref, we_ref, be_ref, wedge_ref, bedge_ref = in_refs
            d_t = d_ref[0].astype(F32)                                   # (TI, N)
            e_bf = (d_t[:, :, None] * wedge_ref[...] + bedge_ref[...]).astype(BF16)
        else:
            e_ref, xp_ref, we_ref, be_ref = in_refs
            e_bf = e_ref[0]                                              # (TI, N, H) bf16
        TI, N = e_bf.shape[0], e_bf.shape[1]
        e_f = e_bf.astype(F32)

        # Hoisted node projection xp = x @ Wv + bv arrives precomputed (B, N, 4H);
        # slice this grid step's tile rows instead of duplicating the x DMA.
        i0 = pl.multiple_of(pl.program_id(1) * TI, TI)
        xp_f = xp_ref[0]                                                 # (N, 4H)
        xp_t = xp_ref[0, pl.ds(i0, TI), :]                               # (TI, 4H)
        x1_t = xp_t[:, 0 * H:1 * H]
        x3_t = xp_t[:, 2 * H:3 * H]
        x2_f = xp_f[:, 1 * H:2 * H]
        x4_f = xp_f[:, 3 * H:4 * H]

        # Node pre-activation: x1 + mean_j sigmoid(e[i,j]) * x2[j]  (sigmoid done ONCE here).
        agg = jnp.mean(jax.nn.sigmoid(e_f) * x2_f[None, :, :], axis=1)   # (TI, H)
        pre_node = x1_t + agg
        pn_ref[0] = pre_node

        # Edge pre-activation: W_e e + x3[i] + x4[j]  (bf16 MXU inputs, f32 accumulation).
        w1 = jnp.dot(e_bf.reshape(TI * N, H), we_ref[...],
                     preferred_element_type=F32) + be_ref[...]
        pre_edge = w1.reshape(TI, N, H) + x3_t[:, None, :] + x4_f[None, :, :]

        nstat_ref[0, 0] = jnp.concatenate(
            [jnp.sum(pre_node, axis=0, keepdims=True),
             jnp.sum(pre_node * pre_node, axis=0, keepdims=True)], axis=0)
        pe2 = pre_edge.reshape(TI * N, H)
        estat_ref[0, 0] = jnp.concatenate(
            [jnp.sum(pe2, axis=0, keepdims=True),
             jnp.sum(pe2 * pe2, axis=0, keepdims=True)], axis=0)

    return kernel


def make_gnn_apply_kernel(H, first, last, num_hidden):
    """Recomputes the per-tile edge pre-activation (cheaper than spilling it to HBM on a
    memory-bound kernel), applies the precomputed global-BN scale/shift + SiLU + residual.
    Node update uses the precomputed pre_node (no sigmoid/agg recompute).  For the last
    layer the EdgeHeatmapGenerator MLP + sigmoid is fused here and a lane-dense (TI, N)
    heatmap slab is emitted instead of the edge tensor."""

    def kernel(*refs):
        n_in = 10 + (2 if first else 0) + ((2 * num_hidden + 2) if last else 0)
        in_refs = list(refs[:n_in])
        x_out_ref, out2_ref = refs[n_in:]

        e_in_ref = in_refs.pop(0)
        xp_ref = in_refs.pop(0)
        x_ref = in_refs.pop(0)
        pn_ref = in_refs.pop(0)
        we_ref = in_refs.pop(0)
        be_ref = in_refs.pop(0)
        ns_ref = in_refs.pop(0)   # node BN scale  (1, H)
        nb_ref = in_refs.pop(0)   # node BN shift  (1, H)
        es_ref = in_refs.pop(0)   # edge BN scale  (1, H)
        eb_ref = in_refs.pop(0)   # edge BN shift  (1, H)
        if first:
            wedge_ref = in_refs.pop(0)
            bedge_ref = in_refs.pop(0)
        hm_refs = in_refs         # heatmap MLP params (only when last)

        if first:
            d_t = e_in_ref[0].astype(F32)
            e_bf = (d_t[:, :, None] * wedge_ref[...] + bedge_ref[...]).astype(BF16)
        else:
            e_bf = e_in_ref[0]
        TI, N = e_bf.shape[0], e_bf.shape[1]
        e_f = e_bf.astype(F32)

        i0 = pl.multiple_of(pl.program_id(1) * TI, TI)
        xp_f = xp_ref[0]
        xp_t = xp_ref[0, pl.ds(i0, TI), :]
        x3_t = xp_t[:, 2 * H:3 * H]
        x4_f = xp_f[:, 3 * H:4 * H]

        # Node update: pure scale-and-shift BN (stats reduced once outside) + SiLU + residual.
        h_node = pn_ref[0] * ns_ref[...] + nb_ref[...]
        x_out_ref[0] = (x_ref[0].astype(F32) + _silu(h_node)).astype(x_out_ref.dtype)

        # Edge update (bf16 MXU recompute of the pre-activation).
        w1 = jnp.dot(e_bf.reshape(TI * N, H), we_ref[...],
                     preferred_element_type=F32) + be_ref[...]
        pre_edge = w1.reshape(TI, N, H) + x3_t[:, None, :] + x4_f[None, :, :]
        h_edge = pre_edge * es_ref[...] + eb_ref[...]
        e_new = e_f + _silu(h_edge)                                      # (TI, N, H) f32

        if not last:
            # TODO(synk): plain round-to-nearest bf16 downcast each layer (no stochastic rounding).
            out2_ref[0] = e_new.astype(out2_ref.dtype)
        else:
            # Fused EdgeHeatmapGenerator: MLP (bf16 matmuls) + sigmoid on the final edge
            # tile while it is still in VMEM; emit a lane-dense (TI, N) heatmap slab.
            h = e_new.reshape(TI * N, H)
            for layer in range(num_hidden):
                w = hm_refs[2 * layer][...]            # (H, H) bf16
                b = hm_refs[2 * layer + 1][...]        # (1, H) f32
                h = _silu(jnp.dot(h.astype(BF16), w, preferred_element_type=F32) + b)
            wo = hm_refs[2 * num_hidden][...]          # (1, H) f32 row of Linear(H, 1)
            bo = hm_refs[2 * num_hidden + 1][...]      # (1, 1) f32
            h3 = h.reshape(TI, N, H)
            logit = jnp.sum(h3 * wo, axis=-1) + bo     # VPU lane reduce, no 1-wide MXU pass
            out2_ref[0] = jax.nn.sigmoid(logit)

    return kernel


def gnn_layer(x, e_or_dist, layer_params, *, edge_embed, hm_params, tile_i,
              vmem_limit, first, last):
    B, N, H = x.shape
    n_tiles = N // tile_i
    wv, bv, we, be, gv, bvn, ge, ben = layer_params
    we_bf = we.astype(BF16)

    # Hoisted fused node projection: one tiny XLA matmul per layer instead of
    # 2 * n_tiles redundant (N,H)x(H,4H) MXU passes inside the gridded kernels.
    xp = jnp.einsum('bnh,hk->bnk', x, wv) + bv                           # (B, N, 4H) f32

    cp = pltpu.CompilerParams(dimension_semantics=("parallel", "parallel"),
                              vmem_limit_bytes=vmem_limit)

    if first:
        e_spec = pl.BlockSpec((1, tile_i, N), lambda b, i: (b, i, 0))        # dist tile
    else:
        e_spec = pl.BlockSpec((1, tile_i, N, H), lambda b, i: (b, i, 0, 0))  # bf16 e tile
    xp_spec = pl.BlockSpec((1, N, 4 * H), lambda b, i: (b, 0, 0))
    xt_spec = pl.BlockSpec((1, tile_i, H), lambda b, i: (b, i, 0))
    stat_spec = pl.BlockSpec((1, 1, 2, H), lambda b, i: (b, i, 0, 0))
    grid = (B, n_tiles)

    # ---- Pass 1: partial BN statistics + pre_node ----
    stats_in = [e_or_dist, xp, we_bf, be]
    stats_specs = [e_spec, xp_spec, _full_spec(we_bf.shape), _full_spec(be.shape)]
    if first:
        stats_in += [edge_embed[0], edge_embed[1]]
        stats_specs += [_full_spec(edge_embed[0].shape), _full_spec(edge_embed[1].shape)]

    nstat, estat, pre_node = pl.pallas_call(
        make_gnn_stats_kernel(H, first),
        grid=grid,
        in_specs=stats_specs,
        out_specs=(stat_spec, stat_spec, xt_spec),
        out_shape=(jax.ShapeDtypeStruct((B, n_tiles, 2, H), F32),
                   jax.ShapeDtypeStruct((B, n_tiles, 2, H), F32),
                   jax.ShapeDtypeStruct((B, N, H), F32)),
        compiler_params=cp,
    )(*stats_in)

    # ---- Exact global train-mode BatchNorm stats, reduced ONCE (tiny XLA reduce) ----
    node_count = float(B * N)
    edge_count = float(B * N * N)
    nsum = jnp.sum(nstat, axis=(0, 1))                                   # (2, H)
    n_mean = nsum[0] / node_count
    n_var = jnp.maximum(nsum[1] / node_count - n_mean * n_mean, 0.0)     # clamp >= 0
    n_scale = gv * lax.rsqrt(n_var + BN_EPS)                             # (1, H)
    n_shift = bvn - n_mean * n_scale
    esum = jnp.sum(estat, axis=(0, 1))
    e_mean = esum[0] / edge_count
    e_var = jnp.maximum(esum[1] / edge_count - e_mean * e_mean, 0.0)
    e_scale = ge * lax.rsqrt(e_var + BN_EPS)
    e_shift = ben - e_mean * e_scale

    # ---- Pass 2: normalize + SiLU + residual (+ fused heatmap on the last layer) ----
    apply_in = [e_or_dist, xp, x, pre_node, we_bf, be,
                n_scale, n_shift, e_scale, e_shift]
    apply_specs = [e_spec, xp_spec, xt_spec, xt_spec,
                   _full_spec(we_bf.shape), _full_spec(be.shape),
                   _full_spec(n_scale.shape), _full_spec(n_shift.shape),
                   _full_spec(e_scale.shape), _full_spec(e_shift.shape)]
    if first:
        apply_in += [edge_embed[0], edge_embed[1]]
        apply_specs += [_full_spec(edge_embed[0].shape), _full_spec(edge_embed[1].shape)]
    num_hidden = 0
    if last:
        num_hidden = (len(hm_params) - 2) // 2
        apply_in += hm_params
        apply_specs += [_full_spec(p.shape) for p in hm_params]

    if last:
        out2_spec = pl.BlockSpec((1, tile_i, N), lambda b, i: (b, i, 0))
        out2_shape = jax.ShapeDtypeStruct((B, N, N), F32)                # heatmap
    else:
        out2_spec = pl.BlockSpec((1, tile_i, N, H), lambda b, i: (b, i, 0, 0))
        out2_shape = jax.ShapeDtypeStruct((B, N, N, H), BF16)            # next layer's e

    x_out, out2 = pl.pallas_call(
        make_gnn_apply_kernel(H, first, last, num_hidden),
        grid=grid,
        in_specs=apply_specs,
        out_specs=(xt_spec, out2_spec),
        out_shape=(jax.ShapeDtypeStruct((B, N, H), F32), out2_shape),
        compiler_params=cp,
    )(*apply_in)
    return x_out, out2


# ----------------------------------------------------------------------------
# Decoder: multistart greedy rollout on the TSP env, vectorized over a chunk of
# S_TILE starts ((S_TILE, N) blocks) and gridded over (batch, start-chunk), both
# axes "parallel" (megacore on v7x).  The two per-step one-hot gathers are fused
# into a single (S_TILE, N) x (N, 2N) bf16 MXU pass.
# ----------------------------------------------------------------------------
def make_decode_kernel(N, S_TILE):
    NEG = -1e30   # plain Python float: not a captured traced constant

    def kernel(heat_ref, dist_ref, act_ref, stat_ref):
        heat = heat_ref[0]                               # (N, N) sigmoid heatmap
        heat = 0.5 * (heat + heat.T)                     # undirected_graph=True: symmetrize
        logits_all = jnp.log(heat + 1e-10)               # decoder logits = log(heatmap)
        dist_b = dist_ref[0]                             # (N, N)
        # Fused gather operand: [logits | dist] along lanes, bf16 for the MXU.
        cat = jnp.concatenate([logits_all, dist_b], axis=1).astype(BF16)   # (N, 2N)

        s_off = pl.program_id(1) * S_TILE
        row_iota = lax.broadcasted_iota(jnp.int32, (S_TILE, N), 1)        # node id per lane
        start_ids = lax.broadcasted_iota(jnp.int32, (S_TILE, 1), 0) + s_off
        start_oh = (row_iota == start_ids).astype(F32)                    # (S_TILE, N)

        visited0 = start_oh
        cur_oh0 = start_oh
        acts0 = jnp.where(row_iota == 0, start_ids, 0).astype(jnp.int32)
        zero_s1 = jnp.zeros((S_TILE, 1), F32)

        def step(t, carry):
            visited, cur_oh, ll, ent, tl, acts = carry
            both = jnp.dot(cur_oh.astype(BF16), cat,
                           preferred_element_type=F32)                    # (S_TILE, 2N)
            rows = both[:, :N]
            drow = both[:, N:]
            masked = jnp.where(visited > 0.0, NEG, rows)
            m = jnp.max(masked, axis=-1, keepdims=True)                   # (S_TILE, 1)
            lse = m + jnp.log(jnp.sum(jnp.exp(masked - m), axis=-1, keepdims=True))
            logp = masked - lse
            # multistart_greedy: first index attaining the max (matches torch.argmax ties).
            is_max = masked >= m
            act = jnp.min(jnp.where(is_max, row_iota, N), axis=-1, keepdims=True)
            act_oh = (row_iota == act).astype(F32)
            ll = ll + jnp.sum(logp * act_oh, axis=-1, keepdims=True)
            p = jnp.exp(logp)
            ent = ent + jnp.sum(jnp.where(visited > 0.0, 0.0, -p * logp),
                                axis=-1, keepdims=True)
            tl = tl + jnp.sum(drow * act_oh, axis=-1, keepdims=True)
            visited = jnp.maximum(visited, act_oh)
            acts = acts + jnp.where(row_iota == t, act, 0).astype(jnp.int32)
            return visited, act_oh, ll, ent, tl, acts

        carry = (visited0, cur_oh0, zero_s1, zero_s1, zero_s1, acts0)
        visited, cur_oh, ll, ent, tl, acts = lax.fori_loop(1, N, step, carry)

        # Close the tour: distance from the last node back to the start node.
        both = jnp.dot(cur_oh.astype(BF16), cat, preferred_element_type=F32)
        tl = tl + jnp.sum(both[:, N:] * start_oh, axis=-1, keepdims=True)

        # One lane-dense slab write per grid step (no per-(b,s) width-1 stores).
        act_ref[0] = acts                                            # (S_TILE, N) int32
        stat_ref[0] = jnp.concatenate([ll, -tl, ent], axis=1)        # (S_TILE, 3)

    return kernel


def decode_multistart_greedy(heatmap, dist, S, vmem_limit):
    B, N, _ = heatmap.shape
    s_tile = _choose_s_tile(S)
    n_s = S // s_tile
    return pl.pallas_call(
        make_decode_kernel(N, s_tile),
        grid=(B, n_s),
        in_specs=[pl.BlockSpec((1, N, N), lambda b, s: (b, 0, 0)),
                  pl.BlockSpec((1, N, N), lambda b, s: (b, 0, 0))],
        out_specs=(pl.BlockSpec((1, s_tile, N), lambda b, s: (b, s, 0)),
                   pl.BlockSpec((1, s_tile, 3), lambda b, s: (b, s, 0))),
        out_shape=(jax.ShapeDtypeStruct((B, S, N), jnp.int32),
                   jax.ShapeDtypeStruct((B, S, 3), F32)),
        compiler_params=pltpu.CompilerParams(
            dimension_semantics=("parallel", "parallel"),
            vmem_limit_bytes=vmem_limit),
    )(heatmap, dist)


# ----------------------------------------------------------------------------
# Parameter init (deterministic, PyTorch-default-style uniform(-1/sqrt(fan_in), ...)).
# ----------------------------------------------------------------------------
def init_params(key, embedding_dim, num_encoder_layers, num_decoder_layers):
    H = embedding_dim
    keys = iter(jax.random.split(key, 256))

    def linear(fan_in, fan_out):
        bound = 1.0 / (fan_in ** 0.5)
        w = jax.random.uniform(next(keys), (fan_in, fan_out), F32, -bound, bound)
        b = jax.random.uniform(next(keys), (1, fan_out), F32, -bound, bound)
        return w, b

    params = {}
    params["w_init"], params["b_init"] = linear(2, H)      # TSPInitEmbedding
    params["w_edge"], params["b_edge"] = linear(1, H)      # TSPEdgeEmbedding (on distances)

    gnn_layers = []
    for _ in range(num_encoder_layers):
        ws, bs = zip(*[linear(H, H) for _ in range(4)])
        wv = jnp.concatenate(ws, axis=1)                   # (H, 4H) fused node projections
        bv = jnp.concatenate(bs, axis=1)                   # (1, 4H)
        we, be = linear(H, H)
        gv, bvn = jnp.ones((1, H), F32), jnp.zeros((1, H), F32)   # BatchNorm affine (node)
        ge, ben = jnp.ones((1, H), F32), jnp.zeros((1, H), F32)   # BatchNorm affine (edge)
        gnn_layers.append((wv, bv, we, be, gv, bvn, ge, ben))
    params["gnn_layers"] = gnn_layers

    params["heatmap_linears"] = [linear(H, H) for _ in range(num_decoder_layers)]
    w_o, b_o = linear(H, 1)
    params["w_hm_out"] = w_o.T                             # (1, H) row vector for VPU reduce
    params["b_hm_out"] = b_o                               # (1, 1)
    return params


# ----------------------------------------------------------------------------
# Full policy forward (glue + Pallas kernels).
# ----------------------------------------------------------------------------
def nonautoregressive_policy_forward(locs, params, num_starts=None):
    B, N, _ = locs.shape
    H = params["w_init"].shape[1]
    S = N if num_starts is None else num_starts   # TSP env.get_num_starts = N

    # ---------------- Encoder ----------------
    # TSPInitEmbedding: Linear(2 -> H) on node coordinates (parameter-setup-scale glue).
    init_embeds = (locs @ params["w_init"] + params["b_init"]).astype(F32)   # (B, N, H)
    # Pairwise Euclidean distances (B, N, N). The Linear(1 -> H) edge embedding is applied
    # per tile INSIDE the first GNN layer's kernels (no (B,N,N,H) f32 XLA temporary).
    # TODO(synk): k-NN sparsification of TSPEdgeEmbedding not implemented; dense graph used.
    diff = locs[:, :, None, :] - locs[:, None, :, :]
    dist = jnp.sqrt(jnp.sum(diff * diff, axis=-1)).astype(F32)               # (B, N, N)

    # Generation-aware VMEM budget: 128 MiB parts (v5e/v6e) get bigger tiles than v7x (64 MiB).
    vmem_cap = _tpu_vmem_capacity()
    if vmem_cap >= (100 << 20):
        tile_budget, vmem_limit = (6 << 20), (96 << 20)
    else:
        tile_budget, vmem_limit = (3 << 20), (48 << 20)
    tile_i = _choose_tile_i(N, H, jnp.dtype(BF16).itemsize, tile_budget)

    # Heatmap MLP params (hidden weights in bf16 for the MXU) for the fused last layer.
    hm_params = []
    for (w, b) in params["heatmap_linears"]:
        hm_params += [w.astype(BF16), b]
    hm_params += [params["w_hm_out"], params["b_hm_out"]]

    edge_embed = (params["w_edge"], params["b_edge"])      # (1, H), (1, H)

    x = init_embeds                                        # node embeddings stay f32 (tiny)
    carrier = dist                                         # first layer consumes dist directly
    hm = None
    L = len(params["gnn_layers"])
    for li, layer in enumerate(params["gnn_layers"]):
        first = (li == 0)
        last = (li == L - 1)
        x, out2 = gnn_layer(x, carrier, layer,
                            edge_embed=edge_embed, hm_params=hm_params,
                            tile_i=tile_i, vmem_limit=vmem_limit,
                            first=first, last=last)
        if last:
            hm = out2                                      # (B, N, N) heatmap, fused
        else:
            carrier = out2                                 # (B, N, N, H) bf16 edge tensor

    # ---------------- Decoder: multistart greedy rollout ----------------
    # TODO(synk): 'multistart_sampling' (train decode type) needs RNG; 'multistart_greedy' implemented.
    actions, stats = decode_multistart_greedy(hm, dist, S, vmem_limit)

    actions = actions.reshape(B * S, N)
    stats = stats.reshape(B * S, 3)
    return {
        "reward": stats[:, 1],             # [B*S]
        "log_likelihood": stats[:, 0],     # [B*S]
        "actions": actions,                # [B*S, N]
        "entropy": stats[:, 2],            # [B*S]
        "init_embeds": init_embeds,        # [B, N, H]
    }


if __name__ == "__main__":
    key = jax.random.PRNGKey(0)
    B, N, H = 2, 8, 32                 # batch, nodes, embedding_dim
    num_encoder_layers = 3             # (module default 15; small for the demo)
    num_decoder_layers = 2             # (module default 5; EdgeHeatmapGenerator needs > 1)

    k_locs, k_params = jax.random.split(key)
    locs = jax.random.uniform(k_locs, (B, N, 2), F32)      # TSP td["locs"]
    params = init_params(k_params, H, num_encoder_layers, num_decoder_layers)

    fwd = jax.jit(nonautoregressive_policy_forward)
    out = fwd(locs, params)
    jax.block_until_ready(out)

    assert out["reward"].shape == (B * N,)
    assert out["log_likelihood"].shape == (B * N,)
    assert out["actions"].shape == (B * N, N)
    assert out["entropy"].shape == (B * N,)
    assert out["init_embeds"].shape == (B, N, H)
    # Sanity: every decoded tour must visit each node exactly once.
    assert bool(jnp.all(jnp.sort(out["actions"], axis=-1)
                        == jnp.arange(N, dtype=jnp.int32)[None, :]))
    print("KERNEL_OK")
</pallas_src>

<mosaic_0001>
module attributes {stable_mosaic.version = 11 : i64} {
  func.func @kernel(%arg0: i32, %arg1: i32, %arg2: memref<1x8x8xf32, #tpu.memory_space<vmem>>, %arg3: memref<1x8x128xf32, #tpu.memory_space<vmem>>, %arg4: memref<32x32xbf16, #tpu.memory_space<vmem>>, %arg5: memref<1x32xf32, #tpu.memory_space<vmem>>, %arg6: memref<1x32xf32, #tpu.memory_space<vmem>>, %arg7: memref<1x32xf32, #tpu.memory_space<vmem>>, %arg8: memref<1x1x2x32xf32, #tpu.memory_space<vmem>>, %arg9: memref<1x1x2x32xf32, #tpu.memory_space<vmem>>, %arg10: memref<1x8x32xf32, #tpu.memory_space<vmem>>) attributes {dimension_semantics = [#tpu.dimension_semantics<parallel>, #tpu.dimension_semantics<parallel>], iteration_bounds = array<i64: 2, 1>, scalar_prefetch = 0 : i64, scratch_operands = 0 : i64, tpu.core_type = #tpu.core_type<tc>, window_params = [{transform_indices = @transform_0, window_bounds = array<i64: 1, 8, 8>}, {transform_indices = @transform_1, window_bounds = array<i64: 1, 8, 128>}, {pipeline_mode = #tpu.pipeline_mode<synchronous>, transform_indices = @transform_2, window_bounds = array<i64: 32, 32>}, {pipeline_mode = #tpu.pipeline_mode<synchronous>, transform_indices = @transform_3, window_bounds = array<i64: 1, 32>}, {pipeline_mode = #tpu.pipeline_mode<synchronous>, transform_indices = @transform_4, window_bounds = array<i64: 1, 32>}, {pipeline_mode = #tpu.pipeline_mode<synchronous>, transform_indices = @transform_5, window_bounds = array<i64: 1, 32>}, {transform_indices = @transform_6, window_bounds = array<i64: 1, 1, 2, 32>}, {transform_indices = @transform_7, window_bounds = array<i64: 1, 1, 2, 32>}, {transform_indices = @transform_8, window_bounds = array<i64: 1, 8, 32>}]} {
    %c0 = arith.constant 0 : index
    %c0_0 = arith.constant 0 : index
    %c0_1 = arith.constant 0 : index
    %0 = vector.load %arg2[%c0, %c0_0, %c0_1] : memref<1x8x8xf32, #tpu.memory_space<vmem>>, vector<1x8x8xf32>
    %1 = vector.shape_cast %0 : vector<1x8x8xf32> to vector<8x8xf32>
    %2 = vector.shape_cast %1 : vector<8x8xf32> to vector<8x8x1xf32>
    %c0_2 = arith.constant 0 : index
    %c0_3 = arith.constant 0 : index
    %3 = vector.load %arg6[%c0_2, %c0_3] : memref<1x32xf32, #tpu.memory_space<vmem>>, vector<1x32xf32>
    %4 = vector.shape_cast %3 : vector<1x32xf32> to vector<1x1x32xf32>
    %5 = vector.broadcast %2 : vector<8x8x1xf32> to vector<8x8x32xf32>
    %6 = vector.broadcast %4 : vector<1x1x32xf32> to vector<8x8x32xf32>
    %7 = arith.mulf %5, %6 : vector<8x8x32xf32>
    %c0_4 = arith.constant 0 : index
    %c0_5 = arith.constant 0 : index
    %8 = vector.load %arg7[%c0_4, %c0_5] : memref<1x32xf32, #tpu.memory_space<vmem>>, vector<1x32xf32>
    %9 = vector.shape_cast %8 : vector<1x32xf32> to vector<1x1x32xf32>
    %10 = vector.broadcast %9 : vector<1x1x32xf32> to vector<8x8x32xf32>
    %11 = arith.addf %7, %10 : vector<8x8x32xf32>
    %12 = arith.truncf %11 : vector<8x8x32xf32> to vector<8x8x32xbf16>
    %13 = arith.extf %12 : vector<8x8x32xbf16> to vector<8x8x32xf32>
    %c8_i32 = arith.constant 8 : i32
    %14 = arith.muli %arg1, %c8_i32 : i32
    %15 = tpu.assume_multiple %14, 8 : i32
    %c0_6 = arith.constant 0 : index
    %c0_7 = arith.constant 0 : index
    %c0_8 = arith.constant 0 : index
    %16 = vector.load %arg3[%c0_6, %c0_7, %c0_8] : memref<1x8x128xf32, #tpu.memory_space<vmem>>, vector<1x8x128xf32>
    %17 = vector.shape_cast %16 : vector<1x8x128xf32> to vector<8x128xf32>
    %c0_9 = arith.constant 0 : index
    %18 = arith.index_cast %15 : i32 to index
    %c0_10 = arith.constant 0 : index
    %19 = vector.load %arg3[%c0_9, %18, %c0_10] : memref<1x8x128xf32, #tpu.memory_space<vmem>>, vector<1x8x128xf32>
    %20 = vector.shape_cast %19 : vector<1x8x128xf32> to vector<8x128xf32>
    %21 = vector.extract_strided_slice %20 {offsets = [0, 0], sizes = [8, 32], strides = [1, 1]} : vector<8x128xf32> to vector<8x32xf32>
    %22 = vector.extract_strided_slice %20 {offsets = [0, 64], sizes = [8, 32], strides = [1, 1]} : vector<8x128xf32> to vector<8x32xf32>
    %23 = vector.extract_strided_slice %17 {offsets = [0, 32], sizes = [8, 32], strides = [1, 1]} : vector<8x128xf32> to vector<8x32xf32>
    %24 = vector.extract_strided_slice %17 {offsets = [0, 96], sizes = [8, 32], strides = [1, 1]} : vector<8x128xf32> to vector<8x32xf32>
    %25 = arith.negf %13 : vector<8x8x32xf32>
    %26 = math.exp %25 : vector<8x8x32xf32>
    %cst = arith.constant 1.000000e+00 : f32
    %27 = vector.broadcast %cst : f32 to vector<8x8x32xf32>
    %28 = arith.addf %27, %26 : vector<8x8x32xf32>
    %29 = arith.divf %27, %28 : vector<8x8x32xf32>
    %30 = vector.shape_cast %23 : vector<8x32xf32> to vector<1x8x32xf32>
    %31 = vector.broadcast %30 : vector<1x8x32xf32> to vector<8x8x32xf32>
    %32 = arith.mulf %29, %31 : vector<8x8x32xf32>
    %cst_11 = arith.constant dense<0.000000e+00> : vector<8x32xf32>
    %33 = vector.multi_reduction <add>, %32, %cst_11 [1] : vector<8x8x32xf32> to vector<8x32xf32>
    %cst_12 = arith.constant 8.000000e+00 : f32
    %34 = vector.broadcast %cst_12 : f32 to vector<8x32xf32>
    %35 = arith.divf %33, %34 : vector<8x32xf32>
    %36 = arith.addf %21, %35 : vector<8x32xf32>
    %c0_13 = arith.constant 0 : index
    %c0_14 = arith.constant 0 : index
    %c0_15 = arith.constant 0 : index
    %37 = vector.load %arg10[%c0_13, %c0_14, %c0_15] : memref<1x8x32xf32, #tpu.memory_space<vmem>>, vector<1x8x32xf32>
    %38 = vector.shape_cast %37 : vector<1x8x32xf32> to vector<8x32xf32>
    %39 = vector.shape_cast %36 : vector<8x32xf32> to vector<1x8x32xf32>
    tpu.vector_store %arg10[%c0_13, %c0_14, %c0_15], %39 {strides = array<i32>} : memref<1x8x32xf32, #tpu.memory_space<vmem>>, vector<1x8x32xf32>,
    %40 = vector.shape_cast %12 : vector<8x8x32xbf16> to vector<64x32xbf16>
    %c0_16 = arith.constant 0 : index
    %c0_17 = arith.constant 0 : index
    %41 = vector.load %arg4[%c0_16, %c0_17] : memref<32x32xbf16, #tpu.memory_space<vmem>>, vector<32x32xbf16>
    %cst_18 = arith.constant dense<0.000000e+00> : vector<64x32xf32>
    %42 = tpu.matmul %40, %41, %cst_18 {dimension_numbers = #tpu.dot_dimension_numbers<[1], [0], [0], [1], [0, 0, 1, 1], [], []>} : vector<64x32xbf16>, vector<32x32xbf16>, vector<64x32xf32> -> vector<64x32xf32>
    %c0_19 = arith.constant 0 : index
    %c0_20 = arith.constant 0 : index
    %43 = vector.load %arg5[%c0_19, %c0_20] : memref<1x32xf32, #tpu.memory_space<vmem>>, vector<1x32xf32>
    %44 = vector.broadcast %43 : vector<1x32xf32> to vector<64x32xf32>
    %45 = arith.addf %42, %44 : vector<64x32xf32>
    %46 = vector.shape_cast %45 : vector<64x32xf32> to vector<8x8x32xf32>
    %47 = vector.shape_cast %22 : vector<8x32xf32> to vector<8x1x32xf32>
    %48 = vector.broadcast %47 : vector<8x1x32xf32> to vector<8x8x32xf32>
    %49 = arith.addf %46, %48 : vector<8x8x32xf32>
    %50 = vector.shape_cast %24 : vector<8x32xf32> to vector<1x8x32xf32>
    %51 = vector.broadcast %50 : vector<1x8x32xf32> to vector<8x8x32xf32>
    %52 = arith.addf %49, %51 : vector<8x8x32xf32>
    %cst_21 = arith.constant dense<0.000000e+00> : vector<32xf32>
    %53 = vector.multi_reduction <add>, %36, %cst_21 [0] : vector<8x32xf32> to vector<32xf32>
    %54 = vector.shape_cast %53 : vector<32xf32> to vector<1x32xf32>
    %55 = arith.mulf %36, %36 : vector<8x32xf32>
    %cst_22 = arith.constant dense<0.000000e+00> : vector<32xf32>
    %56 = vector.multi_reduction <add>, %55, %cst_22 [0] : vector<8x32xf32> to vector<32xf32>
    %57 = vector.shape_cast %56 : vector<32xf32> to vector<1x32xf32>
    %58 = tpu.concatenate %54, %57 in 0 : vector<1x32xf32>, vector<1x32xf32> -> vector<2x32xf32>
    %c0_23 = arith.constant 0 : index
    %c0_24 = arith.constant 0 : index
    %c0_25 = arith.constant 0 : index
    %c0_26 = arith.constant 0 : index
    %59 = vector.load %arg8[%c0_23, %c0_24, %c0_25, %c0_26] : memref<1x1x2x32xf32, #tpu.memory_space<vmem>>, vector<1x1x2x32xf32>
    %60 = vector.shape_cast %59 : vector<1x1x2x32xf32> to vector<2x32xf32>
    %61 = vector.shape_cast %58 : vector<2x32xf32> to vector<1x1x2x32xf32>
    tpu.vector_store %arg8[%c0_23, %c0_24, %c0_25, %c0_26], %61 {strides = array<i32>} : memref<1x1x2x32xf32, #tpu.memory_space<vmem>>, vector<1x1x2x32xf32>,
    %62 = vector.shape_cast %52 : vector<8x8x32xf32> to vector<64x32xf32>
    %cst_27 = arith.constant dense<0.000000e+00> : vector<32xf32>
    %63 = vector.multi_reduction <add>, %62, %cst_27 [0] : vector<64x32xf32> to vector<32xf32>
    %64 = vector.shape_cast %63 : vector<32xf32> to vector<1x32xf32>
    %65 = arith.mulf %62, %62 : vector<64x32xf32>
    %cst_28 = arith.constant dense<0.000000e+00> : vector<32xf32>
    %66 = vector.multi_reduction <add>, %65, %cst_28 [0] : vector<64x32xf32> to vector<32xf32>
    %67 = vector.shape_cast %66 : vector<32xf32> to vector<1x32xf32>
    %68 = tpu.concatenate %64, %67 in 0 : vector<1x32xf32>, vector<1x32xf32> -> vector<2x32xf32>
    %c0_29 = arith.constant 0 : index
    %c0_30 = arith.constant 0 : index
    %c0_31 = arith.constant 0 : index
    %c0_32 = arith.constant 0 : index
    %69 = vector.load %arg9[%c0_29, %c0_30, %c0_31, %c0_32] : memref<1x1x2x32xf32, #tpu.memory_space<vmem>>, vector<1x1x2x32xf32>
    %70 = vector.shape_cast %69 : vector<1x1x2x32xf32> to vector<2x32xf32>
    %71 = vector.shape_cast %68 : vector<2x32xf32> to vector<1x1x2x32xf32>
    tpu.vector_store %arg9[%c0_29, %c0_30, %c0_31, %c0_32], %71 {strides = array<i32>} : memref<1x1x2x32xf32, #tpu.memory_space<vmem>>, vector<1x1x2x32xf32>,
    return
  }
  func.func @transform_0(%arg0: i32, %arg1: i32) -> (i32, i32, i32) {
    %c0_i32 = arith.constant 0 : i32
    %c0_i32_0 = arith.constant 0 : i32
    return %arg0, %arg1, %c0_i32 : i32, i32, i32
  }
  func.func @transform_1(%arg0: i32, %arg1: i32) -> (i32, i32, i32) {
    %c0_i32 = arith.constant 0 : i32
    %c0_i32_0 = arith.constant 0 : i32
    %c0_i32_1 = arith.constant 0 : i32
    return %arg0, %c0_i32, %c0_i32_0 : i32, i32, i32
  }
  func.func @transform_2(%arg0: i32, %arg1: i32) -> (i32, i32) {
    %c0_i32 = arith.constant 0 : i32
    %c0_i32_0 = arith.constant 0 : i32
    %c0_i32_1 = arith.constant 0 : i32
    return %c0_i32, %c0_i32_0 : i32, i32
  }
  func.func @transform_3(%arg0: i32, %arg1: i32) -> (i32, i32) {
    %c0_i32 = arith.constant 0 : i32
    %c0_i32_0 = arith.constant 0 : i32
    %c0_i32_1 = arith.constant 0 : i32
    return %c0_i32, %c0_i32_0 : i32, i32
  }
  func.func @transform_4(%arg0: i32, %arg1: i32) -> (i32, i32) {
    %c0_i32 = arith.constant 0 : i32
    %c0_i32_0 = arith.constant 0 : i32
    %c0_i32_1 = arith.constant 0 : i32
    return %c0_i32, %c0_i32_0 : i32, i32
  }
  func.func @transform_5(%arg0: i32, %arg1: i32) -> (i32, i32) {
    %c0_i32 = arith.constant 0 : i32
    %c0_i32_0 = arith.constant 0 : i32
    %c0_i32_1 = arith.constant 0 : i32
    return %c0_i32, %c0_i32_0 : i32, i32
  }
  func.func @transform_6(%arg0: i32, %arg1: i32) -> (i32, i32, i32, i32) {
    %c0_i32 = arith.constant 0 : i32
    %c0_i32_0 = arith.constant 0 : i32
    %c0_i32_1 = arith.constant 0 : i32
    return %arg0, %arg1, %c0_i32, %c0_i32_0 : i32, i32, i32, i32
  }
  func.func @transform_7(%arg0: i32, %arg1: i32) -> (i32, i32, i32, i32) {
    %c0_i32 = arith.constant 0 : i32
    %c0_i32_0 = arith.constant 0 : i32
    %c0_i32_1 = arith.constant 0 : i32
    return %arg0, %arg1, %c0_i32, %c0_i32_0 : i32, i32, i32, i32
  }
  func.func @transform_8(%arg0: i32, %arg1: i32) -> (i32, i32, i32) {
    %c0_i32 = arith.constant 0 : i32
    %c0_i32_0 = arith.constant 0 : i32
    return %arg0, %arg1, %c0_i32 : i32, i32, i32
  }
}

module attributes {stable_mosaic.version = 11 : i64} {
  func.func @kernel(%arg0: i32, %arg1: i32, %arg2: memref<1x8x8x32xbf16, #tpu.memory_space<vmem>>, %arg3: memref<1x8x128xf32, #tpu.memory_space<vmem>>, %arg4: memref<32x32xbf16, #tpu.memory_space<vmem>>, %arg5: memref<1x32xf32, #tpu.memory_space<vmem>>, %arg6: memref<1x1x2x32xf32, #tpu.memory_space<vmem>>, %arg7: memref<1x1x2x32xf32, #tpu.memory_space<vmem>>, %arg8: memref<1x8x32xf32, #tpu.memory_space<vmem>>) attributes {dimension_semantics = [#tpu.dimension_semantics<parallel>, #tpu.dimension_semantics<parallel>], iteration_bounds = array<i64: 2, 1>, scalar_prefetch = 0 : i64, scratch_operands = 0 : i64, tpu.core_type = #tpu.core_type<tc>, window_params = [{transform_indices = @transform_0, window_bounds = array<i64: 1, 8, 8, 32>}, {transform_indices = @transform_1, window_bounds = array<i64: 1, 8, 128>}, {pipeline_mode = #tpu.pipeline_mode<synchronous>, transform_indices = @transform_2, window_bounds = array<i64: 32, 32>}, {pipeline_mode = #tpu.pipeline_mode<synchronous>, transform_indices = @transform_3, window_bounds = array<i64: 1, 32>}, {transform_indices = @transform_4, window_bounds = array<i64: 1, 1, 2, 32>}, {transform_indices = @transform_5, window_bounds = array<i64: 1, 1, 2, 32>}, {transform_indices = @transform_6, window_bounds = array<i64: 1, 8, 32>}]} {
    %c0 = arith.constant 0 : index
    %c0_0 = arith.constant 0 : index
    %c0_1 = arith.constant 0 : index
    %c0_2 = arith.constant 0 : index
    %0 = vector.load %arg2[%c0, %c0_0, %c0_1, %c0_2] : memref<1x8x8x32xbf16, #tpu.memory_space<vmem>>, vector<1x8x8x32xbf16>
    %1 = vector.shape_cast %0 : vector<1x8x8x32xbf16> to vector<8x8x32xbf16>
    %2 = arith.extf %1 : vector<8x8x32xbf16> to vector<8x8x32xf32>
    %c8_i32 = arith.constant 8 : i32
    %3 = arith.muli %arg1, %c8_i32 : i32
    %4 = tpu.assume_multiple %3, 8 : i32
    %c0_3 = arith.constant 0 : index
    %c0_4 = arith.constant 0 : index
    %c0_5 = arith.constant 0 : index
    %5 = vector.load %arg3[%c0_3, %c0_4, %c0_5] : memref<1x8x128xf32, #tpu.memory_space<vmem>>, vector<1x8x128xf32>
    %6 = vector.shape_cast %5 : vector<1x8x128xf32> to vector<8x128xf32>
    %c0_6 = arith.constant 0 : index
    %7 = arith.index_cast %4 : i32 to index
    %c0_7 = arith.constant 0 : index
    %8 = vector.load %arg3[%c0_6, %7, %c0_7] : memref<1x8x128xf32, #tpu.memory_space<vmem>>, vector<1x8x128xf32>
    %9 = vector.shape_cast %8 : vector<1x8x128xf32> to vector<8x128xf32>
    %10 = vector.extract_strided_slice %9 {offsets = [0, 0], sizes = [8, 32], strides = [1, 1]} : vector<8x128xf32> to vector<8x32xf32>
    %11 = vector.extract_strided_slice %9 {offsets = [0, 64], sizes = [8, 32], strides = [1, 1]} : vector<8x128xf32> to vector<8x32xf32>
    %12 = vector.extract_strided_slice %6 {offsets = [0, 32], sizes = [8, 32], strides = [1, 1]} : vector<8x128xf32> to vector<8x32xf32>
    %13 = vector.extract_strided_slice %6 {offsets = [0, 96], sizes = [8, 32], strides = [1, 1]} : vector<8x128xf32> to vector<8x32xf32>
    %14 = arith.negf %2 : vector<8x8x32xf32>
    %15 = math.exp %14 : vector<8x8x32xf32>
    %cst = arith.constant 1.000000e+00 : f32
    %16 = vector.broadcast %cst : f32 to vector<8x8x32xf32>
    %17 = arith.addf %16, %15 : vector<8x8x32xf32>
    %18 = arith.divf %16, %17 : vector<8x8x32xf32>
    %19 = vector.shape_cast %12 : vector<8x32xf32> to vector<1x8x32xf32>
    %20 = vector.broadcast %19 : vector<1x8x32xf32> to vector<8x8x32xf32>
    %21 = arith.mulf %18, %20 : vector<8x8x32xf32>
    %cst_8 = arith.constant dense<0.000000e+00> : vector<8x32xf32>
    %22 = vector.multi_reduction <add>, %21, %cst_8 [1] : vector<8x8x32xf32> to vector<8x32xf32>
    %cst_9 = arith.constant 8.000000e+00 : f32
    %23 = vector.broadcast %cst_9 : f32 to vector<8x32xf32>
    %24 = arith.divf %22, %23 : vector<8x32xf32>
    %25 = arith.addf %10, %24 : vector<8x32xf32>
    %c0_10 = arith.constant 0 : index
    %c0_11 = arith.constant 0 : index
    %c0_12 = arith.constant 0 : index
    %26 = vector.load %arg8[%c0_10, %c0_11, %c0_12] : memref<1x8x32xf32, #tpu.memory_space<vmem>>, vector<1x8x32xf32>
    %27 = vector.shape_cast %26 : vector<1x8x32xf32> to vector<8x32xf32>
    %28 = vector.shape_cast %25 : vector<8x32xf32> to vector<1x8x32xf32>
    tpu.vector_store %arg8[%c0_10, %c0_11, %c0_12], %28 {strides = array<i32>} : memref<1x8x32xf32, #tpu.memory_space<vmem>>, vector<1x8x32xf32>,
    %29 = vector.shape_cast %1 : vector<8x8x32xbf16> to vector<64x32xbf16>
    %c0_13 = arith.constant 0 : index
    %c0_14 = arith.constant 0 : index
    %30 = vector.load %arg4[%c0_13, %c0_14] : memref<32x32xbf16, #tpu.memory_space<vmem>>, vector<32x32xbf16>
    %cst_15 = arith.constant dense<0.000000e+00> : vector<64x32xf32>
    %31 = tpu.matmul %29, %30, %cst_15 {dimension_numbers = #tpu.dot_dimension_numbers<[1], [0], [0], [1], [0, 0, 1, 1], [], []>} : vector<64x32xbf16>, vector<32x32xbf16>, vector<64x32xf32> -> vector<64x32xf32>
    %c0_16 = arith.constant 0 : index
    %c0_17 = arith.constant 0 : index
    %32 = vector.load %arg5[%c0_16, %c0_17] : memref<1x32xf32, #tpu.memory_space<vmem>>, vector<1x32xf32>
    %33 = vector.broadcast %32 : vector<1x32xf32> to vector<64x32xf32>
    %34 = arith.addf %31, %33 : vector<64x32xf32>
    %35 = vector.shape_cast %34 : vector<64x32xf32> to vector<8x8x32xf32>
    %36 = vector.shape_cast %11 : vector<8x32xf32> to vector<8x1x32xf32>
    %37 = vector.broadcast %36 : vector<8x1x32xf32> to vector<8x8x32xf32>
    %38 = arith.addf %35, %37 : vector<8x8x32xf32>
    %39 = vector.shape_cast %13 : vector<8x32xf32> to vector<1x8x32xf32>
    %40 = vector.broadcast %39 : vector<1x8x32xf32> to vector<8x8x32xf32>
    %41 = arith.addf %38, %40 : vector<8x8x32xf32>
    %cst_18 = arith.constant dense<0.000000e+00> : vector<32xf32>
    %42 = vector.multi_reduction <add>, %25, %cst_18 [0] : vector<8x32xf32> to vector<32xf32>
    %43 = vector.shape_cast %42 : vector<32xf32> to vector<1x32xf32>
    %44 = arith.mulf %25, %25 : vector<8x32xf32>
    %cst_19 = arith.constant dense<0.000000e+00> : vector<32xf32>
    %45 = vector.multi_reduction <add>, %44, %cst_19 [0] : vector<8x32xf32> to vector<32xf32>
    %46 = vector.shape_cast %45 : vector<32xf32> to vector<1x32xf32>
    %47 = tpu.concatenate %43, %46 in 0 : vector<1x32xf32>, vector<1x32xf32> -> vector<2x32xf32>
    %c0_20 = arith.constant 0 : index
    %c0_21 = arith.constant 0 : index
    %c0_22 = arith.constant 0 : index
    %c0_23 = arith.constant 0 : index
    %48 = vector.load %arg6[%c0_20, %c0_21, %c0_22, %c0_23] : memref<1x1x2x32xf32, #tpu.memory_space<vmem>>, vector<1x1x2x32xf32>
    %49 = vector.shape_cast %48 : vector<1x1x2x32xf32> to vector<2x32xf32>
    %50 = vector.shape_cast %47 : vector<2x32xf32> to vector<1x1x2x32xf32>
    tpu.vector_store %arg6[%c0_20, %c0_21, %c0_22, %c0_23], %50 {strides = array<i32>} : memref<1x1x2x32xf32, #tpu.memory_space<vmem>>, vector<1x1x2x32xf32>,
    %51 = vector.shape_cast %41 : vector<8x8x32xf32> to vector<64x32xf32>
    %cst_24 = arith.constant dense<0.000000e+00> : vector<32xf32>
    %52 = vector.multi_reduction <add>, %51, %cst_24 [0] : vector<64x32xf32> to vector<32xf32>
    %53 = vector.shape_cast %52 : vector<32xf32> to vector<1x32xf32>
    %54 = arith.mulf %51, %51 : vector<64x32xf32>
    %cst_25 = arith.constant dense<0.000000e+00> : vector<32xf32>
    %55 = vector.multi_reduction <add>, %54, %cst_25 [0] : vector<64x32xf32> to vector<32xf32>
    %56 = vector.shape_cast %55 : vector<32xf32> to vector<1x32xf32>
    %57 = tpu.concatenate %53, %56 in 0 : vector<1x32xf32>, vector<1x32xf32> -> vector<2x32xf32>
    %c0_26 = arith.constant 0 : index
    %c0_27 = arith.constant 0 : index
    %c0_28 = arith.constant 0 : index
    %c0_29 = arith.constant 0 : index
    %58 = vector.load %arg7[%c0_26, %c0_27, %c0_28, %c0_29] : memref<1x1x2x32xf32, #tpu.memory_space<vmem>>, vector<1x1x2x32xf32>
    %59 = vector.shape_cast %58 : vector<1x1x2x32xf32> to vector<2x32xf32>
    %60 = vector.shape_cast %57 : vector<2x32xf32> to vector<1x1x2x32xf32>
    tpu.vector_store %arg7[%c0_26, %c0_27, %c0_28, %c0_29], %60 {strides = array<i32>} : memref<1x1x2x32xf32, #tpu.memory_space<vmem>>, vector<1x1x2x32xf32>,
    return
  }
  func.func @transform_0(%arg0: i32, %arg1: i32) -> (i32, i32, i32, i32) {
    %c0_i32 = arith.constant 0 : i32
    %c0_i32_0 = arith.constant 0 : i32
    %c0_i32_1 = arith.constant 0 : i32
    return %arg0, %arg1, %c0_i32, %c0_i32_0 : i32, i32, i32, i32
  }
  func.func @transform_1(%arg0: i32, %arg1: i32) -> (i32, i32, i32) {
    %c0_i32 = arith.constant 0 : i32
    %c0_i32_0 = arith.constant 0 : i32
    %c0_i32_1 = arith.constant 0 : i32
    return %arg0, %c0_i32, %c0_i32_0 : i32, i32, i32
  }
  func.func @transform_2(%arg0: i32, %arg1: i32) -> (i32, i32) {
    %c0_i32 = arith.constant 0 : i32
    %c0_i32_0 = arith.constant 0 : i32
    %c0_i32_1 = arith.constant 0 : i32
    return %c0_i32, %c0_i32_0 : i32, i32
  }
  func.func @transform_3(%arg0: i32, %arg1: i32) -> (i32, i32) {
    %c0_i32 = arith.constant 0 : i32
    %c0_i32_0 = arith.constant 0 : i32
    %c0_i32_1 = arith.constant 0 : i32
    return %c0_i32, %c0_i32_0 : i32, i32
  }
  func.func @transform_4(%arg0: i32, %arg1: i32) -> (i32, i32, i32, i32) {
    %c0_i32 = arith.constant 0 : i32
    %c0_i32_0 = arith.constant 0 : i32
    %c0_i32_1 = arith.constant 0 : i32
    return %arg0, %arg1, %c0_i32, %c0_i32_0 : i32, i32, i32, i32
  }
  func.func @transform_5(%arg0: i32, %arg1: i32) -> (i32, i32, i32, i32) {
    %c0_i32 = arith.constant 0 : i32
    %c0_i32_0 = arith.constant 0 : i32
    %c0_i32_1 = arith.constant 0 : i32
    return %arg0, %arg1, %c0_i32, %c0_i32_0 : i32, i32, i32, i32
  }
  func.func @transform_6(%arg0: i32, %arg1: i32) -> (i32, i32, i32) {
    %c0_i32 = arith.constant 0 : i32
    %c0_i32_0 = arith.constant 0 : i32
    return %arg0, %arg1, %c0_i32 : i32, i32, i32
  }
}

module attributes {stable_mosaic.version = 11 : i64} {
  func.func @kernel(%arg0: i32, %arg1: i32, %arg2: memref<1x8x8xf32, #tpu.memory_space<vmem>>, %arg3: memref<1x8x128xf32, #tpu.memory_space<vmem>>, %arg4: memref<1x8x32xf32, #tpu.memory_space<vmem>>, %arg5: memref<1x8x32xf32, #tpu.memory_space<vmem>>, %arg6: memref<32x32xbf16, #tpu.memory_space<vmem>>, %arg7: memref<1x32xf32, #tpu.memory_space<vmem>>, %arg8: memref<1x32xf32, #tpu.memory_space<vmem>>, %arg9: memref<1x32xf32, #tpu.memory_space<vmem>>, %arg10: memref<1x32xf32, #tpu.memory_space<vmem>>, %arg11: memref<1x32xf32, #tpu.memory_space<vmem>>, %arg12: memref<1x32xf32, #tpu.memory_space<vmem>>, %arg13: memref<1x32xf32, #tpu.memory_space<vmem>>, %arg14: memref<1x8x32xf32, #tpu.memory_space<vmem>>, %arg15: memref<1x8x8x32xbf16, #tpu.memory_space<vmem>>) attributes {dimension_semantics = [#tpu.dimension_semantics<parallel>, #tpu.dimension_semantics<parallel>], iteration_bounds = array<i64: 2, 1>, scalar_prefetch = 0 : i64, scratch_operands = 0 : i64, tpu.core_type = #tpu.core_type<tc>, window_params = [{transform_indices = @transform_0, window_bounds = array<i64: 1, 8, 8>}, {transform_indices = @transform_1, window_bounds = array<i64: 1, 8, 128>}, {transform_indices = @transform_2, window_bounds = array<i64: 1, 8, 32>}, {transform_indices = @transform_3, window_bounds = array<i64: 1, 8, 32>}, {pipeline_mode = #tpu.pipeline_mode<synchronous>, transform_indices = @transform_4, window_bounds = array<i64: 32, 32>}, {pipeline_mode = #tpu.pipeline_mode<synchronous>, transform_indices = @transform_5, window_bounds = array<i64: 1, 32>}, {pipeline_mode = #tpu.pipeline_mode<synchronous>, transform_indices = @transform_6, window_bounds = array<i64: 1, 32>}, {pipeline_mode = #tpu.pipeline_mode<synchronous>, transform_indices = @transform_7, window_bounds = array<i64: 1, 32>}, {pipeline_mode = #tpu.pipeline_mode<synchronous>, transform_indices = @transform_8, window_bounds = array<i64: 1, 32>}, {pipeline_mode = #tpu.pipeline_mode<synchronous>, transform_indices = @transform_9, window_bounds = array<i64: 1, 32>}, {pipeline_mode = #tpu.pipeline_mode<synchronous>, transform_indices = @transform_10, window_bounds = array<i64: 1, 32>}, {pipeline_mode = #tpu.pipeline_mode<synchronous>, transform_indices = @transform_11, window_bounds = array<i64: 1, 32>}, {transform_indices = @transform_12, window_bounds = array<i64: 1, 8, 32>}, {transform_indices = @transform_13, window_bounds = array<i64: 1, 8, 8, 32>}]} {
    %c0 = arith.constant 0 : index
    %c0_0 = arith.constant 0 : index
    %c0_1 = arith.constant 0 : index
    %0 = vector.load %arg2[%c0, %c0_0, %c0_1] : memref<1x8x8xf32, #tpu.memory_space<vmem>>, vector<1x8x8xf32>
    %1 = vector.shape_cast %0 : vector<1x8x8xf32> to vector<8x8xf32>
    %2 = vector.shape_cast %1 : vector<8x8xf32> to vector<8x8x1xf32>
    %c0_2 = arith.constant 0 : index
    %c0_3 = arith.constant 0 : index
    %3 = vector.load %arg12[%c0_2, %c0_3] : memref<1x32xf32, #tpu.memory_space<vmem>>, vector<1x32xf32>
    %4 = vector.shape_cast %3 : vector<1x32xf32> to vector<1x1x32xf32>
    %5 = vector.broadcast %2 : vector<8x8x1xf32> to vector<8x8x32xf32>
    %6 = vector.broadcast %4 : vector<1x1x32xf32> to vector<8x8x32xf32>
    %7 = arith.mulf %5, %6 : vector<8x8x32xf32>
    %c0_4 = arith.constant 0 : index
    %c0_5 = arith.constant 0 : index
    %8 = vector.load %arg13[%c0_4, %c0_5] : memref<1x32xf32, #tpu.memory_space<vmem>>, vector<1x32xf32>
    %9 = vector.shape_cast %8 : vector<1x32xf32> to vector<1x1x32xf32>
    %10 = vector.broadcast %9 : vector<1x1x32xf32> to vector<8x8x32xf32>
    %11 = arith.addf %7, %10 : vector<8x8x32xf32>
    %12 = arith.truncf %11 : vector<8x8x32xf32> to vector<8x8x32xbf16>
    %13 = arith.extf %12 : vector<8x8x32xbf16> to vector<8x8x32xf32>
    %c8_i32 = arith.constant 8 : i32
    %14 = arith.muli %arg1, %c8_i32 : i32
    %15 = tpu.assume_multiple %14, 8 : i32
    %c0_6 = arith.constant 0 : index
    %c0_7 = arith.constant 0 : index
    %c0_8 = arith.constant 0 : index
    %16 = vector.load %arg3[%c0_6, %c0_7, %c0_8] : memref<1x8x128xf32, #tpu.memory_space<vmem>>, vector<1x8x128xf32>
    %17 = vector.shape_cast %16 : vector<1x8x128xf32> to vector<8x128xf32>
    %c0_9 = arith.constant 0 : index
    %18 = arith.index_cast %15 : i32 to index
    %c0_10 = arith.constant 0 : index
    %19 = vector.load %arg3[%c0_9, %18, %c0_10] : memref<1x8x128xf32, #tpu.memory_space<vmem>>, vector<1x8x128xf32>
    %20 = vector.shape_cast %19 : vector<1x8x128xf32> to vector<8x128xf32>
    %21 = vector.extract_strided_slice %20 {offsets = [0, 64], sizes = [8, 32], strides = [1, 1]} : vector<8x128xf32> to vector<8x32xf32>
    %22 = vector.extract_strided_slice %17 {offsets = [0, 96], sizes = [8, 32], strides = [1, 1]} : vector<8x128xf32> to vector<8x32xf32>
    %c0_11 = arith.constant 0 : index
    %c0_12 = arith.constant 0 : index
    %c0_13 = arith.constant 0 : index
    %23 = vector.load %arg5[%c0_11, %c0_12, %c0_13] : memref<1x8x32xf32, #tpu.memory_space<vmem>>, vector<1x8x32xf32>
    %24 = vector.shape_cast %23 : vector<1x8x32xf32> to vector<8x32xf32>
    %c0_14 = arith.constant 0 : index
    %c0_15 = arith.constant 0 : index
    %25 = vector.load %arg8[%c0_14, %c0_15] : memref<1x32xf32, #tpu.memory_space<vmem>>, vector<1x32xf32>
    %26 = vector.broadcast %25 : vector<1x32xf32> to vector<8x32xf32>
    %27 = arith.mulf %24, %26 : vector<8x32xf32>
    %c0_16 = arith.constant 0 : index
    %c0_17 = arith.constant 0 : index
    %28 = vector.load %arg9[%c0_16, %c0_17] : memref<1x32xf32, #tpu.memory_space<vmem>>, vector<1x32xf32>
    %29 = vector.broadcast %28 : vector<1x32xf32> to vector<8x32xf32>
    %30 = arith.addf %27, %29 : vector<8x32xf32>
    %c0_18 = arith.constant 0 : index
    %c0_19 = arith.constant 0 : index
    %c0_20 = arith.constant 0 : index
    %31 = vector.load %arg4[%c0_18, %c0_19, %c0_20] : memref<1x8x32xf32, #tpu.memory_space<vmem>>, vector<1x8x32xf32>
    %32 = vector.shape_cast %31 : vector<1x8x32xf32> to vector<8x32xf32>
    %33 = arith.negf %30 : vector<8x32xf32>
    %34 = math.exp %33 : vector<8x32xf32>
    %cst = arith.constant 1.000000e+00 : f32
    %35 = vector.broadcast %cst : f32 to vector<8x32xf32>
    %36 = arith.addf %35, %34 : vector<8x32xf32>
    %37 = arith.divf %35, %36 : vector<8x32xf32>
    %38 = arith.mulf %30, %37 : vector<8x32xf32>
    %39 = arith.addf %32, %38 : vector<8x32xf32>
    %c0_21 = arith.constant 0 : index
    %c0_22 = arith.constant 0 : index
    %c0_23 = arith.constant 0 : index
    %40 = vector.load %arg14[%c0_21, %c0_22, %c0_23] : memref<1x8x32xf32, #tpu.memory_space<vmem>>, vector<1x8x32xf32>
    %41 = vector.shape_cast %40 : vector<1x8x32xf32> to vector<8x32xf32>
    %42 = vector.shape_cast %39 : vector<8x32xf32> to vector<1x8x32xf32>
    tpu.vector_store %arg14[%c0_21, %c0_22, %c0_23], %42 {strides = array<i32>} : memref<1x8x32xf32, #tpu.memory_space<vmem>>, vector<1x8x32xf32>,
    %43 = vector.shape_cast %12 : vector<8x8x32xbf16> to vector<64x32xbf16>
    %c0_24 = arith.constant 0 : index
    %c0_25 = arith.constant 0 : index
    %44 = vector.load %arg6[%c0_24, %c0_25] : memref<32x32xbf16, #tpu.memory_space<vmem>>, vector<32x32xbf16>
    %cst_26 = arith.constant dense<0.000000e+00> : vector<64x32xf32>
    %45 = tpu.matmul %43, %44, %cst_26 {dimension_numbers = #tpu.dot_dimension_numbers<[1], [0], [0], [1], [0, 0, 1, 1], [], []>} : vector<64x32xbf16>, vector<32x32xbf16>, vector<64x32xf32> -> vector<64x32xf32>
    %c0_27 = arith.constant 0 : index
    %c0_28 = arith.constant 0 : index
    %46 = vector.load %arg7[%c0_27, %c0_28] : memref<1x32xf32, #tpu.memory_space<vmem>>, vector<1x32xf32>
    %47 = vector.broadcast %46 : vector<1x32xf32> to vector<64x32xf32>
    %48 = arith.addf %45, %47 : vector<64x32xf32>
    %49 = vector.shape_cast %48 : vector<64x32xf32> to vector<8x8x32xf32>
    %50 = vector.shape_cast %21 : vector<8x32xf32> to vector<8x1x32xf32>
    %51 = vector.broadcast %50 : vector<8x1x32xf32> to vector<8x8x32xf32>
    %52 = arith.addf %49, %51 : vector<8x8x32xf32>
    %53 = vector.shape_cast %22 : vector<8x32xf32> to vector<1x8x32xf32>
    %54 = vector.broadcast %53 : vector<1x8x32xf32> to vector<8x8x32xf32>
    %55 = arith.addf %52, %54 : vector<8x8x32xf32>
    %c0_29 = arith.constant 0 : index
    %c0_30 = arith.constant 0 : index
    %56 = vector.load %arg10[%c0_29, %c0_30] : memref<1x32xf32, #tpu.memory_space<vmem>>, vector<1x32xf32>
    %57 = vector.shape_cast %56 : vector<1x32xf32> to vector<1x1x32xf32>
    %58 = vector.broadcast %57 : vector<1x1x32xf32> to vector<8x8x32xf32>
    %59 = arith.mulf %55, %58 : vector<8x8x32xf32>
    %c0_31 = arith.constant 0 : index
    %c0_32 = arith.constant 0 : index
    %60 = vector.load %arg11[%c0_31, %c0_32] : memref<1x32xf32, #tpu.memory_space<vmem>>, vector<1x32xf32>
    %61 = vector.shape_cast %60 : vector<1x32xf32> to vector<1x1x32xf32>
    %62 = vector.broadcast %61 : vector<1x1x32xf32> to vector<8x8x32xf32>
    %63 = arith.addf %59, %62 : vector<8x8x32xf32>
    %64 = arith.negf %63 : vector<8x8x32xf32>
    %65 = math.exp %64 : vector<8x8x32xf32>
    %cst_33 = arith.constant 1.000000e+00 : f32
    %66 = vector.broadcast %cst_33 : f32 to vector<8x8x32xf32>
    %67 = arith.addf %66, %65 : vector<8x8x32xf32>
    %68 = arith.divf %66, %67 : vector<8x8x32xf32>
    %69 = arith.mulf %63, %68 : vector<8x8x32xf32>
    %70 = arith.addf %13, %69 : vector<8x8x32xf32>
    %71 = arith.truncf %70 : vector<8x8x32xf32> to vector<8x8x32xbf16>
    %c0_34 = arith.constant 0 : index
    %c0_35 = arith.constant 0 : index
    %c0_36 = arith.constant 0 : index
    %c0_37 = arith.constant 0 : index
    %72 = vector.load %arg15[%c0_34, %c0_35, %c0_36, %c0_37] : memref<1x8x8x32xbf16, #tpu.memory_space<vmem>>, vector<1x8x8x32xbf16>
    %73 = vector.shape_cast %72 : vector<1x8x8x32xbf16> to vector<8x8x32xbf16>
    %74 = vector.shape_cast %71 : vector<8x8x32xbf16> to vector<1x8x8x32xbf16>
    tpu.vector_store %arg15[%c0_34, %c0_35, %c0_36, %c0_37], %74 {strides = array<i32>} : memref<1x8x8x32xbf16, #tpu.memory_space<vmem>>, vector<1x8x8x32xbf16>,
    return
  }
  func.func @transform_0(%arg0: i32, %arg1: i32) -> (i32, i32, i32) {
    %c0_i32 = arith.constant 0 : i32
    %c0_i32_0 = arith.constant 0 : i32
    return %arg0, %arg1, %c0_i32 : i32, i32, i32
  }
  func.func @transform_1(%arg0: i32, %arg1: i32) -> (i32, i32, i32) {
    %c0_i32 = arith.constant 0 : i32
    %c0_i32_0 = arith.constant 0 : i32
    %c0_i32_1 = arith.constant 0 : i32
    return %arg0, %c0_i32, %c0_i32_0 : i32, i32, i32
  }
  func.func @transform_2(%arg0: i32, %arg1: i32) -> (i32, i32, i32) {
    %c0_i32 = arith.constant 0 : i32
    %c0_i32_0 = arith.constant 0 : i32
    return %arg0, %arg1, %c0_i32 : i32, i32, i32
  }
  func.func @transform_3(%arg0: i32, %arg1: i32) -> (i32, i32, i32) {
    %c0_i32 = arith.constant 0 : i32
    %c0_i32_0 = arith.constant 0 : i32
    return %arg0, %arg1, %c0_i32 : i32, i32, i32
  }
  func.func @transform_4(%arg0: i32, %arg1: i32) -> (i32, i32) {
    %c0_i32 = arith.constant 0 : i32
    %c0_i32_0 = arith.constant 0 : i32
    %c0_i32_1 = arith.constant 0 : i32
    return %c0_i32, %c0_i32_0 : i32, i32
  }
  func.func @transform_5(%arg0: i32, %arg1: i32) -> (i32, i32) {
    %c0_i32 = arith.constant 0 : i32
    %c0_i32_0 = arith.constant 0 : i32
    %c0_i32_1 = arith.constant 0 : i32
    return %c0_i32, %c0_i32_0 : i32, i32
  }
  func.func @transform_6(%arg0: i32, %arg1: i32) -> (i32, i32) {
    %c0_i32 = arith.constant 0 : i32
    %c0_i32_0 = arith.constant 0 : i32
    %c0_i32_1 = arith.constant 0 : i32
    return %c0_i32, %c0_i32_0 : i32, i32
  }
  func.func @transform_7(%arg0: i32, %arg1: i32) -> (i32, i32) {
    %c0_i32 = arith.constant 0 : i32
    %c0_i32_0 = arith.constant 0 : i32
    %c0_i32_1 = arith.constant 0 : i32
    return %c0_i32, %c0_i32_0 : i32, i32
  }
  func.func @transform_8(%arg0: i32, %arg1: i32) -> (i32, i32) {
    %c0_i32 = arith.constant 0 : i32
    %c0_i32_0 = arith.constant 0 : i32
    %c0_i32_1 = arith.constant 0 : i32
    return %c0_i32, %c0_i32_0 : i32, i32
  }
  func.func @transform_9(%arg0: i32, %arg1: i32) -> (i32, i32) {
    %c0_i32 = arith.constant 0 : i32
    %c0_i32_0 = arith.constant 0 : i32
    %c0_i32_1 = arith.constant 0 : i32
    return %c0_i32, %c0_i32_0 : i32, i32
  }
  func.func @transform_10(%arg0: i32, %arg1: i32) -> (i32, i32) {
    %c0_i32 = arith.constant 0 : i32
    %c0_i32_0 = arith.constant 0 : i32
    %c0_i32_1 = arith.constant 0 : i32
    return %c0_i32, %c0_i32_0 : i32, i32
  }
  func.func @transform_11(%arg0: i32, %arg1: i32) -> (i32, i32) {
    %c0_i32 = arith.constant 0 : i32
    %c0_i32_0 = arith.constant 0 : i32
    %c0_i32_1 = arith.constant 0 : i32
    return %c0_i32, %c0_i32_0 : i32, i32
  }
  func.func @transform_12(%arg0: i32, %arg1: i32) -> (i32, i32, i32) {
    %c0_i32 = arith.constant 0 : i32
    %c0_i32_0 = arith.constant 0 : i32
    return %arg0, %arg1, %c0_i32 : i32, i32, i32
  }
  func.func @transform_13(%arg0: i32, %arg1: i32) -> (i32, i32, i32, i32) {
    %c0_i32 = arith.constant 0 : i32
    %c0_i32_0 = arith.constant 0 : i32
    %c0_i32_1 = arith.constant 0 : i32
    return %arg0, %arg1, %c0_i32, %c0_i32_0 : i32, i32, i32, i32
  }
}

module attributes {stable_mosaic.version = 11 : i64} {
  func.func @kernel(%arg0: i32, %arg1: i32, %arg2: memref<1x8x8x32xbf16, #tpu.memory_space<vmem>>, %arg3: memref<1x8x128xf32, #tpu.memory_space<vmem>>, %arg4: memref<1x8x32xf32, #tpu.memory_space<vmem>>, %arg5: memref<1x8x32xf32, #tpu.memory_space<vmem>>, %arg6: memref<32x32xbf16, #tpu.memory_space<vmem>>, %arg7: memref<1x32xf32, #tpu.memory_space<vmem>>, %arg8: memref<1x32xf32, #tpu.memory_space<vmem>>, %arg9: memref<1x32xf32, #tpu.memory_space<vmem>>, %arg10: memref<1x32xf32, #tpu.memory_space<vmem>>, %arg11: memref<1x32xf32, #tpu.memory_space<vmem>>, %arg12: memref<1x8x32xf32, #tpu.memory_space<vmem>>, %arg13: memref<1x8x8x32xbf16, #tpu.memory_space<vmem>>) attributes {dimension_semantics = [#tpu.dimension_semantics<parallel>, #tpu.dimension_semantics<parallel>], iteration_bounds = array<i64: 2, 1>, scalar_prefetch = 0 : i64, scratch_operands = 0 : i64, tpu.core_type = #tpu.core_type<tc>, window_params = [{transform_indices = @transform_0, window_bounds = array<i64: 1, 8, 8, 32>}, {transform_indices = @transform_1, window_bounds = array<i64: 1, 8, 128>}, {transform_indices = @transform_2, window_bounds = array<i64: 1, 8, 32>}, {transform_indices = @transform_3, window_bounds = array<i64: 1, 8, 32>}, {pipeline_mode = #tpu.pipeline_mode<synchronous>, transform_indices = @transform_4, window_bounds = array<i64: 32, 32>}, {pipeline_mode = #tpu.pipeline_mode<synchronous>, transform_indices = @transform_5, window_bounds = array<i64: 1, 32>}, {pipeline_mode = #tpu.pipeline_mode<synchronous>, transform_indices = @transform_6, window_bounds = array<i64: 1, 32>}, {pipeline_mode = #tpu.pipeline_mode<synchronous>, transform_indices = @transform_7, window_bounds = array<i64: 1, 32>}, {pipeline_mode = #tpu.pipeline_mode<synchronous>, transform_indices = @transform_8, window_bounds = array<i64: 1, 32>}, {pipeline_mode = #tpu.pipeline_mode<synchronous>, transform_indices = @transform_9, window_bounds = array<i64: 1, 32>}, {transform_indices = @transform_10, window_bounds = array<i64: 1, 8, 32>}, {transform_indices = @transform_11, window_bounds = array<i64: 1, 8, 8, 32>}]} {
    %c0 = arith.constant 0 : index
    %c0_0 = arith.constant 0 : index
    %c0_1 = arith.constant 0 : index
    %c0_2 = arith.constant 0 : index
    %0 = vector.load %arg2[%c0, %c0_0, %c0_1, %c0_2] : memref<1x8x8x32xbf16, #tpu.memory_space<vmem>>, vector<1x8x8x32xbf16>
    %1 = vector.shape_cast %0 : vector<1x8x8x32xbf16> to vector<8x8x32xbf16>
    %2 = arith.extf %1 : vector<8x8x32xbf16> to vector<8x8x32xf32>
    %c8_i32 = arith.constant 8 : i32
    %3 = arith.muli %arg1, %c8_i32 : i32
    %4 = tpu.assume_multiple %3, 8 : i32
    %c0_3 = arith.constant 0 : index
    %c0_4 = arith.constant 0 : index
    %c0_5 = arith.constant 0 : index
    %5 = vector.load %arg3[%c0_3, %c0_4, %c0_5] : memref<1x8x128xf32, #tpu.memory_space<vmem>>, vector<1x8x128xf32>
    %6 = vector.shape_cast %5 : vector<1x8x128xf32> to vector<8x128xf32>
    %c0_6 = arith.constant 0 : index
    %7 = arith.index_cast %4 : i32 to index
    %c0_7 = arith.constant 0 : index
    %8 = vector.load %arg3[%c0_6, %7, %c0_7] : memref<1x8x128xf32, #tpu.memory_space<vmem>>, vector<1x8x128xf32>
    %9 = vector.shape_cast %8 : vector<1x8x128xf32> to vector<8x128xf32>
    %10 = vector.extract_strided_slice %9 {offsets = [0, 64], sizes = [8, 32], strides = [1, 1]} : vector<8x128xf32> to vector<8x32xf32>
    %11 = vector.extract_strided_slice %6 {offsets = [0, 96], sizes = [8, 32], strides = [1, 1]} : vector<8x128xf32> to vector<8x32xf32>
    %c0_8 = arith.constant 0 : index
    %c0_9 = arith.constant 0 : index
    %c0_10 = arith.constant 0 : index
    %12 = vector.load %arg5[%c0_8, %c0_9, %c0_10] : memref<1x8x32xf32, #tpu.memory_space<vmem>>, vector<1x8x32xf32>
    %13 = vector.shape_cast %12 : vector<1x8x32xf32> to vector<8x32xf32>
    %c0_11 = arith.constant 0 : index
    %c0_12 = arith.constant 0 : index
    %14 = vector.load %arg8[%c0_11, %c0_12] : memref<1x32xf32, #tpu.memory_space<vmem>>, vector<1x32xf32>
    %15 = vector.broadcast %14 : vector<1x32xf32> to vector<8x32xf32>
    %16 = arith.mulf %13, %15 : vector<8x32xf32>
    %c0_13 = arith.constant 0 : index
    %c0_14 = arith.constant 0 : index
    %17 = vector.load %arg9[%c0_13, %c0_14] : memref<1x32xf32, #tpu.memory_space<vmem>>, vector<1x32xf32>
    %18 = vector.broadcast %17 : vector<1x32xf32> to vector<8x32xf32>
    %19 = arith.addf %16, %18 : vector<8x32xf32>
    %c0_15 = arith.constant 0 : index
    %c0_16 = arith.constant 0 : index
    %c0_17 = arith.constant 0 : index
    %20 = vector.load %arg4[%c0_15, %c0_16, %c0_17] : memref<1x8x32xf32, #tpu.memory_space<vmem>>, vector<1x8x32xf32>
    %21 = vector.shape_cast %20 : vector<1x8x32xf32> to vector<8x32xf32>
    %22 = arith.negf %19 : vector<8x32xf32>
    %23 = math.exp %22 : vector<8x32xf32>
    %cst = arith.constant 1.000000e+00 : f32
    %24 = vector.broadcast %cst : f32 to vector<8x32xf32>
    %25 = arith.addf %24, %23 : vector<8x32xf32>
    %26 = arith.divf %24, %25 : vector<8x32xf32>
    %27 = arith.mulf %19, %26 : vector<8x32xf32>
    %28 = arith.addf %21, %27 : vector<8x32xf32>
    %c0_18 = arith.constant 0 : index
    %c0_19 = arith.constant 0 : index
    %c0_20 = arith.constant 0 : index
    %29 = vector.load %arg12[%c0_18, %c0_19, %c0_20] : memref<1x8x32xf32, #tpu.memory_space<vmem>>, vector<1x8x32xf32>
    %30 = vector.shape_cast %29 : vector<1x8x32xf32> to vector<8x32xf32>
    %31 = vector.shape_cast %28 : vector<8x32xf32> to vector<1x8x32xf32>
    tpu.vector_store %arg12[%c0_18, %c0_19, %c0_20], %31 {strides = array<i32>} : memref<1x8x32xf32, #tpu.memory_space<vmem>>, vector<1x8x32xf32>,
    %32 = vector.shape_cast %1 : vector<8x8x32xbf16> to vector<64x32xbf16>
    %c0_21 = arith.constant 0 : index
    %c0_22 = arith.constant 0 : index
    %33 = vector.load %arg6[%c0_21, %c0_22] : memref<32x32xbf16, #tpu.memory_space<vmem>>, vector<32x32xbf16>
    %cst_23 = arith.constant dense<0.000000e+00> : vector<64x32xf32>
    %34 = tpu.matmul %32, %33, %cst_23 {dimension_numbers = #tpu.dot_dimension_numbers<[1], [0], [0], [1], [0, 0, 1, 1], [], []>} : vector<64x32xbf16>, vector<32x32xbf16>, vector<64x32xf32> -> vector<64x32xf32>
    %c0_24 = arith.constant 0 : index
    %c0_25 = arith.constant 0 : index
    %35 = vector.load %arg7[%c0_24, %c0_25] : memref<1x32xf32, #tpu.memory_space<vmem>>, vector<1x32xf32>
    %36 = vector.broadcast %35 : vector<1x32xf32> to vector<64x32xf32>
    %37 = arith.addf %34, %36 : vector<64x32xf32>
    %38 = vector.shape_cast %37 : vector<64x32xf32> to vector<8x8x32xf32>
    %39 = vector.shape_cast %10 : vector<8x32xf32> to vector<8x1x32xf32>
    %40 = vector.broadcast %39 : vector<8x1x32xf32> to vector<8x8x32xf32>
    %41 = arith.addf %38, %40 : vector<8x8x32xf32>
    %42 = vector.shape_cast %11 : vector<8x32xf32> to vector<1x8x32xf32>
    %43 = vector.broadcast %42 : vector<1x8x32xf32> to vector<8x8x32xf32>
    %44 = arith.addf %41, %43 : vector<8x8x32xf32>
    %c0_26 = arith.constant 0 : index
    %c0_27 = arith.constant 0 : index
    %45 = vector.load %arg10[%c0_26, %c0_27] : memref<1x32xf32, #tpu.memory_space<vmem>>, vector<1x32xf32>
    %46 = vector.shape_cast %45 : vector<1x32xf32> to vector<1x1x32xf32>
    %47 = vector.broadcast %46 : vector<1x1x32xf32> to vector<8x8x32xf32>
    %48 = arith.mulf %44, %47 : vector<8x8x32xf32>
    %c0_28 = arith.constant 0 : index
    %c0_29 = arith.constant 0 : index
    %49 = vector.load %arg11[%c0_28, %c0_29] : memref<1x32xf32, #tpu.memory_space<vmem>>, vector<1x32xf32>
    %50 = vector.shape_cast %49 : vector<1x32xf32> to vector<1x1x32xf32>
    %51 = vector.broadcast %50 : vector<1x1x32xf32> to vector<8x8x32xf32>
    %52 = arith.addf %48, %51 : vector<8x8x32xf32>
    %53 = arith.negf %52 : vector<8x8x32xf32>
    %54 = math.exp %53 : vector<8x8x32xf32>
    %cst_30 = arith.constant 1.000000e+00 : f32
    %55 = vector.broadcast %cst_30 : f32 to vector<8x8x32xf32>
    %56 = arith.addf %55, %54 : vector<8x8x32xf32>
    %57 = arith.divf %55, %56 : vector<8x8x32xf32>
    %58 = arith.mulf %52, %57 : vector<8x8x32xf32>
    %59 = arith.addf %2, %58 : vector<8x8x32xf32>
    %60 = arith.truncf %59 : vector<8x8x32xf32> to vector<8x8x32xbf16>
    %c0_31 = arith.constant 0 : index
    %c0_32 = arith.constant 0 : index
    %c0_33 = arith.constant 0 : index
    %c0_34 = arith.constant 0 : index
    %61 = vector.load %arg13[%c0_31, %c0_32, %c0_33, %c0_34] : memref<1x8x8x32xbf16, #tpu.memory_space<vmem>>, vector<1x8x8x32xbf16>
    %62 = vector.shape_cast %61 : vector<1x8x8x32xbf16> to vector<8x8x32xbf16>
    %63 = vector.shape_cast %60 : vector<8x8x32xbf16> to vector<1x8x8x32xbf16>
    tpu.vector_store %arg13[%c0_31, %c0_32, %c0_33, %c0_34], %63 {strides = array<i32>} : memref<1x8x8x32xbf16, #tpu.memory_space<vmem>>, vector<1x8x8x32xbf16>,
    return
  }
  func.func @transform_0(%arg0: i32, %arg1: i32) -> (i32, i32, i32, i32) {
    %c0_i32 = arith.constant 0 : i32
    %c0_i32_0 = arith.constant 0 : i32
    %c0_i32_1 = arith.constant 0 : i32
    return %arg0, %arg1, %c0_i32, %c0_i32_0 : i32, i32, i32, i32
  }
  func.func @transform_1(%arg0: i32, %arg1: i32) -> (i32, i32, i32) {
    %c0_i32 = arith.constant 0 : i32
    %c0_i32_0 = arith.constant 0 : i32
    %c0_i32_1 = arith.constant 0 : i32
    return %arg0, %c0_i32, %c0_i32_0 : i32, i32, i32
  }
  func.func @transform_2(%arg0: i32, %arg1: i32) -> (i32, i32, i32) {
    %c0_i32 = arith.constant 0 : i32
    %c0_i32_0 = arith.constant 0 : i32
    return %arg0, %arg1, %c0_i32 : i32, i32, i32
  }
  func.func @transform_3(%arg0: i32, %arg1: i32) -> (i32, i32, i32) {
    %c0_i32 = arith.constant 0 : i32
    %c0_i32_0 = arith.constant 0 : i32
    return %arg0, %arg1, %c0_i32 : i32, i32, i32
  }
  func.func @transform_4(%arg0: i32, %arg1: i32) -> (i32, i32) {
    %c0_i32 = arith.constant 0 : i32
    %c0_i32_0 = arith.constant 0 : i32
    %c0_i32_1 = arith.constant 0 : i32
    return %c0_i32, %c0_i32_0 : i32, i32
  }
  func.func @transform_5(%arg0: i32, %arg1: i32) -> (i32, i32) {
    %c0_i32 = arith.constant 0 : i32
    %c0_i32_0 = arith.constant 0 : i32
    %c0_i32_1 = arith.constant 0 : i32
    return %c0_i32, %c0_i32_0 : i32, i32
  }
  func.func @transform_6(%arg0: i32, %arg1: i32) -> (i32, i32) {
    %c0_i32 = arith.constant 0 : i32
    %c0_i32_0 = arith.constant 0 : i32
    %c0_i32_1 = arith.constant 0 : i32
    return %c0_i32, %c0_i32_0 : i32, i32
  }
  func.func @transform_7(%arg0: i32, %arg1: i32) -> (i32, i32) {
    %c0_i32 = arith.constant 0 : i32
    %c0_i32_0 = arith.constant 0 : i32
    %c0_i32_1 = arith.constant 0 : i32
    return %c0_i32, %c0_i32_0 : i32, i32
  }
  func.func @transform_8(%arg0: i32, %arg1: i32) -> (i32, i32) {
    %c0_i32 = arith.constant 0 : i32
    %c0_i32_0 = arith.constant 0 : i32
    %c0_i32_1 = arith.constant 0 : i32
    return %c0_i32, %c0_i32_0 : i32, i32
  }
  func.func @transform_9(%arg0: i32, %arg1: i32) -> (i32, i32) {
    %c0_i32 = arith.constant 0 : i32
    %c0_i32_0 = arith.constant 0 : i32
    %c0_i32_1 = arith.constant 0 : i32
    return %c0_i32, %c0_i32_0 : i32, i32
  }
  func.func @transform_10(%arg0: i32, %arg1: i32) -> (i32, i32, i32) {
    %c0_i32 = arith.constant 0 : i32
    %c0_i32_0 = arith.constant 0 : i32
    return %arg0, %arg1, %c0_i32 : i32, i32, i32
  }
  func.func @transform_11(%arg0: i32, %arg1: i32) -> (i32, i32, i32, i32) {
    %c0_i32 = arith.constant 0 : i32
    %c0_i32_0 = arith.constant 0 : i32
    %c0_i32_1 = arith.constant 0 : i32
    return %arg0, %arg1, %c0_i32, %c0_i32_0 : i32, i32, i32, i32
  }
}

module attributes {stable_mosaic.version = 11 : i64} {
  func.func @kernel(%arg0: i32, %arg1: i32, %arg2: memref<1x8x8xf32, #tpu.memory_space<vmem>>, %arg3: memref<1x8x8xf32, #tpu.memory_space<vmem>>, %arg4: memref<1x8x8xi32, #tpu.memory_space<vmem>>, %arg5: memref<1x8x3xf32, #tpu.memory_space<vmem>>) attributes {dimension_semantics = [#tpu.dimension_semantics<parallel>, #tpu.dimension_semantics<parallel>], iteration_bounds = array<i64: 2, 1>, scalar_prefetch = 0 : i64, scratch_operands = 0 : i64, tpu.core_type = #tpu.core_type<tc>, window_params = [{transform_indices = @transform_0, window_bounds = array<i64: 1, 8, 8>}, {transform_indices = @transform_1, window_bounds = array<i64: 1, 8, 8>}, {transform_indices = @transform_2, window_bounds = array<i64: 1, 8, 8>}, {transform_indices = @transform_3, window_bounds = array<i64: 1, 8, 3>}]} {
    %c0 = arith.constant 0 : index
    %c0_0 = arith.constant 0 : index
    %c0_1 = arith.constant 0 : index
    %0 = vector.load %arg2[%c0, %c0_0, %c0_1] : memref<1x8x8xf32, #tpu.memory_space<vmem>>, vector<1x8x8xf32>
    %1 = vector.shape_cast %0 : vector<1x8x8xf32> to vector<8x8xf32>
    %2 = tpu.transpose %1, [1, 0] : vector<8x8xf32> -> vector<8x8xf32>
    %3 = arith.addf %1, %2 : vector<8x8xf32>
    %cst = arith.constant 5.000000e-01 : f32
    %4 = vector.broadcast %cst : f32 to vector<8x8xf32>
    %5 = arith.mulf %4, %3 : vector<8x8xf32>
    %cst_2 = arith.constant 1.000000e-10 : f32
    %6 = vector.broadcast %cst_2 : f32 to vector<8x8xf32>
    %7 = arith.addf %5, %6 : vector<8x8xf32>
    %8 = math.log %7 : vector<8x8xf32>
    %c0_3 = arith.constant 0 : index
    %c0_4 = arith.constant 0 : index
    %c0_5 = arith.constant 0 : index
    %9 = vector.load %arg3[%c0_3, %c0_4, %c0_5] : memref<1x8x8xf32, #tpu.memory_space<vmem>>, vector<1x8x8xf32>
    %10 = vector.shape_cast %9 : vector<1x8x8xf32> to vector<8x8xf32>
    %11 = tpu.concatenate %8, %10 in 1 : vector<8x8xf32>, vector<8x8xf32> -> vector<8x16xf32>
    %12 = arith.truncf %11 : vector<8x16xf32> to vector<8x16xbf16>
    %c8_i32 = arith.constant 8 : i32
    %13 = arith.muli %arg1, %c8_i32 : i32
    %14 = tpu.iota {dimensions = array<i32: 1>} : vector<8x8xi32>
    %15 = tpu.iota {dimensions = array<i32: 0>} : vector<8x1xi32>
    %16 = vector.broadcast %13 : i32 to vector<8x1xi32>
    %17 = arith.addi %15, %16 : vector<8x1xi32>
    %18 = vector.broadcast %17 : vector<8x1xi32> to vector<8x8xi32>
    %19 = arith.cmpi eq, %14, %18 : vector<8x8xi32>
    %20 = arith.extui %19 : vector<8x8xi1> to vector<8x8xi32>
    %21 = arith.sitofp %20 : vector<8x8xi32> to vector<8x8xf32>
    %c0_i32 = arith.constant 0 : i32
    %22 = vector.broadcast %c0_i32 : i32 to vector<8x8xi32>
    %23 = arith.cmpi eq, %14, %22 : vector<8x8xi32>
    %c0_i32_6 = arith.constant 0 : i32
    %24 = vector.shape_cast %17 : vector<8x1xi32> to vector<8x1xi32>
    %25 = vector.broadcast %24 : vector<8x1xi32> to vector<8x8xi32>
    %26 = vector.broadcast %c0_i32_6 : i32 to vector<8x8xi32>
    %27 = arith.select %23, %25, %26 : vector<8x8xi1>, vector<8x8xi32>
    %cst_7 = arith.constant 0.000000e+00 : f32
    %28 = vector.broadcast %cst_7 : f32 to vector<8x1xf32>
    %c1_i32 = arith.constant 1 : i32
    %c7_i32 = arith.constant 7 : i32
    %29 = arith.addi %c1_i32, %c7_i32 : i32
    %c1_i32_8 = arith.constant 1 : i32
    %30:6 = scf.for %arg6 = %c1_i32 to %29 step %c1_i32_8 iter_args(%arg7 = %21, %arg8 = %21, %arg9 = %28, %arg10 = %28, %arg11 = %28, %arg12 = %27) -> (vector<8x8xf32>, vector<8x8xf32>, vector<8x1xf32>, vector<8x1xf32>, vector<8x1xf32>, vector<8x8xi32>)  : i32 {
      %47 = arith.truncf %arg8 : vector<8x8xf32> to vector<8x8xbf16>
      %cst_19 = arith.constant dense<0.000000e+00> : vector<8x16xf32>
      %48 = tpu.matmul %47, %12, %cst_19 {dimension_numbers = #tpu.dot_dimension_numbers<[1], [0], [0], [1], [0, 0, 1, 1], [], []>} : vector<8x8xbf16>, vector<8x16xbf16>, vector<8x16xf32> -> vector<8x16xf32>
      %49 = vector.extract_strided_slice %48 {offsets = [0, 0], sizes = [8, 8], strides = [1, 1]} : vector<8x16xf32> to vector<8x8xf32>
      %50 = vector.extract_strided_slice %48 {offsets = [0, 8], sizes = [8, 8], strides = [1, 1]} : vector<8x16xf32> to vector<8x8xf32>
      %cst_20 = arith.constant 0.000000e+00 : f32
      %51 = vector.broadcast %cst_20 : f32 to vector<8x8xf32>
      %52 = arith.cmpf ogt, %arg7, %51 : vector<8x8xf32>
      %cst_21 = arith.constant -1.000000e+30 : f32
      %53 = vector.broadcast %cst_21 : f32 to vector<8x8xf32>
      %54 = arith.select %52, %53, %49 : vector<8x8xi1>, vector<8x8xf32>
      %cst_22 = arith.constant dense<0xFF800000> : vector<8xf32>
      %55 = vector.multi_reduction <maximumf>, %54, %cst_22 [1] : vector<8x8xf32> to vector<8xf32>
      %56 = vector.shape_cast %55 : vector<8xf32> to vector<8x1xf32>
      %57 = vector.broadcast %56 : vector<8x1xf32> to vector<8x8xf32>
      %58 = arith.subf %54, %57 : vector<8x8xf32>
      %59 = math.exp %58 : vector<8x8xf32>
      %cst_23 = arith.constant dense<0.000000e+00> : vector<8xf32>
      %60 = vector.multi_reduction <add>, %59, %cst_23 [1] : vector<8x8xf32> to vector<8xf32>
      %61 = vector.shape_cast %60 : vector<8xf32> to vector<8x1xf32>
      %62 = math.log %61 : vector<8x1xf32>
      %63 = arith.addf %56, %62 : vector<8x1xf32>
      %64 = vector.broadcast %63 : vector<8x1xf32> to vector<8x8xf32>
      %65 = arith.subf %54, %64 : vector<8x8xf32>
      %66 = vector.broadcast %56 : vector<8x1xf32> to vector<8x8xf32>
      %67 = arith.cmpf oge, %54, %66 : vector<8x8xf32>
      %c8_i32_24 = arith.constant 8 : i32
      %68 = vector.broadcast %c8_i32_24 : i32 to vector<8x8xi32>
      %69 = arith.select %67, %14, %68 : vector<8x8xi1>, vector<8x8xi32>
      %cst_25 = arith.constant dense<2147483647> : vector<8xi32>
      %70 = vector.multi_reduction <minsi>, %69, %cst_25 [1] : vector<8x8xi32> to vector<8xi32>
      %71 = vector.shape_cast %70 : vector<8xi32> to vector<8x1xi32>
      %72 = vector.broadcast %71 : vector<8x1xi32> to vector<8x8xi32>
      %73 = arith.cmpi eq, %14, %72 : vector<8x8xi32>
      %74 = arith.extui %73 : vector<8x8xi1> to vector<8x8xi32>
      %75 = arith.sitofp %74 : vector<8x8xi32> to vector<8x8xf32>
      %76 = arith.mulf %65, %75 : vector<8x8xf32>
      %cst_26 = arith.constant dense<0.000000e+00> : vector<8xf32>
      %77 = vector.multi_reduction <add>, %76, %cst_26 [1] : vector<8x8xf32> to vector<8xf32>
      %78 = vector.shape_cast %77 : vector<8xf32> to vector<8x1xf32>
      %79 = arith.addf %arg9, %78 : vector<8x1xf32>
      %80 = math.exp %65 : vector<8x8xf32>
      %cst_27 = arith.constant 0.000000e+00 : f32
      %81 = vector.broadcast %cst_27 : f32 to vector<8x8xf32>
      %82 = arith.cmpf ogt, %arg7, %81 : vector<8x8xf32>
      %cst_28 = arith.constant 0.000000e+00 : f32
      %83 = vector.broadcast %cst_28 : f32 to vector<8x8xf32>
      %84 = arith.subf %83, %80 : vector<8x8xf32>
      %85 = arith.mulf %84, %65 : vector<8x8xf32>
      %cst_29 = arith.constant 0.000000e+00 : f32
      %86 = vector.broadcast %cst_29 : f32 to vector<8x8xf32>
      %87 = arith.select %82, %86, %85 : vector<8x8xi1>, vector<8x8xf32>
      %cst_30 = arith.constant dense<0.000000e+00> : vector<8xf32>
      %88 = vector.multi_reduction <add>, %87, %cst_30 [1] : vector<8x8xf32> to vector<8xf32>
      %89 = vector.shape_cast %88 : vector<8xf32> to vector<8x1xf32>
      %90 = arith.addf %arg10, %89 : vector<8x1xf32>
      %91 = arith.mulf %50, %75 : vector<8x8xf32>
      %cst_31 = arith.constant dense<0.000000e+00> : vector<8xf32>
      %92 = vector.multi_reduction <add>, %91, %cst_31 [1] : vector<8x8xf32> to vector<8xf32>
      %93 = vector.shape_cast %92 : vector<8xf32> to vector<8x1xf32>
      %94 = arith.addf %arg11, %93 : vector<8x1xf32>
      %95 = arith.maximumf %arg7, %75 : vector<8x8xf32>
      %96 = vector.broadcast %arg6 : i32 to vector<8x8xi32>
      %97 = arith.cmpi eq, %14, %96 : vector<8x8xi32>
      %c0_i32_32 = arith.constant 0 : i32
      %98 = vector.shape_cast %71 : vector<8x1xi32> to vector<8x1xi32>
      %99 = vector.broadcast %98 : vector<8x1xi32> to vector<8x8xi32>
      %100 = vector.broadcast %c0_i32_32 : i32 to vector<8x8xi32>
      %101 = arith.select %97, %99, %100 : vector<8x8xi1>, vector<8x8xi32>
      %102 = arith.addi %arg12, %101 : vector<8x8xi32>
      scf.yield %95, %75, %79, %90, %94, %102 : vector<8x8xf32>, vector<8x8xf32>, vector<8x1xf32>, vector<8x1xf32>, vector<8x1xf32>, vector<8x8xi32>
    }
    %c7_i32_9 = arith.constant 7 : i32
    %31 = arith.truncf %30#1 : vector<8x8xf32> to vector<8x8xbf16>
    %cst_10 = arith.constant dense<0.000000e+00> : vector<8x16xf32>
    %32 = tpu.matmul %31, %12, %cst_10 {dimension_numbers = #tpu.dot_dimension_numbers<[1], [0], [0], [1], [0, 0, 1, 1], [], []>} : vector<8x8xbf16>, vector<8x16xbf16>, vector<8x16xf32> -> vector<8x16xf32>
    %33 = vector.extract_strided_slice %32 {offsets = [0, 8], sizes = [8, 8], strides = [1, 1]} : vector<8x16xf32> to vector<8x8xf32>
    %34 = arith.mulf %33, %21 : vector<8x8xf32>
    %cst_11 = arith.constant dense<0.000000e+00> : vector<8xf32>
    %35 = vector.multi_reduction <add>, %34, %cst_11 [1] : vector<8x8xf32> to vector<8xf32>
    %36 = vector.shape_cast %35 : vector<8xf32> to vector<8x1xf32>
    %37 = arith.addf %30#4, %36 : vector<8x1xf32>
    %c0_12 = arith.constant 0 : index
    %c0_13 = arith.constant 0 : index
    %c0_14 = arith.constant 0 : index
    %38 = vector.load %arg4[%c0_12, %c0_13, %c0_14] : memref<1x8x8xi32, #tpu.memory_space<vmem>>, vector<1x8x8xi32>
    %39 = vector.shape_cast %38 : vector<1x8x8xi32> to vector<8x8xi32>
    %40 = vector.shape_cast %30#5 : vector<8x8xi32> to vector<1x8x8xi32>
    tpu.vector_store %arg4[%c0_12, %c0_13, %c0_14], %40 {strides = array<i32>} : memref<1x8x8xi32, #tpu.memory_space<vmem>>, vector<1x8x8xi32>,
    %cst_15 = arith.constant 0.000000e+00 : f32
    %41 = vector.broadcast %cst_15 : f32 to vector<8x1xf32>
    %42 = arith.subf %41, %37 : vector<8x1xf32>
    %43 = tpu.concatenate %30#2, %42, %30#3 in 1 : vector<8x1xf32>, vector<8x1xf32>, vector<8x1xf32> -> vector<8x3xf32>
    %c0_16 = arith.constant 0 : index
    %c0_17 = arith.constant 0 : index
    %c0_18 = arith.constant 0 : index
    %44 = vector.load %arg5[%c0_16, %c0_17, %c0_18] : memref<1x8x3xf32, #tpu.memory_space<vmem>>, vector<1x8x3xf32>
    %45 = vector.shape_cast %44 : vector<1x8x3xf32> to vector<8x3xf32>
    %46 = vector.shape_cast %43 : vector<8x3xf32> to vector<1x8x3xf32>
    tpu.vector_store %arg5[%c0_16, %c0_17, %c0_18], %46 {strides = array<i32>} : memref<1x8x3xf32, #tpu.memory_space<vmem>>, vector<1x8x3xf32>,
    return
  }
  func.func @transform_0(%arg0: i32, %arg1: i32) -> (i32, i32, i32) {
    %c0_i32 = arith.constant 0 : i32
    %c0_i32_0 = arith.constant 0 : i32
    %c0_i32_1 = arith.constant 0 : i32
    return %arg0, %c0_i32, %c0_i32_0 : i32, i32, i32
  }
  func.func @transform_1(%arg0: i32, %arg1: i32) -> (i32, i32, i32) {
    %c0_i32 = arith.constant 0 : i32
    %c0_i32_0 = arith.constant 0 : i32
    %c0_i32_1 = arith.constant 0 : i32
    return %arg0, %c0_i32, %c0_i32_0 : i32, i32, i32
  }
  func.func @transform_2(%arg0: i32, %arg1: i32) -> (i32, i32, i32) {
    %c0_i32 = arith.constant 0 : i32
    %c0_i32_0 = arith.constant 0 : i32
    return %arg0, %arg1, %c0_i32 : i32, i32, i32
  }
  func.func @transform_3(%arg0: i32, %arg1: i32) -> (i32, i32, i32) {
    %c0_i32 = arith.constant 0 : i32
    %c0_i32_0 = arith.constant 0 : i32
    return %arg0, %arg1, %c0_i32 : i32, i32, i32
  }
}

module attributes {stable_mosaic.version = 11 : i64} {
  func.func @kernel(%arg0: i32, %arg1: i32, %arg2: memref<1x8x8x32xbf16, #tpu.memory_space<vmem>>, %arg3: memref<1x8x128xf32, #tpu.memory_space<vmem>>, %arg4: memref<1x8x32xf32, #tpu.memory_space<vmem>>, %arg5: memref<1x8x32xf32, #tpu.memory_space<vmem>>, %arg6: memref<32x32xbf16, #tpu.memory_space<vmem>>, %arg7: memref<1x32xf32, #tpu.memory_space<vmem>>, %arg8: memref<1x32xf32, #tpu.memory_space<vmem>>, %arg9: memref<1x32xf32, #tpu.memory_space<vmem>>, %arg10: memref<1x32xf32, #tpu.memory_space<vmem>>, %arg11: memref<1x32xf32, #tpu.memory_space<vmem>>, %arg12: memref<32x32xbf16, #tpu.memory_space<vmem>>, %arg13: memref<1x32xf32, #tpu.memory_space<vmem>>, %arg14: memref<32x32xbf16, #tpu.memory_space<vmem>>, %arg15: memref<1x32xf32, #tpu.memory_space<vmem>>, %arg16: memref<1x32xf32, #tpu.memory_space<vmem>>, %arg17: memref<1x1xf32, #tpu.memory_space<vmem>>, %arg18: memref<1x8x32xf32, #tpu.memory_space<vmem>>, %arg19: memref<1x8x8xf32, #tpu.memory_space<vmem>>) attributes {dimension_semantics = [#tpu.dimension_semantics<parallel>, #tpu.dimension_semantics<parallel>], iteration_bounds = array<i64: 2, 1>, scalar_prefetch = 0 : i64, scratch_operands = 0 : i64, tpu.core_type = #tpu.core_type<tc>, window_params = [{transform_indices = @transform_0, window_bounds = array<i64: 1, 8, 8, 32>}, {transform_indices = @transform_1, window_bounds = array<i64: 1, 8, 128>}, {transform_indices = @transform_2, window_bounds = array<i64: 1, 8, 32>}, {transform_indices = @transform_3, window_bounds = array<i64: 1, 8, 32>}, {pipeline_mode = #tpu.pipeline_mode<synchronous>, transform_indices = @transform_4, window_bounds = array<i64: 32, 32>}, {pipeline_mode = #tpu.pipeline_mode<synchronous>, transform_indices = @transform_5, window_bounds = array<i64: 1, 32>}, {pipeline_mode = #tpu.pipeline_mode<synchronous>, transform_indices = @transform_6, window_bounds = array<i64: 1, 32>}, {pipeline_mode = #tpu.pipeline_mode<synchronous>, transform_indices = @transform_7, window_bounds = array<i64: 1, 32>}, {pipeline_mode = #tpu.pipeline_mode<synchronous>, transform_indices = @transform_8, window_bounds = array<i64: 1, 32>}, {pipeline_mode = #tpu.pipeline_mode<synchronous>, transform_indices = @transform_9, window_bounds = array<i64: 1, 32>}, {pipeline_mode = #tpu.pipeline_mode<synchronous>, transform_indices = @transform_10, window_bounds = array<i64: 32, 32>}, {pipeline_mode = #tpu.pipeline_mode<synchronous>, transform_indices = @transform_11, window_bounds = array<i64: 1, 32>}, {pipeline_mode = #tpu.pipeline_mode<synchronous>, transform_indices = @transform_12, window_bounds = array<i64: 32, 32>}, {pipeline_mode = #tpu.pipeline_mode<synchronous>, transform_indices = @transform_13, window_bounds = array<i64: 1, 32>}, {pipeline_mode = #tpu.pipeline_mode<synchronous>, transform_indices = @transform_14, window_bounds = array<i64: 1, 32>}, {pipeline_mode = #tpu.pipeline_mode<synchronous>, transform_indices = @transform_15, window_bounds = array<i64: 1, 1>}, {transform_indices = @transform_16, window_bounds = array<i64: 1, 8, 32>}, {transform_indices = @transform_17, window_bounds = array<i64: 1, 8, 8>}]} {
    %c0 = arith.constant 0 : index
    %c0_0 = arith.constant 0 : index
    %c0_1 = arith.constant 0 : index
    %c0_2 = arith.constant 0 : index
    %0 = vector.load %arg2[%c0, %c0_0, %c0_1, %c0_2] : memref<1x8x8x32xbf16, #tpu.memory_space<vmem>>, vector<1x8x8x32xbf16>
    %1 = vector.shape_cast %0 : vector<1x8x8x32xbf16> to vector<8x8x32xbf16>
    %2 = arith.extf %1 : vector<8x8x32xbf16> to vector<8x8x32xf32>
    %c8_i32 = arith.constant 8 : i32
    %3 = arith.muli %arg1, %c8_i32 : i32
    %4 = tpu.assume_multiple %3, 8 : i32
    %c0_3 = arith.constant 0 : index
    %c0_4 = arith.constant 0 : index
    %c0_5 = arith.constant 0 : index
    %5 = vector.load %arg3[%c0_3, %c0_4, %c0_5] : memref<1x8x128xf32, #tpu.memory_space<vmem>>, vector<1x8x128xf32>
    %6 = vector.shape_cast %5 : vector<1x8x128xf32> to vector<8x128xf32>
    %c0_6 = arith.constant 0 : index
    %7 = arith.index_cast %4 : i32 to index
    %c0_7 = arith.constant 0 : index
    %8 = vector.load %arg3[%c0_6, %7, %c0_7] : memref<1x8x128xf32, #tpu.memory_space<vmem>>, vector<1x8x128xf32>
    %9 = vector.shape_cast %8 : vector<1x8x128xf32> to vector<8x128xf32>
    %10 = vector.extract_strided_slice %9 {offsets = [0, 64], sizes = [8, 32], strides = [1, 1]} : vector<8x128xf32> to vector<8x32xf32>
    %11 = vector.extract_strided_slice %6 {offsets = [0, 96], sizes = [8, 32], strides = [1, 1]} : vector<8x128xf32> to vector<8x32xf32>
    %c0_8 = arith.constant 0 : index
    %c0_9 = arith.constant 0 : index
    %c0_10 = arith.constant 0 : index
    %12 = vector.load %arg5[%c0_8, %c0_9, %c0_10] : memref<1x8x32xf32, #tpu.memory_space<vmem>>, vector<1x8x32xf32>
    %13 = vector.shape_cast %12 : vector<1x8x32xf32> to vector<8x32xf32>
    %c0_11 = arith.constant 0 : index
    %c0_12 = arith.constant 0 : index
    %14 = vector.load %arg8[%c0_11, %c0_12] : memref<1x32xf32, #tpu.memory_space<vmem>>, vector<1x32xf32>
    %15 = vector.broadcast %14 : vector<1x32xf32> to vector<8x32xf32>
    %16 = arith.mulf %13, %15 : vector<8x32xf32>
    %c0_13 = arith.constant 0 : index
    %c0_14 = arith.constant 0 : index
    %17 = vector.load %arg9[%c0_13, %c0_14] : memref<1x32xf32, #tpu.memory_space<vmem>>, vector<1x32xf32>
    %18 = vector.broadcast %17 : vector<1x32xf32> to vector<8x32xf32>
    %19 = arith.addf %16, %18 : vector<8x32xf32>
    %c0_15 = arith.constant 0 : index
    %c0_16 = arith.constant 0 : index
    %c0_17 = arith.constant 0 : index
    %20 = vector.load %arg4[%c0_15, %c0_16, %c0_17] : memref<1x8x32xf32, #tpu.memory_space<vmem>>, vector<1x8x32xf32>
    %21 = vector.shape_cast %20 : vector<1x8x32xf32> to vector<8x32xf32>
    %22 = arith.negf %19 : vector<8x32xf32>
    %23 = math.exp %22 : vector<8x32xf32>
    %cst = arith.constant 1.000000e+00 : f32
    %24 = vector.broadcast %cst : f32 to vector<8x32xf32>
    %25 = arith.addf %24, %23 : vector<8x32xf32>
    %26 = arith.divf %24, %25 : vector<8x32xf32>
    %27 = arith.mulf %19, %26 : vector<8x32xf32>
    %28 = arith.addf %21, %27 : vector<8x32xf32>
    %c0_18 = arith.constant 0 : index
    %c0_19 = arith.constant 0 : index
    %c0_20 = arith.constant 0 : index
    %29 = vector.load %arg18[%c0_18, %c0_19, %c0_20] : memref<1x8x32xf32, #tpu.memory_space<vmem>>, vector<1x8x32xf32>
    %30 = vector.shape_cast %29 : vector<1x8x32xf32> to vector<8x32xf32>
    %31 = vector.shape_cast %28 : vector<8x32xf32> to vector<1x8x32xf32>
    tpu.vector_store %arg18[%c0_18, %c0_19, %c0_20], %31 {strides = array<i32>} : memref<1x8x32xf32, #tpu.memory_space<vmem>>, vector<1x8x32xf32>,
    %32 = vector.shape_cast %1 : vector<8x8x32xbf16> to vector<64x32xbf16>
    %c0_21 = arith.constant 0 : index
    %c0_22 = arith.constant 0 : index
    %33 = vector.load %arg6[%c0_21, %c0_22] : memref<32x32xbf16, #tpu.memory_space<vmem>>, vector<32x32xbf16>
    %cst_23 = arith.constant dense<0.000000e+00> : vector<64x32xf32>
    %34 = tpu.matmul %32, %33, %cst_23 {dimension_numbers = #tpu.dot_dimension_numbers<[1], [0], [0], [1], [0, 0, 1, 1], [], []>} : vector<64x32xbf16>, vector<32x32xbf16>, vector<64x32xf32> -> vector<64x32xf32>
    %c0_24 = arith.constant 0 : index
    %c0_25 = arith.constant 0 : index
    %35 = vector.load %arg7[%c0_24, %c0_25] : memref<1x32xf32, #tpu.memory_space<vmem>>, vector<1x32xf32>
    %36 = vector.broadcast %35 : vector<1x32xf32> to vector<64x32xf32>
    %37 = arith.addf %34, %36 : vector<64x32xf32>
    %38 = vector.shape_cast %37 : vector<64x32xf32> to vector<8x8x32xf32>
    %39 = vector.shape_cast %10 : vector<8x32xf32> to vector<8x1x32xf32>
    %40 = vector.broadcast %39 : vector<8x1x32xf32> to vector<8x8x32xf32>
    %41 = arith.addf %38, %40 : vector<8x8x32xf32>
    %42 = vector.shape_cast %11 : vector<8x32xf32> to vector<1x8x32xf32>
    %43 = vector.broadcast %42 : vector<1x8x32xf32> to vector<8x8x32xf32>
    %44 = arith.addf %41, %43 : vector<8x8x32xf32>
    %c0_26 = arith.constant 0 : index
    %c0_27 = arith.constant 0 : index
    %45 = vector.load %arg10[%c0_26, %c0_27] : memref<1x32xf32, #tpu.memory_space<vmem>>, vector<1x32xf32>
    %46 = vector.shape_cast %45 : vector<1x32xf32> to vector<1x1x32xf32>
    %47 = vector.broadcast %46 : vector<1x1x32xf32> to vector<8x8x32xf32>
    %48 = arith.mulf %44, %47 : vector<8x8x32xf32>
    %c0_28 = arith.constant 0 : index
    %c0_29 = arith.constant 0 : index
    %49 = vector.load %arg11[%c0_28, %c0_29] : memref<1x32xf32, #tpu.memory_space<vmem>>, vector<1x32xf32>
    %50 = vector.shape_cast %49 : vector<1x32xf32> to vector<1x1x32xf32>
    %51 = vector.broadcast %50 : vector<1x1x32xf32> to vector<8x8x32xf32>
    %52 = arith.addf %48, %51 : vector<8x8x32xf32>
    %53 = arith.negf %52 : vector<8x8x32xf32>
    %54 = math.exp %53 : vector<8x8x32xf32>
    %cst_30 = arith.constant 1.000000e+00 : f32
    %55 = vector.broadcast %cst_30 : f32 to vector<8x8x32xf32>
    %56 = arith.addf %55, %54 : vector<8x8x32xf32>
    %57 = arith.divf %55, %56 : vector<8x8x32xf32>
    %58 = arith.mulf %52, %57 : vector<8x8x32xf32>
    %59 = arith.addf %2, %58 : vector<8x8x32xf32>
    %60 = vector.shape_cast %59 : vector<8x8x32xf32> to vector<64x32xf32>
    %c0_31 = arith.constant 0 : index
    %c0_32 = arith.constant 0 : index
    %61 = vector.load %arg12[%c0_31, %c0_32] : memref<32x32xbf16, #tpu.memory_space<vmem>>, vector<32x32xbf16>
    %c0_33 = arith.constant 0 : index
    %c0_34 = arith.constant 0 : index
    %62 = vector.load %arg13[%c0_33, %c0_34] : memref<1x32xf32, #tpu.memory_space<vmem>>, vector<1x32xf32>
    %63 = arith.truncf %60 : vector<64x32xf32> to vector<64x32xbf16>
    %cst_35 = arith.constant dense<0.000000e+00> : vector<64x32xf32>
    %64 = tpu.matmul %63, %61, %cst_35 {dimension_numbers = #tpu.dot_dimension_numbers<[1], [0], [0], [1], [0, 0, 1, 1], [], []>} : vector<64x32xbf16>, vector<32x32xbf16>, vector<64x32xf32> -> vector<64x32xf32>
    %65 = vector.broadcast %62 : vector<1x32xf32> to vector<64x32xf32>
    %66 = arith.addf %64, %65 : vector<64x32xf32>
    %67 = arith.negf %66 : vector<64x32xf32>
    %68 = math.exp %67 : vector<64x32xf32>
    %cst_36 = arith.constant 1.000000e+00 : f32
    %69 = vector.broadcast %cst_36 : f32 to vector<64x32xf32>
    %70 = arith.addf %69, %68 : vector<64x32xf32>
    %71 = arith.divf %69, %70 : vector<64x32xf32>
    %72 = arith.mulf %66, %71 : vector<64x32xf32>
    %c0_37 = arith.constant 0 : index
    %c0_38 = arith.constant 0 : index
    %73 = vector.load %arg14[%c0_37, %c0_38] : memref<32x32xbf16, #tpu.memory_space<vmem>>, vector<32x32xbf16>
    %c0_39 = arith.constant 0 : index
    %c0_40 = arith.constant 0 : index
    %74 = vector.load %arg15[%c0_39, %c0_40] : memref<1x32xf32, #tpu.memory_space<vmem>>, vector<1x32xf32>
    %75 = arith.truncf %72 : vector<64x32xf32> to vector<64x32xbf16>
    %cst_41 = arith.constant dense<0.000000e+00> : vector<64x32xf32>
    %76 = tpu.matmul %75, %73, %cst_41 {dimension_numbers = #tpu.dot_dimension_numbers<[1], [0], [0], [1], [0, 0, 1, 1], [], []>} : vector<64x32xbf16>, vector<32x32xbf16>, vector<64x32xf32> -> vector<64x32xf32>
    %77 = vector.broadcast %74 : vector<1x32xf32> to vector<64x32xf32>
    %78 = arith.addf %76, %77 : vector<64x32xf32>
    %79 = arith.negf %78 : vector<64x32xf32>
    %80 = math.exp %79 : vector<64x32xf32>
    %cst_42 = arith.constant 1.000000e+00 : f32
    %81 = vector.broadcast %cst_42 : f32 to vector<64x32xf32>
    %82 = arith.addf %81, %80 : vector<64x32xf32>
    %83 = arith.divf %81, %82 : vector<64x32xf32>
    %84 = arith.mulf %78, %83 : vector<64x32xf32>
    %c0_43 = arith.constant 0 : index
    %c0_44 = arith.constant 0 : index
    %85 = vector.load %arg16[%c0_43, %c0_44] : memref<1x32xf32, #tpu.memory_space<vmem>>, vector<1x32xf32>
    %c0_45 = arith.constant 0 : index
    %c0_46 = arith.constant 0 : index
    %86 = vector.load %arg17[%c0_45, %c0_46] : memref<1x1xf32, #tpu.memory_space<vmem>>, vector<1x1xf32>
    %87 = vector.shape_cast %84 : vector<64x32xf32> to vector<8x8x32xf32>
    %88 = vector.shape_cast %85 : vector<1x32xf32> to vector<1x1x32xf32>
    %89 = vector.broadcast %88 : vector<1x1x32xf32> to vector<8x8x32xf32>
    %90 = arith.mulf %87, %89 : vector<8x8x32xf32>
    %cst_47 = arith.constant dense<0.000000e+00> : vector<8x8xf32>
    %91 = vector.multi_reduction <add>, %90, %cst_47 [2] : vector<8x8x32xf32> to vector<8x8xf32>
    %92 = vector.broadcast %86 : vector<1x1xf32> to vector<8x8xf32>
    %93 = arith.addf %91, %92 : vector<8x8xf32>
    %94 = arith.negf %93 : vector<8x8xf32>
    %95 = math.exp %94 : vector<8x8xf32>
    %cst_48 = arith.constant 1.000000e+00 : f32
    %96 = vector.broadcast %cst_48 : f32 to vector<8x8xf32>
    %97 = arith.addf %96, %95 : vector<8x8xf32>
    %98 = arith.divf %96, %97 : vector<8x8xf32>
    %c0_49 = arith.constant 0 : index
    %c0_50 = arith.constant 0 : index
    %c0_51 = arith.constant 0 : index
    %99 = vector.load %arg19[%c0_49, %c0_50, %c0_51] : memref<1x8x8xf32, #tpu.memory_space<vmem>>, vector<1x8x8xf32>
    %100 = vector.shape_cast %99 : vector<1x8x8xf32> to vector<8x8xf32>
    %101 = vector.shape_cast %98 : vector<8x8xf32> to vector<1x8x8xf32>
    tpu.vector_store %arg19[%c0_49, %c0_50, %c0_51], %101 {strides = array<i32>} : memref<1x8x8xf32, #tpu.memory_space<vmem>>, vector<1x8x8xf32>,
    return
  }
  func.func @transform_0(%arg0: i32, %arg1: i32) -> (i32, i32, i32, i32) {
    %c0_i32 = arith.constant 0 : i32
    %c0_i32_0 = arith.constant 0 : i32
    %c0_i32_1 = arith.constant 0 : i32
    return %arg0, %arg1, %c0_i32, %c0_i32_0 : i32, i32, i32, i32
  }
  func.func @transform_1(%arg0: i32, %arg1: i32) -> (i32, i32, i32) {
    %c0_i32 = arith.constant 0 : i32
    %c0_i32_0 = arith.constant 0 : i32
    %c0_i32_1 = arith.constant 0 : i32
    return %arg0, %c0_i32, %c0_i32_0 : i32, i32, i32
  }
  func.func @transform_2(%arg0: i32, %arg1: i32) -> (i32, i32, i32) {
    %c0_i32 = arith.constant 0 : i32
    %c0_i32_0 = arith.constant 0 : i32
    return %arg0, %arg1, %c0_i32 : i32, i32, i32
  }
  func.func @transform_3(%arg0: i32, %arg1: i32) -> (i32, i32, i32) {
    %c0_i32 = arith.constant 0 : i32
    %c0_i32_0 = arith.constant 0 : i32
    return %arg0, %arg1, %c0_i32 : i32, i32, i32
  }
  func.func @transform_4(%arg0: i32, %arg1: i32) -> (i32, i32) {
    %c0_i32 = arith.constant 0 : i32
    %c0_i32_0 = arith.constant 0 : i32
    %c0_i32_1 = arith.constant 0 : i32
    return %c0_i32, %c0_i32_0 : i32, i32
  }
  func.func @transform_5(%arg0: i32, %arg1: i32) -> (i32, i32) {
    %c0_i32 = arith.constant 0 : i32
    %c0_i32_0 = arith.constant 0 : i32
    %c0_i32_1 = arith.constant 0 : i32
    return %c0_i32, %c0_i32_0 : i32, i32
  }
  func.func @transform_6(%arg0: i32, %arg1: i32) -> (i32, i32) {
    %c0_i32 = arith.constant 0 : i32
    %c0_i32_0 = arith.constant 0 : i32
    %c0_i32_1 = arith.constant 0 : i32
    return %c0_i32, %c0_i32_0 : i32, i32
  }
  func.func @transform_7(%arg0: i32, %arg1: i32) -> (i32, i32) {
    %c0_i32 = arith.constant 0 : i32
    %c0_i32_0 = arith.constant 0 : i32
    %c0_i32_1 = arith.constant 0 : i32
    return %c0_i32, %c0_i32_0 : i32, i32
  }
  func.func @transform_8(%arg0: i32, %arg1: i32) -> (i32, i32) {
    %c0_i32 = arith.constant 0 : i32
    %c0_i32_0 = arith.constant 0 : i32
    %c0_i32_1 = arith.constant 0 : i32
    return %c0_i32, %c0_i32_0 : i32, i32
  }
  func.func @transform_9(%arg0: i32, %arg1: i32) -> (i32, i32) {
    %c0_i32 = arith.constant 0 : i32
    %c0_i32_0 = arith.constant 0 : i32
    %c0_i32_1 = arith.constant 0 : i32
    return %c0_i32, %c0_i32_0 : i32, i32
  }
  func.func @transform_10(%arg0: i32, %arg1: i32) -> (i32, i32) {
    %c0_i32 = arith.constant 0 : i32
    %c0_i32_0 = arith.constant 0 : i32
    %c0_i32_1 = arith.constant 0 : i32
    return %c0_i32, %c0_i32_0 : i32, i32
  }
  func.func @transform_11(%arg0: i32, %arg1: i32) -> (i32, i32) {
    %c0_i32 = arith.constant 0 : i32
    %c0_i32_0 = arith.constant 0 : i32
    %c0_i32_1 = arith.constant 0 : i32
    return %c0_i32, %c0_i32_0 : i32, i32
  }
  func.func @transform_12(%arg0: i32, %arg1: i32) -> (i32, i32) {
    %c0_i32 = arith.constant 0 : i32
    %c0_i32_0 = arith.constant 0 : i32
    %c0_i32_1 = arith.constant 0 : i32
    return %c0_i32, %c0_i32_0 : i32, i32
  }
  func.func @transform_13(%arg0: i32, %arg1: i32) -> (i32, i32) {
    %c0_i32 = arith.constant 0 : i32
    %c0_i32_0 = arith.constant 0 : i32
    %c0_i32_1 = arith.constant 0 : i32
    return %c0_i32, %c0_i32_0 : i32, i32
  }
  func.func @transform_14(%arg0: i32, %arg1: i32) -> (i32, i32) {
    %c0_i32 = arith.constant 0 : i32
    %c0_i32_0 = arith.constant 0 : i32
    %c0_i32_1 = arith.constant 0 : i32
    return %c0_i32, %c0_i32_0 : i32, i32
  }
  func.func @transform_15(%arg0: i32, %arg1: i32) -> (i32, i32) {
    %c0_i32 = arith.constant 0 : i32
    %c0_i32_0 = arith.constant 0 : i32
    %c0_i32_1 = arith.constant 0 : i32
    return %c0_i32, %c0_i32_0 : i32, i32
  }
  func.func @transform_16(%arg0: i32, %arg1: i32) -> (i32, i32, i32) {
    %c0_i32 = arith.constant 0 : i32
    %c0_i32_0 = arith.constant 0 : i32
    return %arg0, %arg1, %c0_i32 : i32, i32, i32
  }
  func.func @transform_17(%arg0: i32, %arg1: i32) -> (i32, i32, i32) {
    %c0_i32 = arith.constant 0 : i32
    %c0_i32_0 = arith.constant 0 : i32
    return %arg0, %arg1, %c0_i32 : i32, i32, i32
  }
}

</mosaic_0001>

<bundles_post_ra>
// kernel: nonautoregressive_policy_forward.7
= control target key start
LH: loop header
LB: loop body
LE: loop exit
PB: predicated region body
PF: predicated region fallthrough
CT: control target
= control target key end

     0   :  { %s1326_s27 = smov 0   ;;  %s1328_s28 = smov 0   ;;  %s1451_s0 = inlined_call_operand.vmem [shape: f32[2,8,8], index: 0, kind: input, shape index: {}]   ;;  %s1452_s1 = inlined_call_operand.vmem [shape: f32[2,8,128], index: 1, kind: input, shape index: {}]   ;;  %s1453_s2 = inlined_call_operand.vmem [shape: bf16[32,32], index: 2, kind: input, shape index: {}]   ;;  %s1454_s3 = inlined_call_operand.vmem [shape: f32[1,32], index: 3, kind: input, shape index: {}]   ;;  %s1455_s4 = inlined_call_operand.vmem [shape: f32[1,32], index: 4, kind: input, shape index: {}]   ;;  %s1456_s5 = inlined_call_operand.vmem [shape: f32[1,32], index: 5, kind: input, shape index: {}]   ;;  %s1457_s6 = inlined_call_operand.vmem [shape: f32[2,1,2,32], index: 6, kind: output, shape index: {0}]   ;;  %s1458_s7 = inlined_call_operand.vmem [shape: f32[2,1,2,32], index: 7, kind: output, shape index: {1}]   ;;  %s1459_s8 = inlined_call_operand.vmem [shape: f32[2,8,32], index: 8, kind: output, shape index: {2}]  }
   0x1   :  { %s1330_s29 = smov 0  }
   0x2 LB: > { %s31_s30 = sadd.s32 1, %s1271_s28  ;;  %p1135_p0 = scmp.ge.s32.totalorder %s1275_s29, 1  ;;  %s1275_s29 = sphi %s1330_s29, %s19_s29   ;;  %s1271_s28 = sphi %s1328_s28, %s1461_s28   ;;  %s1267_s27 = sphi %s1326_s27, %s1460_s27  }
   0x3   : > { %p33_p1 = scmp.ge.s32.totalorder %s31_s30, 2  ;;  %p298_p2 = scmp.lt.s32.totalorder %s1275_s29, 3 }
   0x5   : > { %s1463_s30 = smov (%p33_p1, %s31_s30), 0  ;;  %p299_p3 = pnand %p1135_p0, %p298_p2 }
   0x6   : > { %p354_p4 = scmp.lt.s32.totalorder (!%p299_p3), %s1267_s27, 1  ;;  %s1277_s20 = smov (!%p299_p3), 96  }
   0x7   : > { %302 = sbr.rel (%p299_p3) target bundleno = 383 (0x17f), region = 44  ;;  %s1279_s21 = smov (!%p299_p3), 64  }
   0x8   : > { %s1280_s22 = smov (!%p299_p3), 32  }
   0xc   : > { %v388_v0 = vlaneseq  ;;  %s1465_s27 = smov (!%p354_p4, %s1267_s27), 1  ;;  %v1219_v2 = vld [vmem:[%s1453_s2 + $0x8] sm:$0xff]   ;;  %v1220_v3 = vld [vmem:[%s1453_s2] sm:$0xff]   ;;  %v1278_v22 = vmov 1966171168   ;;  %vm554_vm0 = vcmask 261120  }
   0xd   : > { %s1353_s13 = sshll.u32 %s1465_s27, 3  ;;  %1174 = vmatprep.subr.bf16.mxu0 %v1219_v2  ;;  %1186 = vmatprep.subr.bf16.mxu1 %v1219_v2  ;;  %v768_v23 = vunpack.c.l.s4 %v1278_v22  ;;  %v1141_v47 = vld [vmem:[%s1455_s4] ss:$0 sm:$0xff]  ;;  %vm628_vm1 = vcmask 1041409   ;;  %vm630_vm2 = vcmask 1042434   ;;  %vm632_vm3 = vcmask 1043459  }
   0xe   : > { %v389_v1 = vshrl.u32 %v388_v0, 7  ;;  %s360_s16 = scalar_lea.vmem %s1451_s0, %s1353_s13  ;;  %1175 = vmatpush3.bf16.msra.mxu0 %v1219_v2  ;;  %1188 = vmatpush3.bf16.msra.mxu1 %v1219_v2  ;;  %s364_s19 = scalar_lea.vmem %s1452_s1, %s1353_s13  ;;  %v1142_v48 = vld [vmem:[%s1456_s5] ss:$0 sm:$0xff]  ;;  %vm634_vm4 = vcmask 1044484   ;;  %vm636_vm5 = vcmask 1045509   ;;  %vm638_vm6 = vcmask 1046534  }
   0xf   : > { %v387_v8 = vld [vmem:[%s360_s16] sm:$0xff]  ;;  %1176 = vmatprep.subr.bf16.mxu0 %v1220_v3  ;;  %1187 = vmatprep.subr.bf16.mxu1 %v1220_v3  ;;  %v769_v24 = vunpack.c.0.s8 %v768_v23  ;;  %vm640_vm7 = vcmask 1047559   ;;  %s385_s11 = scalar_lea.vmem %s1459_s8, %s1353_s13  ;;  %s1138_s12 = sshll.u32 %s1465_s27, 1  ;;  %vm905_vm8 = vcmask 1040384   ;;  %vm907_vm9 = vcmask 254976  }
  0x10   : > { %v404_v4 = vsub.s32 2, %v389_v1  ;;  %v1355_v5 = vsub.s32 0, %v389_v1  ;;  %v411_v6 = vsub.s32 3, %v389_v1  ;;  %v397_v7 = vsub.s32 1, %v389_v1  ;;  %v1366_v21 = vld [vmem:[%s364_s19] sm:$0xff]  ;;  %s371_s15 = scalar_lea.vmem %s1457_s6, %s1138_s12 }
  0x11   : > { %v425_v13 = vsub.s32 5, %v389_v1  ;;  %v418_v14 = vsub.s32 4, %v389_v1  ;;  %v439_v17 = vsub.s32 7, %v389_v1  ;;  %v432_v18 = vsub.s32 6, %v389_v1 }
  0x12   : > { %v405_v9 = vrot.slane %v387_v8, %v404_v4  ;;  %v391_v10 = vrot.slane %v387_v8, %v1355_v5  ;;  %v412_v11 = vrot.slane %v387_v8, %v411_v6  ;;  %v398_v12 = vrot.slane %v387_v8, %v397_v7  ;;  %1177 = vmatpush3.bf16.msra.mxu0 %v1220_v3 }
  0x13   : > { %1189 = vmatpush3.bf16.msra.mxu1 %v1220_v3  ;;  %v426_v15 = vrot.slane %v387_v8, %v425_v13  ;;  %v419_v16 = vrot.slane %v387_v8, %v418_v14  ;;  %v440_v19 = vrot.slane %v387_v8, %v439_v17  ;;  %v433_v20 = vrot.slane %v387_v8, %v432_v18 }
  0x14   : > { %407 = vbcast.lane.b32.xlu1 %v405_v9, 256  ;;  %393 = vbcast.lane.b32.xlu0 %v391_v10, 256  ;;  %v772_v25 = vsub.s32 %v769_v24, %v389_v1  ;;  %v766_v27 = vcombine.high %v1366_v21, %v1366_v21 }
  0x16   : > { %v773_v26 = vrot.slane %v1366_v21, %v772_v25  ;;  %v780_v33 = vrot.slane %v766_v27, %v772_v25 }
  0x18   : > { %414 = vbcast.lane.b32.xlu1 %v412_v11, 256  ;;  %400 = vbcast.lane.b32.xlu0 %v398_v12, 256  ;;  %v789_v28 = vrot.slane %v773_v26, %v772_v25  ;;  %v781_v29 = vcombine.high %v773_v26, %v773_v26  ;;  %v782_v37 = vcombine.high %v780_v33, %v780_v33 }
  0x19   : > { %v796_v38 = vrot.slane %v780_v33, %v772_v25 }
  0x1a   : > { %v818_v30 = vrot.slane %v789_v28, %v1355_v5  ;;  %v803_v31 = vrot.slane %v781_v29, %v772_v25  ;;  %v811_v32 = vcombine.high %v789_v28, %v789_v28  ;;  %v810_v40 = vrot.slane %v782_v37, %v772_v25 }
  0x1b   : > { %v834_v41 = vrot.slane %v796_v38, %v1355_v5  ;;  %v812_v42 = vcombine.high %v796_v38, %v796_v38 }
  0x1c   : > { %428 = vbcast.lane.b32.xlu1 %v426_v15, 256  ;;  %421 = vbcast.lane.b32.xlu0 %v419_v16, 256  ;;  %v822_v34 = vrot.slane %v803_v31, %v1355_v5  ;;  %v826_v35 = vrot.slane %v811_v32, %v1355_v5  ;;  %v813_v36 = vcombine.high %v803_v31, %v803_v31 }
  0x1d   : > { %v838_v43 = vrot.slane %v810_v40, %v1355_v5  ;;  %v814_v44 = vcombine.high %v810_v40, %v810_v40  ;;  %v842_v45 = vrot.slane %v812_v42, %v1355_v5 }
  0x1e   : > { %v830_v39 = vrot.slane %v813_v36, %v1355_v5 }
  0x1f   : > { %v846_v46 = vrot.slane %v814_v44, %v1355_v5 }
  0x20   : > { %442 = vbcast.lane.b32.xlu1 %v440_v19, 256  ;;  %435 = vbcast.lane.b32.xlu0 %v433_v20, 256 }
  0x24   : > { %543 = vrot.lane.b32.xlu0 %v1366_v21, %s1277_s20  ;;  %847 = vrot.lane.b32.xlu1 %v818_v30, %s1279_s21  ;;  %s378_s20 = scalar_lea.vmem %s1458_s7, %s1138_s12 }
  0x28   : > { %849 = vrot.lane.b32.xlu0 %v822_v34, %s1279_s21  ;;  %851 = vrot.lane.b32.xlu1 %v826_v35, %s1279_s21 }
  0x2c   : > { %879 = vrot.lane.b32.xlu0 %v1366_v21, %s1280_s22  ;;  %853 = vrot.lane.b32.xlu1 %v830_v39, %s1279_s21 }
  0x30   : > { %855 = vrot.lane.b32.xlu0 %v834_v41, %s1279_s21  ;;  %857 = vrot.lane.b32.xlu1 %v838_v43, %s1279_s21 }
  0x34   : > { %859 = vrot.lane.b32.xlu0 %v842_v45, %s1279_s21  ;;  %861 = vrot.lane.b32.xlu1 %v846_v46, %s1279_s21 }
  0x86   : > { %v408_v49 = vpop.permute.xlu1 %407  ;;  %v394_v50 = vpop.permute.xlu0 %393 }
  0x87   : > { %v453_v51 = vmul.f32 %v1141_v47, %v408_v49  ;;  %v451_v52 = vmul.f32 %v1141_v47, %v394_v50 }
  0x89   : > { %v468_v53 = vadd.f32 %v1142_v48, %v453_v51  ;;  %v466_v54 = vadd.f32 %v1142_v48, %v451_v52 }
  0x8a   : > { %v415_v55 = vpop.permute.xlu1 %414  ;;  %v401_v56 = vpop.permute.xlu0 %400 }
  0x8b   : > { %v476_v57 = vpack.c.bf16 %v468_v53, %v468_v53  ;;  %v474_v58 = vpack.c.bf16 %v466_v54, %v466_v54  ;;  %v454_v59 = vmul.f32 %v1141_v47, %v415_v55  ;;  %v452_v60 = vmul.f32 %v1141_v47, %v401_v56 }
  0x8d   : > { %v484_v61 = vunpack.c.l.bf16 %v476_v57  ;;  %v482_v62 = vunpack.c.l.bf16 %v474_v58  ;;  %v469_v63 = vadd.f32 %v1142_v48, %v454_v59  ;;  %v467_v0 = vadd.f32 %v1142_v48, %v452_v60 }
  0x8e   : > { %v429_v1 = vpop.permute.xlu1 %428  ;;  %v422_v2 = vpop.permute.xlu0 %421 }
  0x8f   : > { %v1145_v3 = vmul.f32 -1.442695, %v484_v61  ;;  %v1143_v4 = vmul.f32 -1.442695, %v482_v62  ;;  %v477_v5 = vpack.c.bf16 %v469_v63, %v469_v63  ;;  %v1165_v6 = vpack.c.bf16 %v469_v63, %v468_v53 }
  0x90   : > { %v475_v7 = vpack.c.bf16 %v467_v0, %v467_v0  ;;  %v456_v8 = vmul.f32 %v1141_v47, %v429_v1  ;;  %v455_v9 = vmul.f32 %v1141_v47, %v422_v2  ;;  %v1164_v10 = vpack.c.bf16 %v467_v0, %v466_v54 }
  0x91   : > { %1221 = vpow2.f32 %v1145_v3  ;;  %v485_v11 = vunpack.c.l.bf16 %v477_v5 }
  0x92   : > { %1223 = vpow2.f32 %v1143_v4  ;;  %v483_v12 = vunpack.c.l.bf16 %v475_v7  ;;  %v471_v13 = vadd.f32 %v1142_v48, %v456_v8  ;;  %v470_v14 = vadd.f32 %v1142_v48, %v455_v9  ;;  %1178 = vmatprep.mubr.msk.bf16.mxu0 %vm554_vm0, %v1164_v10  ;;  %v443_v15 = vpop.permute.xlu1 %442  ;;  %v436_v16 = vpop.permute.xlu0 %435 }
  0x93   : > { %v1146_v17 = vmul.f32 -1.442695, %v485_v11  ;;  %v458_v18 = vmul.f32 %v1141_v47, %v443_v15  ;;  %1179 = vmatmul.mubr.msk.bf16.vlgmr.msra.gmra.mxu0 %vm554_vm0, %v1165_v6  ;;  %v457_v19 = vmul.f32 %v1141_v47, %v436_v16 }
  0x94   : > { %v1144_v20 = vmul.f32 -1.442695, %v483_v12  ;;  %v479_v22 = vpack.c.bf16 %v471_v13, %v471_v13  ;;  %v478_v23 = vpack.c.bf16 %v470_v14, %v470_v14  ;;  %v1166_v24 = vpack.c.bf16 %v471_v13, %v470_v14 }
  0x95   : > { %1225 = vpow2.f32 %v1146_v17  ;;  %v473_v25 = vadd.f32 %v1142_v48, %v458_v18  ;;  %v472_v26 = vadd.f32 %v1142_v48, %v457_v19 }
  0x96   : > { %1227 = vpow2.f32 %v1144_v20  ;;  %v487_v27 = vunpack.c.l.bf16 %v479_v22  ;;  %v486_v28 = vunpack.c.l.bf16 %v478_v23  ;;  %1182 = vmatprep.mubr.msk.bf16.mxu1 %vm554_vm0, %v1166_v24  ;;  %v544_v54 = vpop.permute.xlu0 %543 }
  0x97   : > { %v481_v29 = vpack.c.bf16 %v473_v25, %v473_v25  ;;  %v480_v30 = vpack.c.bf16 %v472_v26, %v472_v26  ;;  %v1167_v31 = vpack.c.bf16 %v473_v25, %v472_v26 }
  0x98   : > { %v1148_v32 = vmul.f32 -1.442695, %v487_v27  ;;  %v1147_v33 = vmul.f32 -1.442695, %v486_v28 }
  0x99   : > { %v489_v34 = vunpack.c.l.bf16 %v481_v29  ;;  %v488_v35 = vunpack.c.l.bf16 %v480_v30  ;;  %1183 = vmatmul.mubr.msk.bf16.vlgmr.msra.gmra.mxu1 %vm554_vm0, %v1167_v31 }
  0x9a   : > { %1229 = vpow2.f32 %v1148_v32 }
  0x9b   : > { %1231 = vpow2.f32 %v1147_v33  ;;  %v1150_v36 = vmul.f32 -1.442695, %v489_v34  ;;  %v1149_v37 = vmul.f32 -1.442695, %v488_v35 }
  0x9d   : > { %1233 = vpow2.f32 %v1150_v36 }
  0x9e   : > { %v1222_v38 = vpop.eup %1221  ;;  %1235 = vpow2.f32 %v1149_v37 }
  0x9f   : > { %v1224_v39 = vpop.eup %1223  ;;  %v520_v40 = vadd.f32 1.0, %v1222_v38 }
  0xa0   : > { %v518_v41 = vadd.f32 1.0, %v1224_v39 }
  0xa1   : > { %1237 = vrcp.f32 %v520_v40 }
  0xa2   : > { %v1226_v42 = vpop.eup %1225  ;;  %1239 = vrcp.f32 %v518_v41 }
  0xa3   : > { %v1228_v43 = vpop.eup %1227  ;;  %v521_v44 = vadd.f32 1.0, %v1226_v42 }
  0xa4   : > { %v519_v45 = vadd.f32 1.0, %v1228_v43 }
  0xa5   : > { %1241 = vrcp.f32 %v521_v44 }
  0xa6   : > { %1243 = vrcp.f32 %v519_v45 }
  0xa7   : > { %v1230_v46 = vpop.eup %1229 }
  0xa8   : > { %v1232_v47 = vpop.eup %1231  ;;  %v523_v48 = vadd.f32 1.0, %v1230_v46 }
  0xa9   : > { %v522_v49 = vadd.f32 1.0, %v1232_v47 }
  0xaa   : > { %v1234_v50 = vpop.eup %1233  ;;  %1245 = vrcp.f32 %v523_v48 }
  0xab   : > { %v1236_v51 = vpop.eup %1235  ;;  %1247 = vrcp.f32 %v522_v49  ;;  %v525_v52 = vadd.f32 1.0, %v1234_v50 }
  0xac   : > { %v524_v53 = vadd.f32 1.0, %v1236_v51 }
  0xad   : > { %1249 = vrcp.f32 %v525_v52 }
  0xae   : > { %v1238_v55 = vpop.eup %1237  ;;  %1251 = vrcp.f32 %v524_v53 }
  0xaf   : > { %v1240_v56 = vpop.eup %1239  ;;  %v548_v57 = vmul.f32 %v1238_v55, %v544_v54 }
  0xb0   : > { %v546_v58 = vmul.f32 %v1240_v56, %v544_v54 }
  0xb1   : > { %v569_v59 = vsel %vm554_vm0, %v548_v57, 0.0 }
  0xb2   : > { %v1242_v60 = vpop.eup %1241  ;;  %v555_v61 = vsel %vm554_vm0, %v546_v58, 0.0  ;;  %v570_v62 = vrot.slane %v569_v59, 4 }
  0xb3   : > { %v1244_v63 = vpop.eup %1243  ;;  %v549_v0 = vmul.f32 %v1242_v60, %v544_v54  ;;  %v556_v1 = vrot.slane %v555_v61, 4 }
  0xb4   : > { %v547_v2 = vmul.f32 %v1244_v63, %v544_v54  ;;  %v571_v3 = vadd.f32 %v570_v62, %v569_v59 }
  0xb5   : > { %v557_v4 = vadd.f32 %v556_v1, %v555_v61  ;;  %v576_v5 = vsel %vm554_vm0, %v549_v0, 0.0 }
  0xb6   : > { %v562_v6 = vsel %vm554_vm0, %v547_v2, 0.0  ;;  %v572_v7 = vrot.slane %v571_v3, 2  ;;  %v577_v8 = vrot.slane %v576_v5, 4 }
  0xb7   : > { %v1246_v9 = vpop.eup %1245  ;;  %v558_v10 = vrot.slane %v557_v4, 2  ;;  %v563_v11 = vrot.slane %v562_v6, 4 }
  0xb8   : > { %v1248_v12 = vpop.eup %1247  ;;  %v551_v13 = vmul.f32 %v1246_v9, %v544_v54  ;;  %v573_v14 = vadd.f32 %v572_v7, %v571_v3  ;;  %v578_v15 = vadd.f32 %v577_v8, %v576_v5 }
  0xb9   : > { %v550_v16 = vmul.f32 %v1248_v12, %v544_v54  ;;  %v559_v17 = vadd.f32 %v558_v10, %v557_v4  ;;  %v564_v18 = vadd.f32 %v563_v11, %v562_v6 }
  0xba   : > { %v1250_v19 = vpop.eup %1249  ;;  %v579_v20 = vrot.slane %v578_v15, 2  ;;  %v590_v22 = vsel %vm554_vm0, %v551_v13, 0.0  ;;  %v574_v29 = vrot.slane %v573_v14, 1 }
  0xbb   : > { %v1252_v23 = vpop.eup %1251  ;;  %v553_v24 = vmul.f32 %v1250_v19, %v544_v54  ;;  %v560_v25 = vrot.slane %v559_v17, 1  ;;  %v565_v26 = vrot.slane %v564_v18, 2  ;;  %v583_v27 = vsel %vm554_vm0, %v550_v16, 0.0 }
  0xbc   : > { %v552_v28 = vmul.f32 %v1252_v23, %v544_v54  ;;  %v580_v30 = vadd.f32 %v579_v20, %v578_v15  ;;  %v584_v31 = vrot.slane %v583_v27, 4  ;;  %v591_v33 = vrot.slane %v590_v22, 4 }
  0xbd   : > { %v566_v32 = vadd.f32 %v565_v26, %v564_v18  ;;  %v604_v34 = vsel %vm554_vm0, %v553_v24, 0.0  ;;  %v561_v39 = vadd.f32 %v560_v25, %v559_v17  ;;  %v575_v43 = vadd.f32 %v574_v29, %v573_v14 }
  0xbe   : > { %v581_v35 = vrot.slane %v580_v30, 1  ;;  %v585_v36 = vadd.f32 %v584_v31, %v583_v27  ;;  %v597_v37 = vsel %vm554_vm0, %v552_v28, 0.0  ;;  %v605_v38 = vrot.slane %v604_v34, 4 }
  0xbf   : > { %v567_v40 = vrot.slane %v566_v32, 1  ;;  %v592_v41 = vadd.f32 %v591_v33, %v590_v22  ;;  %v598_v42 = vrot.slane %v597_v37, 4  ;;  %v612_v54 = vmul.f32 0.125, %v561_v39  ;;  %v850_v33 = vpop.permute.xlu0 %849 }
  0xc0   : > { %v586_v44 = vrot.slane %v585_v36, 2  ;;  %v606_v45 = vadd.f32 %v605_v38, %v604_v34  ;;  %v582_v47 = vadd.f32 %v581_v35, %v580_v30  ;;  %v614_v58 = vmul.f32 0.125, %v575_v43  ;;  %v1151_v35 = vld [vmem:[%s1454_s3] ss:$0 sm:$0xff] }
  0xc1   : > { %v568_v46 = vadd.f32 %v567_v40, %v566_v32  ;;  %v593_v48 = vrot.slane %v592_v41, 2  ;;  %v599_v49 = vadd.f32 %v598_v42, %v597_v37  ;;  %v848_v32 = vpop.permute.xlu1 %847 }
  0xc2   : > { %v587_v50 = vadd.f32 %v586_v44, %v585_v36  ;;  %v607_v51 = vrot.slane %v606_v45, 2  ;;  %v615_v61 = vmul.f32 0.125, %v582_v47 }
  0xc3   : > { %v594_v52 = vadd.f32 %v593_v48, %v592_v41  ;;  %v600_v53 = vrot.slane %v599_v49, 2  ;;  %v613_v55 = vmul.f32 0.125, %v568_v46  ;;  %v880_v36 = vpop.permute.xlu0 %879 }
  0xc4   : > { %v588_v56 = vrot.slane %v587_v50, 1  ;;  %v608_v57 = vadd.f32 %v607_v51, %v606_v45 }
  0xc5   : > { %v595_v59 = vrot.slane %v594_v52, 1  ;;  %v601_v60 = vadd.f32 %v600_v53, %v599_v49  ;;  %v629_v62 = vsel %vm628_vm1, %v613_v55, %v612_v54  ;;  %v852_v34 = vpop.permute.xlu1 %851 }
  0xc6   : > { %v589_v63 = vadd.f32 %v588_v56, %v587_v50  ;;  %v609_v0 = vrot.slane %v608_v57, 1  ;;  %v631_v1 = vsel %vm630_vm2, %v614_v58, %v629_v62 }
  0xc7   : > { %v596_v2 = vadd.f32 %v595_v59, %v594_v52  ;;  %v602_v3 = vrot.slane %v601_v60, 1  ;;  %v633_v4 = vsel %vm632_vm3, %v615_v61, %v631_v1  ;;  %v856_v44 = vpop.permute.xlu0 %855 }
  0xc8   : > { %v610_v5 = vadd.f32 %v609_v0, %v608_v57  ;;  %v616_v6 = vmul.f32 0.125, %v589_v63 }
  0xc9   : > { %v603_v7 = vadd.f32 %v602_v3, %v601_v60  ;;  %v617_v8 = vmul.f32 0.125, %v596_v2  ;;  %v854_v37 = vpop.permute.xlu1 %853 }
  0xca   : > { %v619_v9 = vmul.f32 0.125, %v610_v5  ;;  %v635_v10 = vsel %vm634_vm4, %v616_v6, %v633_v4 }
  0xcb   : > { %v618_v11 = vmul.f32 0.125, %v603_v7  ;;  %v637_v12 = vsel %vm636_vm5, %v617_v8, %v635_v10  ;;  %v860_v59 = vpop.permute.xlu0 %859 }
  0xcd   : > { %v639_v13 = vsel %vm638_vm6, %v618_v11, %v637_v12  ;;  %v858_v47 = vpop.permute.xlu1 %857 }
  0xce   : > { %v641_v14 = vsel %vm640_vm7, %v619_v9, %v639_v13 }
  0xcf   : > { %v643_v15 = vadd.f32 %v641_v14, %v1366_v21 }
  0xd1   : > { %644 = vst.msk [vmem:[%s385_s11] sm:$0xff] %vm554_vm0, %v643_v15  ;;  %v897_v16 = vmul.f32 %v643_v15, %v643_v15  ;;  %v890_v17 = vsel %vm554_vm0, %v643_v15, 0.0  ;;  %v862_v3 = vpop.permute.xlu1 %861 }
  0xd2   : > { %v891_v18 = vrot.slane %v890_v17, 4 }
  0xd3   : > { %v898_v19 = vsel %vm554_vm0, %v897_v16, 0.0 }
  0xd4   : > { %v892_v20 = vadd.f32 %v891_v18, %v890_v17  ;;  %v899_v22 = vrot.slane %v898_v19, 4 }
  0xd6   : > { %v893_v23 = vrot.slane %v892_v20, 2  ;;  %v900_v24 = vadd.f32 %v899_v22, %v898_v19 }
  0xd8   : > { %v894_v25 = vadd.f32 %v893_v23, %v892_v20  ;;  %v901_v26 = vrot.slane %v900_v24, 2 }
  0xda   : > { %v895_v27 = vrot.slane %v894_v25, 1  ;;  %v902_v28 = vadd.f32 %v901_v26, %v900_v24 }
  0xdc   : > { %v903_v29 = vrot.slane %v902_v28, 1  ;;  %v896_v21 = vadd.f32 %v895_v27, %v894_v25 }
  0xde   : > { %v904_v30 = vadd.f32 %v903_v29, %v902_v28 }
  0xe0   : > { %v906_v31 = vsel %vm905_vm8, %v896_v21, %v904_v30 }
  0xe1   : > { %908 = vst.msk [vmem:[%s371_s15] sm:$0x3] %vm907_vm9, %v906_v31 }
 0x153   : > { %v1180_v38 = vpop.f32.mrf.mxu0 }
 0x154   : > { %v743_v39 = vadd.f32 %v1180_v38, %v1151_v35 }
 0x155   : > { %v734_v40 = vpop.f32.mrf.mxu0 }
 0x156   : > { %v735_v41 = vadd.f32 %v1151_v35, %v734_v40  ;;  %v873_v42 = vadd.f32 %v852_v34, %v743_v39 }
 0x157   : > { %v1181_v43 = vpop.f32.mrf.mxu0 }
 0x158   : > { %v871_v45 = vadd.f32 %v848_v32, %v735_v41  ;;  %v746_v46 = vadd.f32 %v1181_v43, %v1151_v35  ;;  %v884_v53 = vadd.f32 %v880_v36, %v873_v42 }
 0x159   : > { %v737_v48 = vpop.f32.mrf.mxu0  ;;  %v1184_v49 = vpop.f32.mrf.mxu1 }
 0x15a   : > { %v882_v50 = vadd.f32 %v880_v36, %v871_v45  ;;  %v874_v51 = vadd.f32 %v854_v37, %v746_v46  ;;  %v738_v52 = vadd.f32 %v1151_v35, %v737_v48  ;;  %v759_v56 = vadd.f32 %v1184_v49, %v1151_v35 }
 0x15b   : > { %v750_v54 = vpop.f32.mrf.mxu1  ;;  %v932_v0 = vmul.f32 %v884_v53, %v884_v53  ;;  %v912_v11 = vsel %vm554_vm0, %v884_v53, 0.0 }
 0x15c   : > { %v872_v55 = vadd.f32 %v850_v33, %v738_v52  ;;  %v885_v57 = vadd.f32 %v880_v36, %v874_v51  ;;  %v751_v58 = vadd.f32 %v1151_v35, %v750_v54  ;;  %v930_v61 = vmul.f32 %v882_v50, %v882_v50 }
 0x15d   : > { %v1185_v60 = vpop.f32.mrf.mxu1  ;;  %v909_v63 = vsel %vm554_vm0, %v882_v50, 0.0  ;;  %v877_v7 = vadd.f32 %v860_v59, %v759_v56  ;;  %v941_v19 = vsel %vm554_vm0, %v932_v0, 0.0 }
 0x15e   : > { %v883_v62 = vadd.f32 %v880_v36, %v872_v55  ;;  %v875_v1 = vadd.f32 %v856_v44, %v751_v58  ;;  %v762_v2 = vadd.f32 %v1185_v60, %v1151_v35  ;;  %v933_v9 = vmul.f32 %v885_v57, %v885_v57 }
 0x15f   : > { %v753_v4 = vpop.f32.mrf.mxu1  ;;  %v938_v13 = vsel %vm554_vm0, %v930_v61, 0.0  ;;  %v914_v20 = vsel %vm554_vm0, %v885_v57, 0.0  ;;  %v888_v23 = vadd.f32 %v880_v36, %v877_v7 }
 0x160   : > { %v910_v5 = vsel %vm554_vm0, %v883_v62, 0.0  ;;  %v931_v6 = vmul.f32 %v883_v62, %v883_v62  ;;  %v754_v8 = vadd.f32 %v1151_v35, %v753_v4  ;;  %v886_v12 = vadd.f32 %v880_v36, %v875_v1 }
 0x161   : > { %v911_v10 = vadd.f32 %v910_v5, %v909_v63  ;;  %v878_v15 = vadd.f32 %v862_v3, %v762_v2  ;;  %v943_v25 = vsel %vm554_vm0, %v933_v9, 0.0  ;;  %v936_v34 = vmul.f32 %v888_v23, %v888_v23 }
 0x162   : > { %v939_v14 = vsel %vm554_vm0, %v931_v6, 0.0  ;;  %v876_v16 = vadd.f32 %v858_v47, %v754_v8  ;;  %v934_v22 = vmul.f32 %v886_v12, %v886_v12  ;;  %v916_v28 = vsel %vm554_vm0, %v886_v12, 0.0 }
 0x163   : > { %v913_v17 = vadd.f32 %v912_v11, %v911_v10  ;;  %v940_v18 = vadd.f32 %v939_v14, %v938_v13  ;;  %v889_v29 = vadd.f32 %v880_v36, %v878_v15  ;;  %v920_v39 = vsel %vm554_vm0, %v888_v23, 0.0 }
 0x164   : > { %v887_v24 = vadd.f32 %v880_v36, %v876_v16  ;;  %v945_v33 = vsel %vm554_vm0, %v934_v22, 0.0  ;;  %v949_v43 = vsel %vm554_vm0, %v936_v34, 0.0 }
 0x165   : > { %v942_v26 = vadd.f32 %v941_v19, %v940_v18  ;;  %v915_v27 = vadd.f32 %v914_v20, %v913_v17  ;;  %v937_v40 = vmul.f32 %v889_v29, %v889_v29  ;;  %v922_v36 = vsel %vm554_vm0, %v889_v29, 0.0 }
 0x166   : > { %v918_v21 = vsel %vm554_vm0, %v887_v24, 0.0  ;;  %v935_v30 = vmul.f32 %v887_v24, %v887_v24 }
 0x167   : > { %v917_v31 = vadd.f32 %v916_v28, %v915_v27  ;;  %v944_v32 = vadd.f32 %v943_v25, %v942_v26  ;;  %v951_v46 = vsel %vm554_vm0, %v937_v40, 0.0 }
 0x168   : > { %v947_v35 = vsel %vm554_vm0, %v935_v30, 0.0 }
 0x169   : > { %v946_v37 = vadd.f32 %v945_v33, %v944_v32  ;;  %v919_v38 = vadd.f32 %v918_v21, %v917_v31 }
 0x16b   : > { %v921_v41 = vadd.f32 %v920_v39, %v919_v38  ;;  %v948_v42 = vadd.f32 %v947_v35, %v946_v37 }
 0x16d   : > { %v923_v44 = vadd.f32 %v922_v36, %v921_v41  ;;  %v950_v45 = vadd.f32 %v949_v43, %v948_v42 }
 0x16f   : > { %v924_v47 = vrot.slane %v923_v44, 4  ;;  %v952_v48 = vadd.f32 %v951_v46, %v950_v45 }
 0x171   : > { %v925_v49 = vadd.f32 %v924_v47, %v923_v44  ;;  %v953_v50 = vrot.slane %v952_v48, 4 }
 0x173   : > { %v926_v51 = vrot.slane %v925_v49, 2  ;;  %v954_v52 = vadd.f32 %v953_v50, %v952_v48 }
 0x175   : > { %v927_v53 = vadd.f32 %v926_v51, %v925_v49  ;;  %v955_v54 = vrot.slane %v954_v52, 2 }
 0x177   : > { %v928_v55 = vrot.slane %v927_v53, 1  ;;  %v956_v56 = vadd.f32 %v955_v54, %v954_v52 }
 0x179   : > { %v957_v57 = vrot.slane %v956_v56, 1  ;;  %v929_v58 = vadd.f32 %v928_v55, %v927_v53 }
 0x17b   : > { %v958_v59 = vadd.f32 %v957_v57, %v956_v56 }
 0x17d   : > { %v959_v60 = vsel %vm905_vm8, %v929_v58, %v958_v59 }
 0x17e   : > { %960 = vst.msk [vmem:[%s378_s20] sm:$0x3] %vm907_vm9, %v959_v60 }
 0x17f PF: > { %s19_s29 = sadd.s32 1, %s1275_s29   ;;  %s1460_s27 = smov %s1271_s28 }
 0x180   : > { %p16_p5 = scmp.ge.s32.totalorder %s19_s29, 4   ;;  %s1461_s28 = smov %s1463_s30 }
 0x182   :  { %18 = sbr.rel (!%p16_p5) target bundleno = 2 (0x2), region = 102 }

// kernel: nonautoregressive_policy_forward.9
= control target key start
LH: loop header
LB: loop body
LE: loop exit
PB: predicated region body
PF: predicated region fallthrough
CT: control target
= control target key end

     0   :  { %s1190_s21 = smov 0   ;;  %s1192_s22 = smov 0   ;;  %s1299_s0 = inlined_call_operand.vmem [shape: bf16[2,8,8,32], index: 0, kind: input, shape index: {}]   ;;  %s1300_s1 = inlined_call_operand.vmem [shape: f32[2,8,128], index: 1, kind: input, shape index: {}]   ;;  %s1301_s2 = inlined_call_operand.vmem [shape: bf16[32,32], index: 2, kind: input, shape index: {}]   ;;  %s1302_s3 = inlined_call_operand.vmem [shape: f32[1,32], index: 3, kind: input, shape index: {}]   ;;  %s1303_s4 = inlined_call_operand.vmem [shape: f32[2,1,2,32], index: 4, kind: output, shape index: {0}]   ;;  %s1304_s5 = inlined_call_operand.vmem [shape: f32[2,1,2,32], index: 5, kind: output, shape index: {1}]   ;;  %s1305_s6 = inlined_call_operand.vmem [shape: f32[2,8,32], index: 6, kind: output, shape index: {2}]  }
   0x1   :  { %s1194_s23 = smov 0  }
   0x2 LB: > { %s29_s24 = sadd.s32 1, %s1145_s22  ;;  %p1005_p0 = scmp.ge.s32.totalorder %s1149_s23, 1  ;;  %s1149_s23 = sphi %s1194_s23, %s17_s23   ;;  %s1145_s22 = sphi %s1192_s22, %s1307_s22   ;;  %s1141_s21 = sphi %s1190_s21, %s1306_s21  }
   0x3   : > { %p31_p1 = scmp.ge.s32.totalorder %s29_s24, 2  ;;  %p251_p2 = scmp.lt.s32.totalorder %s1149_s23, 3 }
   0x5   : > { %s1309_s24 = smov (%p31_p1, %s29_s24), 0  ;;  %p252_p3 = pnand %p1005_p0, %p251_p2 }
   0x6   : > { %p306_p4 = scmp.lt.s32.totalorder (!%p252_p3), %s1141_s21, 1  ;;  %s1152_s13 = smov (!%p252_p3), 96  }
   0x7   : > { %255 = sbr.rel (%p252_p3) target bundleno = 257 (0x101), region = 36  ;;  %s1153_s14 = smov (!%p252_p3), 64  }
   0x8   : > { %s1154_s15 = smov (!%p252_p3), 32  }
   0xc   : > { %v1084_v0 = vld [vmem:[%s1301_s2 + $0x8] sm:$0xff]   ;;  %v1085_v1 = vld [vmem:[%s1301_s2] sm:$0xff]   ;;  %s1311_s21 = smov (!%p306_p4, %s1141_s21), 1  ;;  %v1151_v2 = vmov 1966171168   ;;  %v637_v4 = vlaneseq  ;;  %vm421_vm0 = vcmask 261120  }
   0xd   : > { %1040 = vmatprep.subr.bf16.mxu0 %v1084_v0  ;;  %1052 = vmatprep.subr.bf16.mxu1 %v1084_v0  ;;  %s1033_s29 = sshll.u32 %s1311_s21, 5  ;;  %s1008_s30 = sshll.u32 %s1311_s21, 3  ;;  %v635_v3 = vunpack.c.l.s4 %v1151_v2  ;;  %vm495_vm1 = vcmask 1041409   ;;  %vm497_vm2 = vcmask 1042434   ;;  %vm499_vm3 = vcmask 1043459  }
   0xe   : > { %1041 = vmatpush3.bf16.msra.mxu0 %v1084_v0  ;;  %1054 = vmatpush3.bf16.msra.mxu1 %v1084_v0  ;;  %s313_s9 = scalar_lea.vmem %s1299_s0, %s1033_s29  ;;  %s318_s12 = scalar_lea.vmem %s1300_s1, %s1008_s30  ;;  %v638_v11 = vshrl.u32 %v637_v4, 7  ;;  %vm501_vm4 = vcmask 1044484   ;;  %vm503_vm5 = vcmask 1045509   ;;  %vm505_vm6 = vcmask 1046534  }
   0xf   : > { %1042 = vmatprep.subr.bf16.mxu0 %v1085_v1  ;;  %1053 = vmatprep.subr.bf16.mxu1 %v1085_v1  ;;  %v341_v5 = vld [vmem:[%s313_s9] sm:$0xff]   ;;  %v345_v6 = vld [vmem:[%s313_s9 + $0x10] sm:$0xff]   ;;  %v343_v7 = vld [vmem:[%s313_s9 + $0x8] sm:$0xff]   ;;  %v636_v10 = vunpack.c.0.s8 %v635_v3  ;;  %vm507_vm7 = vcmask 1047559   ;;  %s339_s18 = scalar_lea.vmem %s1305_s6, %s1008_s30  ;;  %s1009_s19 = sshll.u32 %s1311_s21, 1  ;;  %vm772_vm8 = vcmask 1040384  }
  0x10   : > { %v1226_v8 = vld [vmem:[%s318_s12] sm:$0xff]  ;;  %v347_v9 = vld [vmem:[%s313_s9 + $0x18] sm:$0xff]   ;;  %1044 = vmatprep.mubr.msk.bf16.mxu0 %vm421_vm0, %v341_v5  ;;  %1048 = vmatprep.mubr.msk.bf16.mxu1 %vm421_vm0, %v345_v6  ;;  %v684_v16 = vsub.s32 0, %v638_v11  ;;  %v349_v35 = vunpack.c.l.bf16 %v341_v5  ;;  %v350_v36 = vunpack.c.h.bf16 %v341_v5  ;;  %v353_v37 = vunpack.c.l.bf16 %v345_v6  ;;  %s325_s26 = scalar_lea.vmem %s1303_s4, %s1009_s19  ;;  %s332_s7 = scalar_lea.vmem %s1304_s5, %s1009_s19 }
  0x11   : > { %410 = vrot.lane.b32.xlu0 %v1226_v8, %s1152_s13  ;;  %v639_v12 = vsub.s32 %v636_v10, %v638_v11  ;;  %v633_v13 = vcombine.high %v1226_v8, %v1226_v8  ;;  %v354_v38 = vunpack.c.h.bf16 %v345_v6  ;;  %v351_v40 = vunpack.c.l.bf16 %v343_v7 }
  0x12   : > { %1043 = vmatpush3.bf16.msra.mxu0 %v1085_v1  ;;  %1055 = vmatpush3.bf16.msra.mxu1 %v1085_v1  ;;  %v1012_v39 = vmul.f32 -1.442695, %v349_v35  ;;  %v1013_v41 = vmul.f32 -1.442695, %v350_v36  ;;  %v352_v42 = vunpack.c.h.bf16 %v343_v7  ;;  %v1016_v43 = vmul.f32 -1.442695, %v353_v37 }
  0x13   : > { %v640_v14 = vrot.slane %v1226_v8, %v639_v12  ;;  %v647_v18 = vrot.slane %v633_v13, %v639_v12  ;;  %v355_v44 = vunpack.c.l.bf16 %v347_v9  ;;  %v1017_v45 = vmul.f32 -1.442695, %v354_v38 }
  0x14   : > { %v356_v46 = vunpack.c.h.bf16 %v347_v9  ;;  %1095 = vpow2.f32 %v1012_v39  ;;  %v1014_v47 = vmul.f32 -1.442695, %v351_v40  ;;  %v1015_v48 = vmul.f32 -1.442695, %v352_v42 }
  0x15   : > { %1045 = vmatmul.mubr.msk.bf16.vlgmr.msra.gmra.mxu0 %vm421_vm0, %v343_v7  ;;  %1049 = vmatmul.mubr.msk.bf16.vlgmr.msra.gmra.mxu1 %vm421_vm0, %v347_v9  ;;  %v656_v15 = vrot.slane %v640_v14, %v639_v12  ;;  %v648_v17 = vcombine.high %v640_v14, %v640_v14  ;;  %v663_v23 = vrot.slane %v647_v18, %v639_v12  ;;  %1097 = vpow2.f32 %v1013_v41 }
  0x16   : > { %v649_v26 = vcombine.high %v647_v18, %v647_v18  ;;  %1099 = vpow2.f32 %v1016_v43  ;;  %v1018_v49 = vmul.f32 -1.442695, %v355_v44  ;;  %v1019_v50 = vmul.f32 -1.442695, %v356_v46 }
  0x17   : > { %v670_v19 = vrot.slane %v648_v17, %v639_v12  ;;  %v678_v20 = vcombine.high %v656_v15, %v656_v15  ;;  %v685_v21 = vrot.slane %v656_v15, %v684_v16  ;;  %v701_v27 = vrot.slane %v663_v23, %v684_v16 }
  0x18   : > { %v679_v28 = vcombine.high %v663_v23, %v663_v23  ;;  %v677_v30 = vrot.slane %v649_v26, %v639_v12  ;;  %1101 = vpow2.f32 %v1017_v45  ;;  %vm774_vm9 = vcmask 254976  }
  0x19   : > { %v689_v22 = vrot.slane %v670_v19, %v684_v16  ;;  %714 = vrot.lane.b32.xlu0 %v685_v21, %s1153_s14  ;;  %v680_v24 = vcombine.high %v670_v19, %v670_v19  ;;  %v693_v25 = vrot.slane %v678_v20, %v684_v16  ;;  %1103 = vpow2.f32 %v1014_v47 }
  0x1a   : > { %v709_v31 = vrot.slane %v679_v28, %v684_v16  ;;  %v705_v32 = vrot.slane %v677_v30, %v684_v16  ;;  %v681_v33 = vcombine.high %v677_v30, %v677_v30  ;;  %1105 = vpow2.f32 %v1015_v48 }
  0x1b   : > { %716 = vrot.lane.b32.xlu1 %v689_v22, %s1153_s14  ;;  %v697_v29 = vrot.slane %v680_v24, %v684_v16  ;;  %1107 = vpow2.f32 %v1018_v49 }
  0x1c   : > { %v713_v34 = vrot.slane %v681_v33, %v684_v16  ;;  %1109 = vpow2.f32 %v1019_v50 }
  0x1d   : > { %746 = vrot.lane.b32.xlu0 %v1226_v8, %s1154_s15 }
  0x1f   : > { %718 = vrot.lane.b32.xlu1 %v693_v25, %s1153_s14 }
  0x21   : > { %722 = vrot.lane.b32.xlu0 %v701_v27, %s1153_s14  ;;  %v1096_v51 = vpop.eup %1095 }
  0x22   : > { %v1098_v52 = vpop.eup %1097  ;;  %v385_v55 = vadd.f32 1.0, %v1096_v51 }
  0x23   : > { %720 = vrot.lane.b32.xlu1 %v697_v29, %s1153_s14  ;;  %v1100_v53 = vpop.eup %1099  ;;  %v386_v57 = vadd.f32 1.0, %v1098_v52 }
  0x24   : > { %v389_v59 = vadd.f32 1.0, %v1100_v53  ;;  %1111 = vrcp.f32 %v385_v55 }
  0x25   : > { %726 = vrot.lane.b32.xlu0 %v709_v31, %s1153_s14  ;;  %v1102_v54 = vpop.eup %1101  ;;  %1113 = vrcp.f32 %v386_v57 }
  0x26   : > { %v1104_v56 = vpop.eup %1103  ;;  %v390_v61 = vadd.f32 1.0, %v1102_v54  ;;  %1115 = vrcp.f32 %v389_v59 }
  0x27   : > { %724 = vrot.lane.b32.xlu1 %v705_v32, %s1153_s14  ;;  %v1106_v58 = vpop.eup %1105  ;;  %v387_v63 = vadd.f32 1.0, %v1104_v56 }
  0x28   : > { %v1108_v60 = vpop.eup %1107  ;;  %v388_v0 = vadd.f32 1.0, %v1106_v58  ;;  %1117 = vrcp.f32 %v390_v61 }
  0x29   : > { %v1110_v62 = vpop.eup %1109  ;;  %v391_v1 = vadd.f32 1.0, %v1108_v60  ;;  %1119 = vrcp.f32 %v387_v63 }
  0x2a   : > { %v392_v2 = vadd.f32 1.0, %v1110_v62  ;;  %1121 = vrcp.f32 %v388_v0 }
  0x2b   : > { %728 = vrot.lane.b32.xlu1 %v713_v34, %s1153_s14  ;;  %1123 = vrcp.f32 %v391_v1 }
  0x2c   : > { %1125 = vrcp.f32 %v392_v2 }
  0x31   : > { %v1112_v3 = vpop.eup %1111 }
  0x32   : > { %v1114_v4 = vpop.eup %1113 }
  0x33   : > { %v1116_v5 = vpop.eup %1115 }
  0x35   : > { %v1118_v6 = vpop.eup %1117 }
  0x36   : > { %v1120_v7 = vpop.eup %1119 }
  0x37   : > { %v1122_v9 = vpop.eup %1121 }
  0x38   : > { %v1124_v10 = vpop.eup %1123 }
  0x39   : > { %v1126_v11 = vpop.eup %1125 }
  0x83   : > { %v411_v12 = vpop.permute.xlu0 %410 }
  0x84   : > { %v413_v13 = vmul.f32 %v1112_v3, %v411_v12  ;;  %v414_v14 = vmul.f32 %v1114_v4, %v411_v12  ;;  %v415_v15 = vmul.f32 %v1120_v7, %v411_v12  ;;  %v416_v16 = vmul.f32 %v1122_v9, %v411_v12 }
  0x85   : > { %v417_v17 = vmul.f32 %v1116_v5, %v411_v12  ;;  %v418_v18 = vmul.f32 %v1118_v6, %v411_v12  ;;  %v419_v19 = vmul.f32 %v1124_v10, %v411_v12  ;;  %v420_v20 = vmul.f32 %v1126_v11, %v411_v12 }
  0x86   : > { %v422_v21 = vsel %vm421_vm0, %v413_v13, 0.0  ;;  %v429_v22 = vsel %vm421_vm0, %v414_v14, 0.0  ;;  %v436_v23 = vsel %vm421_vm0, %v415_v15, 0.0  ;;  %v443_v24 = vsel %vm421_vm0, %v416_v16, 0.0 }
  0x87   : > { %v423_v25 = vrot.slane %v422_v21, 4  ;;  %v430_v26 = vrot.slane %v429_v22, 4  ;;  %v437_v27 = vrot.slane %v436_v23, 4  ;;  %v444_v28 = vrot.slane %v443_v24, 4 }
  0x88   : > { %v450_v29 = vsel %vm421_vm0, %v417_v17, 0.0  ;;  %v457_v30 = vsel %vm421_vm0, %v418_v18, 0.0  ;;  %v464_v31 = vsel %vm421_vm0, %v419_v19, 0.0  ;;  %v471_v32 = vsel %vm421_vm0, %v420_v20, 0.0 }
  0x89   : > { %v424_v33 = vadd.f32 %v423_v25, %v422_v21  ;;  %v431_v34 = vadd.f32 %v430_v26, %v429_v22  ;;  %v438_v35 = vadd.f32 %v437_v27, %v436_v23  ;;  %v445_v36 = vadd.f32 %v444_v28, %v443_v24 }
  0x8a   : > { %v451_v37 = vrot.slane %v450_v29, 4  ;;  %v458_v38 = vrot.slane %v457_v30, 4  ;;  %v465_v39 = vrot.slane %v464_v31, 4  ;;  %v472_v40 = vrot.slane %v471_v32, 4 }
  0x8b   : > { %v425_v41 = vrot.slane %v424_v33, 2  ;;  %v432_v42 = vrot.slane %v431_v34, 2  ;;  %v439_v43 = vrot.slane %v438_v35, 2  ;;  %v446_v44 = vrot.slane %v445_v36, 2 }
  0x8c   : > { %v452_v45 = vadd.f32 %v451_v37, %v450_v29  ;;  %v459_v46 = vadd.f32 %v458_v38, %v457_v30  ;;  %v466_v47 = vadd.f32 %v465_v39, %v464_v31  ;;  %v473_v48 = vadd.f32 %v472_v40, %v471_v32 }
  0x8d   : > { %v426_v49 = vadd.f32 %v425_v41, %v424_v33  ;;  %v433_v50 = vadd.f32 %v432_v42, %v431_v34  ;;  %v440_v51 = vadd.f32 %v439_v43, %v438_v35  ;;  %v447_v52 = vadd.f32 %v446_v44, %v445_v36 }
  0x8e   : > { %v453_v53 = vrot.slane %v452_v45, 2  ;;  %v460_v54 = vrot.slane %v459_v46, 2  ;;  %v467_v55 = vrot.slane %v466_v47, 2  ;;  %v474_v56 = vrot.slane %v473_v48, 2 }
  0x8f   : > { %v427_v57 = vrot.slane %v426_v49, 1  ;;  %v434_v58 = vrot.slane %v433_v50, 1  ;;  %v441_v59 = vrot.slane %v440_v51, 1  ;;  %v448_v60 = vrot.slane %v447_v52, 1 }
  0x90   : > { %v454_v61 = vadd.f32 %v453_v53, %v452_v45  ;;  %v461_v62 = vadd.f32 %v460_v54, %v459_v46  ;;  %v468_v63 = vadd.f32 %v467_v55, %v466_v47  ;;  %v475_v0 = vadd.f32 %v474_v56, %v473_v48  ;;  %v717_v45 = vpop.permute.xlu1 %716  ;;  %v715_v46 = vpop.permute.xlu0 %714 }
  0x91   : > { %v428_v1 = vadd.f32 %v427_v57, %v426_v49  ;;  %v435_v2 = vadd.f32 %v434_v58, %v433_v50  ;;  %v442_v3 = vadd.f32 %v441_v59, %v440_v51  ;;  %v449_v4 = vadd.f32 %v448_v60, %v447_v52  ;;  %v1020_v49 = vld [vmem:[%s1302_s3] ss:$0 sm:$0xff] }
  0x92   : > { %v455_v5 = vrot.slane %v454_v61, 1  ;;  %v462_v6 = vrot.slane %v461_v62, 1  ;;  %v469_v7 = vrot.slane %v468_v63, 1  ;;  %v476_v9 = vrot.slane %v475_v0, 1 }
  0x93   : > { %v479_v10 = vmul.f32 0.125, %v428_v1  ;;  %v480_v11 = vmul.f32 0.125, %v435_v2  ;;  %v481_v12 = vmul.f32 0.125, %v442_v3  ;;  %v482_v13 = vmul.f32 0.125, %v449_v4 }
  0x94   : > { %v456_v14 = vadd.f32 %v455_v5, %v454_v61  ;;  %v463_v15 = vadd.f32 %v462_v6, %v461_v62  ;;  %v470_v16 = vadd.f32 %v469_v7, %v468_v63  ;;  %v477_v17 = vadd.f32 %v476_v9, %v475_v0  ;;  %v719_v47 = vpop.permute.xlu1 %718  ;;  %v747_v48 = vpop.permute.xlu0 %746 }
  0x95   : > { %v496_v18 = vsel %vm495_vm1, %v480_v11, %v479_v10 }
  0x96   : > { %v483_v19 = vmul.f32 0.125, %v456_v14  ;;  %v484_v20 = vmul.f32 0.125, %v463_v15  ;;  %v485_v21 = vmul.f32 0.125, %v470_v16  ;;  %v498_v22 = vsel %vm497_vm2, %v481_v12, %v496_v18 }
  0x97   : > { %v486_v23 = vmul.f32 0.125, %v477_v17  ;;  %v500_v24 = vsel %vm499_vm3, %v482_v13, %v498_v22 }
  0x98   : > { %v502_v25 = vsel %vm501_vm4, %v483_v19, %v500_v24  ;;  %v721_v50 = vpop.permute.xlu1 %720  ;;  %v723_v56 = vpop.permute.xlu0 %722 }
  0x99   : > { %v504_v26 = vsel %vm503_vm5, %v484_v20, %v502_v25 }
  0x9a   : > { %v506_v27 = vsel %vm505_vm6, %v485_v21, %v504_v26 }
  0x9b   : > { %v508_v28 = vsel %vm507_vm7, %v486_v23, %v506_v27 }
  0x9c   : > { %v510_v29 = vadd.f32 %v508_v28, %v1226_v8  ;;  %v725_v61 = vpop.permute.xlu1 %724  ;;  %v727_v12 = vpop.permute.xlu0 %726 }
  0x9e   : > { %511 = vst.msk [vmem:[%s339_s18] sm:$0xff] %vm421_vm0, %v510_v29  ;;  %v757_v30 = vsel %vm421_vm0, %v510_v29, 0.0  ;;  %v764_v31 = vmul.f32 %v510_v29, %v510_v29 }
  0x9f   : > { %v758_v32 = vrot.slane %v757_v30, 4 }
  0xa0   : > { %v765_v33 = vsel %vm421_vm0, %v764_v31, 0.0  ;;  %v729_v18 = vpop.permute.xlu1 %728 }
  0xa1   : > { %v759_v34 = vadd.f32 %v758_v32, %v757_v30  ;;  %v766_v35 = vrot.slane %v765_v33, 4 }
  0xa3   : > { %v760_v36 = vrot.slane %v759_v34, 2  ;;  %v767_v37 = vadd.f32 %v766_v35, %v765_v33 }
  0xa5   : > { %v761_v38 = vadd.f32 %v760_v36, %v759_v34  ;;  %v768_v39 = vrot.slane %v767_v37, 2 }
  0xa7   : > { %v762_v40 = vrot.slane %v761_v38, 1  ;;  %v769_v41 = vadd.f32 %v768_v39, %v767_v37 }
  0xa9   : > { %v763_v42 = vadd.f32 %v762_v40, %v761_v38  ;;  %v770_v8 = vrot.slane %v769_v41, 1 }
  0xab   : > { %v771_v43 = vadd.f32 %v770_v8, %v769_v41 }
  0xad   : > { %v773_v44 = vsel %vm772_vm8, %v763_v42, %v771_v43 }
  0xae   : > { %775 = vst.msk [vmem:[%s325_s26] sm:$0x3] %vm774_vm9, %v773_v44 }
  0xd5   : > { %v1046_v51 = vpop.f32.mrf.mxu0  ;;  %v1050_v53 = vpop.f32.mrf.mxu1 }
  0xd6   : > { %v610_v52 = vadd.f32 %v1046_v51, %v1020_v49  ;;  %v626_v7 = vadd.f32 %v1050_v53, %v1020_v49 }
  0xd7   : > { %v601_v54 = vpop.f32.mrf.mxu0  ;;  %v617_v57 = vpop.f32.mrf.mxu1 }
  0xd8   : > { %v602_v55 = vadd.f32 %v1020_v49, %v601_v54  ;;  %v740_v59 = vadd.f32 %v719_v47, %v610_v52  ;;  %v618_v63 = vadd.f32 %v1020_v49, %v617_v57  ;;  %v744_v20 = vadd.f32 %v727_v12, %v626_v7 }
  0xd9   : > { %v1047_v58 = vpop.f32.mrf.mxu0  ;;  %v1051_v0 = vpop.f32.mrf.mxu1 }
  0xda   : > { %v738_v60 = vadd.f32 %v715_v46, %v602_v55  ;;  %v613_v62 = vadd.f32 %v1047_v58, %v1020_v49  ;;  %v751_v6 = vadd.f32 %v747_v48, %v740_v59  ;;  %v742_v9 = vadd.f32 %v723_v56, %v618_v63 }
  0xdb   : > { %v604_v1 = vpop.f32.mrf.mxu0  ;;  %v620_v5 = vpop.f32.mrf.mxu1  ;;  %v629_v13 = vadd.f32 %v1051_v0, %v1020_v49  ;;  %v755_v37 = vadd.f32 %v747_v48, %v744_v20 }
  0xdc   : > { %v749_v2 = vadd.f32 %v747_v48, %v738_v60  ;;  %v741_v3 = vadd.f32 %v721_v50, %v613_v62  ;;  %v605_v4 = vadd.f32 %v1020_v49, %v604_v1  ;;  %v621_v11 = vadd.f32 %v1020_v49, %v620_v5 }
  0xdd   : > { %v799_v19 = vmul.f32 %v751_v6, %v751_v6  ;;  %v753_v22 = vadd.f32 %v747_v48, %v742_v9  ;;  %v779_v25 = vsel %vm421_vm0, %v751_v6, 0.0  ;;  %v745_v27 = vadd.f32 %v729_v18, %v629_v13 }
  0xde   : > { %v739_v10 = vadd.f32 %v717_v45, %v605_v4  ;;  %v797_v14 = vmul.f32 %v749_v2, %v749_v2  ;;  %v752_v15 = vadd.f32 %v747_v48, %v741_v3  ;;  %v743_v17 = vadd.f32 %v725_v61, %v621_v11 }
  0xdf   : > { %v776_v21 = vsel %vm421_vm0, %v749_v2, 0.0  ;;  %v808_v34 = vsel %vm421_vm0, %v799_v19, 0.0  ;;  %v801_v35 = vmul.f32 %v753_v22, %v753_v22  ;;  %v783_v40 = vsel %vm421_vm0, %v753_v22, 0.0 }
  0xe0   : > { %v750_v16 = vadd.f32 %v747_v48, %v739_v10  ;;  %v805_v28 = vsel %vm421_vm0, %v797_v14, 0.0  ;;  %v800_v29 = vmul.f32 %v752_v15, %v752_v15  ;;  %v754_v31 = vadd.f32 %v747_v48, %v743_v17 }
  0xe1   : > { %v781_v36 = vsel %vm421_vm0, %v752_v15, 0.0  ;;  %v756_v8 = vadd.f32 %v747_v48, %v745_v27  ;;  %v812_v45 = vsel %vm421_vm0, %v801_v35, 0.0  ;;  %v803_v47 = vmul.f32 %v755_v37, %v755_v37 }
  0xe2   : > { %v777_v23 = vsel %vm421_vm0, %v750_v16, 0.0  ;;  %v798_v24 = vmul.f32 %v750_v16, %v750_v16  ;;  %v810_v41 = vsel %vm421_vm0, %v800_v29, 0.0  ;;  %v802_v42 = vmul.f32 %v754_v31, %v754_v31 }
  0xe3   : > { %v778_v26 = vadd.f32 %v777_v23, %v776_v21  ;;  %v785_v46 = vsel %vm421_vm0, %v754_v31, 0.0  ;;  %v804_v52 = vmul.f32 %v756_v8, %v756_v8  ;;  %v787_v53 = vsel %vm421_vm0, %v755_v37, 0.0 }
  0xe4   : > { %v806_v30 = vsel %vm421_vm0, %v798_v24, 0.0  ;;  %v814_v51 = vsel %vm421_vm0, %v802_v42, 0.0  ;;  %v789_v56 = vsel %vm421_vm0, %v756_v8, 0.0  ;;  %v816_v48 = vsel %vm421_vm0, %v803_v47, 0.0 }
  0xe5   : > { %v780_v32 = vadd.f32 %v779_v25, %v778_v26  ;;  %v807_v33 = vadd.f32 %v806_v30, %v805_v28  ;;  %v818_v59 = vsel %vm421_vm0, %v804_v52, 0.0 }
  0xe7   : > { %v809_v38 = vadd.f32 %v808_v34, %v807_v33  ;;  %v782_v39 = vadd.f32 %v781_v36, %v780_v32 }
  0xe9   : > { %v784_v43 = vadd.f32 %v783_v40, %v782_v39  ;;  %v811_v44 = vadd.f32 %v810_v41, %v809_v38 }
  0xeb   : > { %v786_v49 = vadd.f32 %v785_v46, %v784_v43  ;;  %v813_v50 = vadd.f32 %v812_v45, %v811_v44 }
  0xed   : > { %v788_v54 = vadd.f32 %v787_v53, %v786_v49  ;;  %v815_v55 = vadd.f32 %v814_v51, %v813_v50 }
  0xef   : > { %v790_v57 = vadd.f32 %v789_v56, %v788_v54  ;;  %v817_v58 = vadd.f32 %v816_v48, %v815_v55 }
  0xf1   : > { %v791_v60 = vrot.slane %v790_v57, 4  ;;  %v819_v61 = vadd.f32 %v818_v59, %v817_v58 }
  0xf3   : > { %v792_v62 = vadd.f32 %v791_v60, %v790_v57  ;;  %v820_v63 = vrot.slane %v819_v61, 4 }
  0xf5   : > { %v793_v0 = vrot.slane %v792_v62, 2  ;;  %v821_v1 = vadd.f32 %v820_v63, %v819_v61 }
  0xf7   : > { %v794_v2 = vadd.f32 %v793_v0, %v792_v62  ;;  %v822_v3 = vrot.slane %v821_v1, 2 }
  0xf9   : > { %v795_v4 = vrot.slane %v794_v2, 1  ;;  %v823_v5 = vadd.f32 %v822_v3, %v821_v1 }
  0xfb   : > { %v824_v6 = vrot.slane %v823_v5, 1  ;;  %v796_v7 = vadd.f32 %v795_v4, %v794_v2 }
  0xfd   : > { %v825_v9 = vadd.f32 %v824_v6, %v823_v5 }
  0xff   : > { %v826_v10 = vsel %vm772_vm8, %v796_v7, %v825_v9 }
 0x100   : > { %827 = vst.msk [vmem:[%s332_s7] sm:$0x3] %vm774_vm9, %v826_v10 }
 0x101 PF: > { %s17_s23 = sadd.s32 1, %s1149_s23   ;;  %s1306_s21 = smov %s1145_s22 }
 0x102   : > { %p14_p5 = scmp.ge.s32.totalorder %s17_s23, 4   ;;  %s1307_s22 = smov %s1309_s24 }
 0x104   :  { %16 = sbr.rel (!%p14_p5) target bundleno = 2 (0x2), region = 94 }

// kernel: nonautoregressive_policy_forward.8
= control target key start
LH: loop header
LB: loop body
LE: loop exit
PB: predicated region body
PF: predicated region fallthrough
CT: control target
= control target key end

     0   :  { %s1456_s25 = smov 0   ;;  %s1458_s26 = smov 0   ;;  %s1645_s0 = inlined_call_operand.vmem [shape: f32[2,8,8], index: 0, kind: input, shape index: {}]   ;;  %s1646_s1 = inlined_call_operand.vmem [shape: f32[2,8,128], index: 1, kind: input, shape index: {}]   ;;  %s1647_s2 = inlined_call_operand.vmem [shape: f32[2,8,32], index: 2, kind: input, shape index: {}]   ;;  %s1648_s3 = inlined_call_operand.vmem [shape: f32[2,8,32], index: 3, kind: input, shape index: {}]   ;;  %s1649_s4 = inlined_call_operand.vmem [shape: bf16[32,32], index: 4, kind: input, shape index: {}]   ;;  %s1650_s5 = inlined_call_operand.vmem [shape: f32[1,32], index: 5, kind: input, shape index: {}]   ;;  %s1651_s6 = inlined_call_operand.vmem [shape: f32[1,32], index: 6, kind: input, shape index: {}]   ;;  %s1652_s7 = inlined_call_operand.vmem [shape: f32[1,32], index: 7, kind: input, shape index: {}]   ;;  %s1653_s8 = inlined_call_operand.vmem [shape: f32[1,32], index: 8, kind: input, shape index: {}]   ;;  %s1654_s9 = inlined_call_operand.vmem [shape: f32[1,32], index: 9, kind: input, shape index: {}]   ;;  %s1655_s10 = inlined_call_operand.vmem [shape: f32[1,32], index: 10, kind: input, shape index: {}]   ;;  %s1656_s11 = inlined_call_operand.vmem [shape: f32[1,32], index: 11, kind: input, shape index: {}]   ;;  %s1657_s12 = inlined_call_operand.vmem [shape: f32[2,8,32], index: 12, kind: output, shape index: {0}]   ;;  %s1658_s13 = inlined_call_operand.vmem [shape: bf16[2,8,8,32], index: 13, kind: output, shape index: {1}]  }
   0x1   :  { %s1460_s27 = smov 0  }
   0x2 LB: > { %s36_s28 = sadd.s32 1, %s1377_s26  ;;  %p1230_p0 = scmp.ge.s32.totalorder %s1381_s27, 1  ;;  %s1381_s27 = sphi %s1460_s27, %s24_s27   ;;  %s1377_s26 = sphi %s1458_s26, %s1660_s26   ;;  %s1373_s25 = sphi %s1456_s25, %s1659_s25  }
   0x3   : > { %p38_p1 = scmp.ge.s32.totalorder %s36_s28, 2  ;;  %p447_p2 = scmp.lt.s32.totalorder %s1381_s27, 3 }
   0x5   : > { %s1662_s28 = smov (%p38_p1, %s36_s28), 0  ;;  %p448_p3 = pnand %p1230_p0, %p447_p2 }
   0x6   : > { %p522_p4 = scmp.lt.s32.totalorder (!%p448_p3), %s1373_s25, 1  ;;  %s1384_s18 = smov (!%p448_p3), 64  }
   0x7   : > { %451 = sbr.rel (%p448_p3) target bundleno = 402 (0x192), region = 68 }
   0xc   : > { %v566_v0 = vlaneseq  ;;  %v1320_v1 = vld [vmem:[%s1649_s4 + $0x8] sm:$0xff]   ;;  %s1664_s25 = smov (!%p522_p4, %s1373_s25), 1  ;;  %v1321_v7 = vld [vmem:[%s1649_s4] sm:$0xff]   ;;  %v1383_v25 = vmov 1966171168   ;;  %vm698_vm0 = vcmask 261120  }
   0xd   : > { %1277 = vmatprep.subr.bf16.mxu0 %v1320_v1  ;;  %1289 = vmatprep.subr.bf16.mxu1 %v1320_v1  ;;  %s1480_s14 = sshll.u32 %s1664_s25, 3  ;;  %v1240_v15 = vld [vmem:[%s1651_s6] ss:$0 sm:$0xff]  ;;  %v823_v26 = vunpack.c.l.s4 %v1383_v25  ;;  %s1266_s23 = sshll.u32 %s1664_s25, 5  ;;  %vm1048_vm1 = vcmask 257024  }
   0xe   : > { %v567_v2 = vshrl.u32 %v566_v0, 7  ;;  %1278 = vmatpush3.bf16.msra.mxu0 %v1320_v1  ;;  %1291 = vmatpush3.bf16.msra.mxu1 %v1320_v1  ;;  %s528_s17 = scalar_lea.vmem %s1645_s0, %s1480_s14  ;;  %s546_s22 = scalar_lea.vmem %s1648_s3, %s1480_s14  ;;  %v1241_v17 = vld [vmem:[%s1652_s7] ss:$0 sm:$0xff] }
   0xf   : > { %v565_v8 = vld [vmem:[%s528_s17] sm:$0xff]  ;;  %1279 = vmatprep.subr.bf16.mxu0 %v1321_v7  ;;  %1290 = vmatprep.subr.bf16.mxu1 %v1321_v7  ;;  %s532_s17 = scalar_lea.vmem %s1646_s1, %s1480_s14  ;;  %v824_v29 = vunpack.c.0.s8 %v823_v26  ;;  %s539_s21 = scalar_lea.vmem %s1647_s2, %s1480_s14 }
  0x10   : > { %v596_v3 = vsub.s32 4, %v567_v2  ;;  %v1482_v4 = vsub.s32 0, %v567_v2  ;;  %v603_v5 = vsub.s32 5, %v567_v2  ;;  %v575_v6 = vsub.s32 1, %v567_v2  ;;  %v672_v16 = vld [vmem:[%s546_s22] sm:$0xff]  ;;  %s1385_s22 = smov 32   ;;  %s553_s29 = scalar_lea.vmem %s1657_s12, %s1480_s14 }
  0x11   : > { %v589_v13 = vsub.s32 3, %v567_v2  ;;  %v582_v14 = vsub.s32 2, %v567_v2  ;;  %v680_v18 = vmul.f32 %v1240_v15, %v672_v16  ;;  %v617_v21 = vsub.s32 7, %v567_v2  ;;  %v671_v30 = vld [vmem:[%s532_s17] sm:$0xff] }
  0x12   : > { %v597_v9 = vrot.slane %v565_v8, %v596_v3  ;;  %v569_v10 = vrot.slane %v565_v8, %v1482_v4  ;;  %1280 = vmatpush3.bf16.msra.mxu0 %v1321_v7  ;;  %v604_v11 = vrot.slane %v565_v8, %v603_v5  ;;  %v576_v12 = vrot.slane %v565_v8, %v575_v6  ;;  %v689_v56 = vld [vmem:[%s539_s21] sm:$0xff] }
  0x13   : > { %1292 = vmatpush3.bf16.msra.mxu1 %v1321_v7  ;;  %v590_v19 = vrot.slane %v565_v8, %v589_v13  ;;  %v583_v20 = vrot.slane %v565_v8, %v582_v14  ;;  %v610_v22 = vsub.s32 6, %v567_v2  ;;  %v688_v23 = vadd.f32 %v1241_v17, %v680_v18  ;;  %v1238_v61 = vld [vmem:[%s1655_s10] ss:$0 sm:$0xff] }
  0x14   : > { %599 = vbcast.lane.b32.xlu1 %v597_v9, 256  ;;  %571 = vbcast.lane.b32.xlu0 %v569_v10, 256  ;;  %v618_v27 = vrot.slane %v565_v8, %v617_v21  ;;  %v827_v31 = vsub.s32 %v824_v29, %v567_v2  ;;  %v821_v32 = vcombine.high %v671_v30, %v671_v30  ;;  %v1239_v2 = vld [vmem:[%s1656_s11] ss:$0 sm:$0xff] }
  0x15   : > { %v1242_v24 = vmul.f32 -1.442695, %v688_v23  ;;  %v611_v28 = vrot.slane %v565_v8, %v610_v22 }
  0x16   : > { %v828_v33 = vrot.slane %v671_v30, %v827_v31  ;;  %v835_v35 = vrot.slane %v821_v32, %v827_v31 }
  0x17   : > { %1323 = vpow2.f32 %v1242_v24 }
  0x18   : > { %606 = vbcast.lane.b32.xlu1 %v604_v11, 256  ;;  %578 = vbcast.lane.b32.xlu0 %v576_v12, 256  ;;  %v844_v34 = vrot.slane %v828_v33, %v827_v31  ;;  %v836_v36 = vcombine.high %v828_v33, %v828_v33  ;;  %v837_v40 = vcombine.high %v835_v35, %v835_v35 }
  0x19   : > { %v851_v42 = vrot.slane %v835_v35, %v827_v31 }
  0x1a   : > { %v873_v37 = vrot.slane %v844_v34, %v1482_v4  ;;  %v866_v38 = vcombine.high %v844_v34, %v844_v34  ;;  %v858_v39 = vrot.slane %v836_v36, %v827_v31  ;;  %v865_v46 = vrot.slane %v837_v40, %v827_v31  ;;  %v1243_v31 = vld [vmem:[%s1650_s5] ss:$0 sm:$0xff] }
  0x1b   : > { %v889_v49 = vrot.slane %v851_v42, %v1482_v4  ;;  %v867_v50 = vcombine.high %v851_v42, %v851_v42  ;;  %v1254_v40 = vld [vmem:[%s1653_s8] ss:$0 sm:$0xff] }
  0x1c   : > { %592 = vbcast.lane.b32.xlu1 %v590_v19, 256  ;;  %585 = vbcast.lane.b32.xlu0 %v583_v20, 256  ;;  %v881_v41 = vrot.slane %v866_v38, %v1482_v4  ;;  %v877_v43 = vrot.slane %v858_v39, %v1482_v4  ;;  %v868_v44 = vcombine.high %v858_v39, %v858_v39 }
  0x1d   : > { %v893_v51 = vrot.slane %v865_v46, %v1482_v4  ;;  %v869_v52 = vcombine.high %v865_v46, %v865_v46  ;;  %v897_v53 = vrot.slane %v867_v50, %v1482_v4  ;;  %v1255_v46 = vld [vmem:[%s1654_s9] ss:$0 sm:$0xff] }
  0x1e   : > { %v885_v45 = vrot.slane %v868_v44, %v1482_v4 }
  0x1f   : > { %v901_v54 = vrot.slane %v869_v52, %v1482_v4 }
  0x20   : > { %620 = vbcast.lane.b32.xlu1 %v618_v27, 256  ;;  %613 = vbcast.lane.b32.xlu0 %v611_v28, 256 }
  0x24   : > { %902 = vrot.lane.b32.xlu0 %v873_v37, %s1384_s18  ;;  %904 = vrot.lane.b32.xlu1 %v877_v43, %s1384_s18  ;;  %v1324_v47 = vpop.eup %1323 }
  0x25   : > { %v693_v48 = vadd.f32 1.0, %v1324_v47 }
  0x27   : > { %1325 = vrcp.f32 %v693_v48 }
  0x28   : > { %906 = vrot.lane.b32.xlu0 %v881_v41, %s1384_s18  ;;  %908 = vrot.lane.b32.xlu1 %v885_v45, %s1384_s18 }
  0x2c   : > { %910 = vrot.lane.b32.xlu0 %v889_v49, %s1384_s18  ;;  %912 = vrot.lane.b32.xlu1 %v893_v51, %s1384_s18 }
  0x30   : > { %914 = vrot.lane.b32.xlu0 %v897_v53, %s1384_s18  ;;  %916 = vrot.lane.b32.xlu1 %v901_v54, %s1384_s18 }
  0x34   : > { %935 = vrot.lane.b32.xlu0 %v671_v30, %s1385_s22  ;;  %v1326_v55 = vpop.eup %1325 }
  0x35   : > { %v696_v57 = vmul.f32 %v1326_v55, %v688_v23 }
  0x37   : > { %v697_v58 = vadd.f32 %v696_v57, %v689_v56 }
  0x39   : > { %699 = vst.msk [vmem:[%s553_s29] sm:$0xff] %vm698_vm0, %v697_v58  ;;  %s1606_s29 = scalar_lea.vmem %s1658_s13, %s1266_s23 }
  0x86   : > { %v600_v59 = vpop.permute.xlu1 %599  ;;  %v572_v60 = vpop.permute.xlu0 %571 }
  0x87   : > { %v633_v62 = vmul.f32 %v1238_v61, %v600_v59  ;;  %v629_v63 = vmul.f32 %v1238_v61, %v572_v60 }
  0x89   : > { %v1533_v7 = vadd.f32 %v1239_v2, %v633_v62  ;;  %v1535_v8 = vadd.f32 %v1239_v2, %v629_v63 }
  0x8a   : > { %v607_v0 = vpop.permute.xlu1 %606  ;;  %v579_v1 = vpop.permute.xlu0 %578 }
  0x8b   : > { %v634_v3 = vmul.f32 %v1238_v61, %v607_v0  ;;  %v630_v4 = vmul.f32 %v1238_v61, %v579_v1 }
  0x8d   : > { %v1529_v5 = vadd.f32 %v1239_v2, %v634_v3  ;;  %v1531_v6 = vadd.f32 %v1239_v2, %v630_v4 }
  0x8e   : > { %v593_v9 = vpop.permute.xlu1 %592  ;;  %v586_v10 = vpop.permute.xlu0 %585 }
  0x8f   : > { %v632_v11 = vmul.f32 %v1238_v61, %v593_v9  ;;  %v631_v12 = vmul.f32 %v1238_v61, %v586_v10  ;;  %v1267_v13 = vpack.c.bf16 %v1531_v6, %v1535_v8  ;;  %v1269_v14 = vpack.c.bf16 %v1529_v5, %v1533_v7 }
  0x91   : > { %v1541_v15 = vadd.f32 %v1239_v2, %v632_v11  ;;  %v1543_v16 = vadd.f32 %v1239_v2, %v631_v12  ;;  %1281 = vmatprep.mubr.msk.bf16.mxu0 %vm698_vm0, %v1267_v13  ;;  %1285 = vmatprep.mubr.msk.bf16.mxu1 %vm698_vm0, %v1269_v14 }
  0x92   : > { %v621_v17 = vpop.permute.xlu1 %620  ;;  %v614_v18 = vpop.permute.xlu0 %613 }
  0x93   : > { %v1268_v19 = vpack.c.bf16 %v1541_v15, %v1543_v16  ;;  %v636_v20 = vmul.f32 %v1238_v61, %v621_v17  ;;  %v635_v21 = vmul.f32 %v1238_v61, %v614_v18 }
  0x95   : > { %v1549_v22 = vadd.f32 %v1239_v2, %v636_v20  ;;  %1282 = vmatmul.mubr.msk.bf16.vlgmr.msra.gmra.mxu0 %vm698_vm0, %v1268_v19  ;;  %v1552_v23 = vadd.f32 %v1239_v2, %v635_v21 }
  0x96   : > { %v903_v25 = vpop.permute.xlu0 %902  ;;  %v905_v28 = vpop.permute.xlu1 %904 }
  0x97   : > { %v1270_v24 = vpack.c.bf16 %v1549_v22, %v1552_v23 }
  0x99   : > { %1286 = vmatmul.mubr.msk.bf16.vlgmr.msra.gmra.mxu1 %vm698_vm0, %v1270_v24 }
  0x9a   : > { %v907_v26 = vpop.permute.xlu0 %906  ;;  %v909_v30 = vpop.permute.xlu1 %908 }
  0x9e   : > { %v911_v27 = vpop.permute.xlu0 %910  ;;  %v913_v38 = vpop.permute.xlu1 %912 }
  0xa2   : > { %v915_v29 = vpop.permute.xlu0 %914  ;;  %v917_v60 = vpop.permute.xlu1 %916 }
  0xa6   : > { %v936_v35 = vpop.permute.xlu0 %935 }
 0x155   : > { %v1283_v32 = vpop.f32.mrf.mxu0 }
 0x156   : > { %v798_v33 = vadd.f32 %v1283_v32, %v1243_v31 }
 0x157   : > { %v789_v34 = vpop.f32.mrf.mxu0 }
 0x158   : > { %v928_v36 = vadd.f32 %v907_v26, %v798_v33  ;;  %v790_v37 = vadd.f32 %v1243_v31, %v789_v34 }
 0x159   : > { %v1284_v39 = vpop.f32.mrf.mxu0  ;;  %v1287_v43 = vpop.f32.mrf.mxu1 }
 0x15a   : > { %v926_v41 = vadd.f32 %v903_v25, %v790_v37  ;;  %v801_v42 = vadd.f32 %v1284_v39, %v1243_v31  ;;  %v940_v44 = vadd.f32 %v936_v35, %v928_v36  ;;  %v814_v45 = vadd.f32 %v1287_v43, %v1243_v31 }
 0x15b   : > { %v792_v47 = vpop.f32.mrf.mxu0  ;;  %v805_v52 = vpop.f32.mrf.mxu1 }
 0x15c   : > { %v929_v48 = vadd.f32 %v909_v30, %v801_v42  ;;  %v938_v49 = vadd.f32 %v936_v35, %v926_v41  ;;  %v955_v50 = vmul.f32 %v1254_v40, %v940_v44  ;;  %v793_v51 = vadd.f32 %v1243_v31, %v792_v47 }
 0x15d   : > { %v932_v53 = vadd.f32 %v915_v29, %v814_v45  ;;  %v806_v54 = vadd.f32 %v1243_v31, %v805_v52  ;;  %v1288_v59 = vpop.f32.mrf.mxu1 }
 0x15e   : > { %v941_v55 = vadd.f32 %v936_v35, %v929_v48  ;;  %v953_v56 = vmul.f32 %v1254_v40, %v938_v49  ;;  %v1566_v57 = vadd.f32 %v1255_v46, %v955_v50  ;;  %v927_v58 = vadd.f32 %v905_v28, %v793_v51 }
 0x15f   : > { %v944_v61 = vadd.f32 %v936_v35, %v932_v53  ;;  %v930_v62 = vadd.f32 %v911_v27, %v806_v54  ;;  %v817_v63 = vadd.f32 %v1288_v59, %v1243_v31  ;;  %v808_v4 = vpop.f32.mrf.mxu1  ;;  %v654_v53 = vpack.c.bf16 %v1543_v16, %v1543_v16 }
 0x160   : > { %v956_v0 = vmul.f32 %v1254_v40, %v941_v55  ;;  %v1568_v1 = vadd.f32 %v1255_v46, %v953_v56  ;;  %v1258_v2 = vmul.f32 -1.442695, %v1566_v57  ;;  %v939_v3 = vadd.f32 %v936_v35, %v927_v58 }
 0x161   : > { %v959_v9 = vmul.f32 %v1254_v40, %v944_v61  ;;  %v942_v10 = vadd.f32 %v936_v35, %v930_v62  ;;  %v933_v11 = vadd.f32 %v917_v60, %v817_v63  ;;  %v809_v12 = vadd.f32 %v1243_v31, %v808_v4 }
 0x162   : > { %v1571_v13 = vadd.f32 %v1255_v46, %v956_v0  ;;  %v1256_v14 = vmul.f32 -1.442695, %v1568_v1  ;;  %1327 = vpow2.f32 %v1258_v2  ;;  %v954_v17 = vmul.f32 %v1254_v40, %v939_v3 }
 0x163   : > { %v1574_v18 = vadd.f32 %v1255_v46, %v959_v9  ;;  %v957_v19 = vmul.f32 %v1254_v40, %v942_v10  ;;  %v945_v20 = vadd.f32 %v936_v35, %v933_v11  ;;  %v931_v21 = vadd.f32 %v913_v38, %v809_v12 }
 0x164   : > { %1329 = vpow2.f32 %v1256_v14  ;;  %v1259_v24 = vmul.f32 -1.442695, %v1571_v13  ;;  %v1577_v25 = vadd.f32 %v1255_v46, %v954_v17  ;;  %v652_v54 = vpack.c.bf16 %v1535_v8, %v1535_v8 }
 0x165   : > { %v1262_v26 = vmul.f32 -1.442695, %v1574_v18  ;;  %v1580_v27 = vadd.f32 %v1255_v46, %v957_v19  ;;  %v960_v28 = vmul.f32 %v1254_v40, %v945_v20  ;;  %v943_v29 = vadd.f32 %v936_v35, %v931_v21 }
 0x166   : > { %1331 = vpow2.f32 %v1259_v24  ;;  %v1257_v30 = vmul.f32 -1.442695, %v1577_v25  ;;  %v655_v56 = vpack.c.bf16 %v1541_v15, %v1541_v15  ;;  %v662_v58 = vunpack.c.l.bf16 %v654_v53 }
 0x167   : > { %1333 = vpow2.f32 %v1262_v26  ;;  %v1260_v31 = vmul.f32 -1.442695, %v1580_v27  ;;  %v1584_v32 = vadd.f32 %v1255_v46, %v960_v28  ;;  %v958_v33 = vmul.f32 %v1254_v40, %v943_v29 }
 0x168   : > { %1335 = vpow2.f32 %v1257_v30  ;;  %v658_v61 = vpack.c.bf16 %v1552_v23, %v1552_v23  ;;  %v660_v62 = vunpack.c.l.bf16 %v652_v54  ;;  %v653_v16 = vpack.c.bf16 %v1531_v6, %v1531_v6 }
 0x169   : > { %1337 = vpow2.f32 %v1260_v31  ;;  %v1263_v34 = vmul.f32 -1.442695, %v1584_v32  ;;  %v1587_v36 = vadd.f32 %v1255_v46, %v958_v33  ;;  %v656_v15 = vpack.c.bf16 %v1533_v7, %v1533_v7 }
 0x16a   : > { %v663_v23 = vunpack.c.l.bf16 %v655_v56  ;;  %v666_v9 = vunpack.c.l.bf16 %v658_v61  ;;  %v661_v12 = vunpack.c.l.bf16 %v653_v16  ;;  %v657_v19 = vpack.c.bf16 %v1529_v5, %v1529_v5 }
 0x16b   : > { %1339 = vpow2.f32 %v1263_v34  ;;  %v1261_v37 = vmul.f32 -1.442695, %v1587_v36 }
 0x16c   : > { %v665_v31 = vunpack.c.l.bf16 %v657_v19 }
 0x16d   : > { %1341 = vpow2.f32 %v1261_v37 }
 0x16f   : > { %v1328_v35 = vpop.eup %1327 }
 0x170   : > { %v1002_v38 = vadd.f32 1.0, %v1328_v35 }
 0x171   : > { %v1330_v39 = vpop.eup %1329 }
 0x172   : > { %v1000_v41 = vadd.f32 1.0, %v1330_v39  ;;  %1343 = vrcp.f32 %v1002_v38 }
 0x173   : > { %v1332_v42 = vpop.eup %1331 }
 0x174   : > { %v1334_v43 = vpop.eup %1333  ;;  %v1003_v44 = vadd.f32 1.0, %v1332_v42  ;;  %1345 = vrcp.f32 %v1000_v41 }
 0x175   : > { %v1336_v40 = vpop.eup %1335  ;;  %v1006_v45 = vadd.f32 1.0, %v1334_v43 }
 0x176   : > { %v1338_v47 = vpop.eup %1337  ;;  %1347 = vrcp.f32 %v1003_v44  ;;  %v1001_v46 = vadd.f32 1.0, %v1336_v40 }
 0x177   : > { %1349 = vrcp.f32 %v1006_v45  ;;  %v1004_v48 = vadd.f32 1.0, %v1338_v47 }
 0x178   : > { %v1340_v49 = vpop.eup %1339  ;;  %1351 = vrcp.f32 %v1001_v46 }
 0x179   : > { %1353 = vrcp.f32 %v1004_v48  ;;  %v1007_v50 = vadd.f32 1.0, %v1340_v49 }
 0x17a   : > { %v1342_v51 = vpop.eup %1341 }
 0x17b   : > { %1355 = vrcp.f32 %v1007_v50  ;;  %v1005_v52 = vadd.f32 1.0, %v1342_v51 }
 0x17d   : > { %1357 = vrcp.f32 %v1005_v52 }
 0x17f   : > { %v1344_v55 = vpop.eup %1343 }
 0x180   : > { %v1026_v59 = vmul.f32 %v1344_v55, %v1566_v57 }
 0x181   : > { %v1346_v60 = vpop.eup %1345 }
 0x182   : > { %v1024_v63 = vmul.f32 %v1346_v60, %v1568_v1  ;;  %v1034_v0 = vadd.f32 %v1026_v59, %v662_v58  ;;  %v659_v1 = vpack.c.bf16 %v1549_v22, %v1549_v22 }
 0x183   : > { %v1348_v8 = vpop.eup %1347 }
 0x184   : > { %v1350_v57 = vpop.eup %1349  ;;  %v1027_v2 = vmul.f32 %v1348_v8, %v1571_v13  ;;  %v1032_v3 = vadd.f32 %v1024_v63, %v660_v62  ;;  %v1042_v6 = vpack.c.bf16 %v1034_v0, %v1034_v0  ;;  %v664_v13 = vunpack.c.l.bf16 %v656_v15 }
 0x185   : > { %v1352_v4 = vpop.eup %1351  ;;  %v1030_v10 = vmul.f32 %v1350_v57, %v1574_v18  ;;  %v667_v26 = vunpack.c.l.bf16 %v659_v1 }
 0x186   : > { %v1354_v11 = vpop.eup %1353  ;;  %v1035_v14 = vadd.f32 %v1027_v2, %v663_v23  ;;  %v1040_v17 = vpack.c.bf16 %v1032_v3, %v1032_v3  ;;  %1051 = vst.msk [vmem:[%s1606_s29 + $0x8] sm:$0xf] %vm1048_vm1, %v1042_v6  ;;  %v1025_v7 = vmul.f32 %v1352_v4, %v1577_v25 }
 0x187   : > { %v1038_v20 = vadd.f32 %v1030_v10, %v666_v9  ;;  %v1028_v22 = vmul.f32 %v1354_v11, %v1580_v27 }
 0x188   : > { %v1356_v21 = vpop.eup %1355  ;;  %v1043_v18 = vpack.c.bf16 %v1035_v14, %v1035_v14  ;;  %1049 = vst.msk [vmem:[%s1606_s29] sm:$0xf] %vm1048_vm1, %v1040_v17  ;;  %v1033_v24 = vadd.f32 %v1025_v7, %v661_v12 }
 0x189   : > { %v1046_v28 = vpack.c.bf16 %v1038_v20, %v1038_v20  ;;  %v1036_v29 = vadd.f32 %v1028_v22, %v664_v13  ;;  %v1031_v25 = vmul.f32 %v1356_v21, %v1584_v32 }
 0x18a   : > { %v1358_v30 = vpop.eup %1357  ;;  %1052 = vst.msk [vmem:[%s1606_s29 + $0xc] sm:$0xf] %vm1048_vm1, %v1043_v18  ;;  %v1041_v5 = vpack.c.bf16 %v1033_v24, %v1033_v24 }
 0x18b   : > { %1055 = vst.msk [vmem:[%s1606_s29 + $0x18] sm:$0xf] %vm1048_vm1, %v1046_v28  ;;  %v1044_v27 = vpack.c.bf16 %v1036_v29, %v1036_v29  ;;  %v1039_v33 = vadd.f32 %v1031_v25, %v667_v26  ;;  %v1029_v34 = vmul.f32 %v1358_v30, %v1587_v36 }
 0x18c   : > { %1050 = vst.msk [vmem:[%s1606_s29 + $0x4] sm:$0xf] %vm1048_vm1, %v1041_v5 }
 0x18d   : > { %1053 = vst.msk [vmem:[%s1606_s29 + $0x10] sm:$0xf] %vm1048_vm1, %v1044_v27  ;;  %v1047_v37 = vpack.c.bf16 %v1039_v33, %v1039_v33  ;;  %v1037_v35 = vadd.f32 %v1029_v34, %v665_v31 }
 0x18f   : > { %1056 = vst.msk [vmem:[%s1606_s29 + $0x1c] sm:$0xf] %vm1048_vm1, %v1047_v37  ;;  %v1045_v32 = vpack.c.bf16 %v1037_v35, %v1037_v35 }
 0x191   : > { %1054 = vst.msk [vmem:[%s1606_s29 + $0x14] sm:$0xf] %vm1048_vm1, %v1045_v32 }
 0x192 PF: > { %s24_s27 = sadd.s32 1, %s1381_s27   ;;  %s1659_s25 = smov %s1377_s26 }
 0x193   : > { %p21_p5 = scmp.ge.s32.totalorder %s24_s27, 4   ;;  %s1660_s26 = smov %s1662_s28 }
 0x195   :  { %23 = sbr.rel (!%p21_p5) target bundleno = 2 (0x2), region = 120 }

// kernel: nonautoregressive_policy_forward.10
= control target key start
LH: loop header
LB: loop body
LE: loop exit
PB: predicated region body
PF: predicated region fallthrough
CT: control target
= control target key end

     0   :  { %s1319_s17 = smov 0   ;;  %s1321_s18 = smov 0   ;;  %s1470_s0 = inlined_call_operand.vmem [shape: bf16[2,8,8,32], index: 0, kind: input, shape index: {}]   ;;  %s1471_s1 = inlined_call_operand.vmem [shape: f32[2,8,128], index: 1, kind: input, shape index: {}]   ;;  %s1472_s2 = inlined_call_operand.vmem [shape: f32[2,8,32], index: 2, kind: input, shape index: {}]   ;;  %s1473_s3 = inlined_call_operand.vmem [shape: f32[2,8,32], index: 3, kind: input, shape index: {}]   ;;  %s1474_s4 = inlined_call_operand.vmem [shape: bf16[32,32], index: 4, kind: input, shape index: {}]   ;;  %s1475_s5 = inlined_call_operand.vmem [shape: f32[1,32], index: 5, kind: input, shape index: {}]   ;;  %s1476_s6 = inlined_call_operand.vmem [shape: f32[1,32], index: 6, kind: input, shape index: {}]   ;;  %s1477_s7 = inlined_call_operand.vmem [shape: f32[1,32], index: 7, kind: input, shape index: {}]   ;;  %s1478_s8 = inlined_call_operand.vmem [shape: f32[1,32], index: 8, kind: input, shape index: {}]   ;;  %s1479_s9 = inlined_call_operand.vmem [shape: f32[1,32], index: 9, kind: input, shape index: {}]   ;;  %s1480_s10 = inlined_call_operand.vmem [shape: f32[2,8,32], index: 10, kind: output, shape index: {0}]   ;;  %s1481_s11 = inlined_call_operand.vmem [shape: bf16[2,8,8,32], index: 11, kind: output, shape index: {1}]  }
   0x1   :  { %s1323_s19 = smov 0  }
   0x2 LB: > { %s34_s20 = sadd.s32 1, %s1250_s18  ;;  %p1100_p0 = scmp.ge.s32.totalorder %s1254_s19, 1  ;;  %s1254_s19 = sphi %s1323_s19, %s22_s19   ;;  %s1250_s18 = sphi %s1321_s18, %s1483_s18   ;;  %s1246_s17 = sphi %s1319_s17, %s1482_s17  }
   0x3   : > { %p36_p1 = scmp.ge.s32.totalorder %s34_s20, 2  ;;  %p400_p2 = scmp.lt.s32.totalorder %s1254_s19, 3 }
   0x5   : > { %s1485_s20 = smov (%p36_p1, %s34_s20), 0  ;;  %p401_p3 = pnand %p1100_p0, %p400_p2 }
   0x6   : > { %p474_p4 = scmp.lt.s32.totalorder (!%p401_p3), %s1246_s17, 1  ;;  %s1257_s27 = smov (!%p401_p3), 64  }
   0x7   : > { %404 = sbr.rel (%p401_p3) target bundleno = 271 (0x10f), region = 60  ;;  %s1258_s28 = smov (!%p401_p3), 32  }
   0xc   : > { %v1186_v0 = vld [vmem:[%s1474_s4 + $0x8] sm:$0xff]   ;;  %v1187_v1 = vld [vmem:[%s1474_s4] sm:$0xff]   ;;  %s1487_s17 = smov (!%p474_p4, %s1246_s17), 1  ;;  %v692_v2 = vlaneseq  ;;  %v1256_v3 = vmov 1966171168   ;;  %vm565_vm0 = vcmask 261120  }
   0xd   : > { %1143 = vmatprep.subr.bf16.mxu0 %v1186_v0  ;;  %1155 = vmatprep.subr.bf16.mxu1 %v1186_v0  ;;  %s1135_s25 = sshll.u32 %s1487_s17, 5  ;;  %s1347_s26 = sshll.u32 %s1487_s17, 3  ;;  %v690_v4 = vunpack.c.l.s4 %v1256_v3  ;;  %v1109_v11 = vld [vmem:[%s1476_s6] ss:$0 sm:$0xff]  ;;  %vm915_vm1 = vcmask 257024  }
   0xe   : > { %1144 = vmatpush3.bf16.msra.mxu0 %v1186_v0  ;;  %1157 = vmatpush3.bf16.msra.mxu1 %v1186_v0  ;;  %s481_s29 = scalar_lea.vmem %s1470_s0, %s1135_s25  ;;  %s486_s13 = scalar_lea.vmem %s1471_s1, %s1347_s26  ;;  %v693_v9 = vshrl.u32 %v692_v2, 7  ;;  %v1110_v14 = vld [vmem:[%s1477_s7] ss:$0 sm:$0xff] }
   0xf   : > { %1145 = vmatprep.subr.bf16.mxu0 %v1187_v1  ;;  %1156 = vmatprep.subr.bf16.mxu1 %v1187_v1  ;;  %v1354_v5 = vld [vmem:[%s481_s29] sm:$0xff]   ;;  %v1356_v6 = vld [vmem:[%s481_s29 + $0x10] sm:$0xff]   ;;  %v1358_v7 = vld [vmem:[%s481_s29 + $0x8] sm:$0xff]   ;;  %v691_v8 = vunpack.c.0.s8 %v690_v4  ;;  %s500_s16 = scalar_lea.vmem %s1473_s3, %s1347_s26  ;;  %s493_s12 = scalar_lea.vmem %s1472_s2, %s1347_s26 }
  0x10   : > { %v1364_v10 = vld [vmem:[%s481_s29 + $0x18] sm:$0xff]   ;;  %v539_v12 = vld [vmem:[%s500_s16] sm:$0xff]  ;;  %1147 = vmatprep.mubr.msk.bf16.mxu0 %vm565_vm0, %v1354_v5  ;;  %1151 = vmatprep.mubr.msk.bf16.mxu1 %vm565_vm0, %v1356_v6  ;;  %v739_v20 = vsub.s32 0, %v693_v9  ;;  %s507_s15 = scalar_lea.vmem %s1480_s10, %s1347_s26  ;;  %s1434_s29 = scalar_lea.vmem %s1481_s11, %s1135_s25 }
  0x11   : > { %v538_v13 = vld [vmem:[%s486_s13] sm:$0xff]  ;;  %v547_v15 = vmul.f32 %v1109_v11, %v539_v12  ;;  %v694_v16 = vsub.s32 %v691_v8, %v693_v9 }
  0x12   : > { %1146 = vmatpush3.bf16.msra.mxu0 %v1187_v1  ;;  %1158 = vmatpush3.bf16.msra.mxu1 %v1187_v1  ;;  %v688_v17 = vcombine.high %v538_v13, %v538_v13  ;;  %v556_v44 = vld [vmem:[%s493_s12] sm:$0xff] }
  0x13   : > { %v555_v18 = vadd.f32 %v1110_v14, %v547_v15  ;;  %v695_v19 = vrot.slane %v538_v13, %v694_v16  ;;  %v1112_v53 = vld [vmem:[%s1475_s5] ss:$0 sm:$0xff] }
  0x14   : > { %v702_v21 = vrot.slane %v688_v17, %v694_v16  ;;  %v1123_v2 = vld [vmem:[%s1478_s8] ss:$0 sm:$0xff] }
  0x15   : > { %1148 = vmatmul.mubr.msk.bf16.vlgmr.msra.gmra.mxu0 %vm565_vm0, %v1358_v7  ;;  %1152 = vmatmul.mubr.msk.bf16.vlgmr.msra.gmra.mxu1 %vm565_vm0, %v1364_v10  ;;  %v1111_v22 = vmul.f32 -1.442695, %v555_v18  ;;  %v711_v23 = vrot.slane %v695_v19, %v694_v16  ;;  %v703_v24 = vcombine.high %v695_v19, %v695_v19  ;;  %v1124_v14 = vld [vmem:[%s1479_s9] ss:$0 sm:$0xff] }
  0x16   : > { %v704_v25 = vcombine.high %v702_v21, %v702_v21  ;;  %v718_v31 = vrot.slane %v702_v21, %v694_v16 }
  0x17   : > { %1196 = vpow2.f32 %v1111_v22  ;;  %v740_v26 = vrot.slane %v711_v23, %v739_v20  ;;  %v725_v27 = vrot.slane %v703_v24, %v694_v16  ;;  %v733_v28 = vcombine.high %v711_v23, %v711_v23 }
  0x18   : > { %v732_v34 = vrot.slane %v704_v25, %v694_v16  ;;  %v756_v35 = vrot.slane %v718_v31, %v739_v20  ;;  %v734_v36 = vcombine.high %v718_v31, %v718_v31 }
  0x19   : > { %769 = vrot.lane.b32.xlu0 %v740_v26, %s1257_s27  ;;  %v744_v29 = vrot.slane %v725_v27, %v739_v20  ;;  %v748_v30 = vrot.slane %v733_v28, %v739_v20  ;;  %v735_v32 = vcombine.high %v725_v27, %v725_v27 }
  0x1a   : > { %v760_v37 = vrot.slane %v732_v34, %v739_v20  ;;  %v736_v38 = vcombine.high %v732_v34, %v732_v34  ;;  %v764_v39 = vrot.slane %v734_v36, %v739_v20 }
  0x1b   : > { %773 = vrot.lane.b32.xlu1 %v748_v30, %s1257_s27  ;;  %v752_v33 = vrot.slane %v735_v32, %v739_v20 }
  0x1c   : > { %v768_v40 = vrot.slane %v736_v38, %v739_v20 }
  0x1d   : > { %771 = vrot.lane.b32.xlu0 %v744_v29, %s1257_s27 }
  0x1f   : > { %775 = vrot.lane.b32.xlu1 %v752_v33, %s1257_s27 }
  0x21   : > { %777 = vrot.lane.b32.xlu0 %v756_v35, %s1257_s27 }
  0x23   : > { %779 = vrot.lane.b32.xlu1 %v760_v37, %s1257_s27 }
  0x24   : > { %v1197_v41 = vpop.eup %1196 }
  0x25   : > { %v560_v42 = vadd.f32 1.0, %v1197_v41  ;;  %781 = vrot.lane.b32.xlu0 %v764_v39, %s1257_s27 }
  0x27   : > { %1198 = vrcp.f32 %v560_v42  ;;  %783 = vrot.lane.b32.xlu1 %v768_v40, %s1257_s27 }
  0x29   : > { %802 = vrot.lane.b32.xlu0 %v538_v13, %s1258_s28 }
  0x34   : > { %v1199_v43 = vpop.eup %1198 }
  0x35   : > { %v563_v45 = vmul.f32 %v1199_v43, %v555_v18 }
  0x37   : > { %v564_v46 = vadd.f32 %v563_v45, %v556_v44 }
  0x39   : > { %566 = vst.msk [vmem:[%s507_s15] sm:$0xff] %vm565_vm0, %v564_v46 }
  0x8b   : > { %v770_v47 = vpop.permute.xlu0 %769 }
  0x8d   : > { %v774_v49 = vpop.permute.xlu1 %773 }
  0x8f   : > { %v772_v48 = vpop.permute.xlu0 %771 }
  0x91   : > { %v776_v51 = vpop.permute.xlu1 %775 }
  0x93   : > { %v778_v50 = vpop.permute.xlu0 %777 }
  0x95   : > { %v780_v54 = vpop.permute.xlu1 %779 }
  0x97   : > { %v782_v52 = vpop.permute.xlu0 %781 }
  0x99   : > { %v784_v13 = vpop.permute.xlu1 %783 }
  0x9b   : > { %v803_v59 = vpop.permute.xlu0 %802 }
  0xd5   : > { %v1149_v55 = vpop.f32.mrf.mxu0  ;;  %v1153_v56 = vpop.f32.mrf.mxu1 }
  0xd6   : > { %v665_v57 = vadd.f32 %v1149_v55, %v1112_v53  ;;  %v681_v58 = vadd.f32 %v1153_v56, %v1112_v53 }
  0xd7   : > { %v656_v60 = vpop.f32.mrf.mxu0  ;;  %v672_v61 = vpop.f32.mrf.mxu1 }
  0xd8   : > { %v795_v62 = vadd.f32 %v774_v49, %v665_v57  ;;  %v799_v63 = vadd.f32 %v782_v52, %v681_v58  ;;  %v657_v0 = vadd.f32 %v1112_v53, %v656_v60  ;;  %v673_v1 = vadd.f32 %v1112_v53, %v672_v61 }
  0xd9   : > { %v1150_v3 = vpop.f32.mrf.mxu0  ;;  %v1154_v4 = vpop.f32.mrf.mxu1 }
  0xda   : > { %v793_v8 = vadd.f32 %v770_v47, %v657_v0  ;;  %v797_v9 = vadd.f32 %v778_v50, %v673_v1  ;;  %v807_v11 = vadd.f32 %v803_v59, %v795_v62  ;;  %v811_v12 = vadd.f32 %v803_v59, %v799_v63 }
  0xdb   : > { %v668_v15 = vadd.f32 %v1150_v3, %v1112_v53  ;;  %v684_v16 = vadd.f32 %v1154_v4, %v1112_v53  ;;  %v659_v17 = vpop.f32.mrf.mxu0  ;;  %v675_v18 = vpop.f32.mrf.mxu1 }
  0xdc   : > { %v805_v19 = vadd.f32 %v803_v59, %v793_v8  ;;  %v809_v20 = vadd.f32 %v803_v59, %v797_v9  ;;  %v822_v21 = vmul.f32 %v1123_v2, %v807_v11  ;;  %v826_v22 = vmul.f32 %v1123_v2, %v811_v12 }
  0xdd   : > { %v796_v23 = vadd.f32 %v776_v51, %v668_v15  ;;  %v800_v24 = vadd.f32 %v784_v13, %v684_v16  ;;  %v660_v25 = vadd.f32 %v1112_v53, %v659_v17  ;;  %v676_v26 = vadd.f32 %v1112_v53, %v675_v18 }
  0xde   : > { %v820_v27 = vmul.f32 %v1123_v2, %v805_v19  ;;  %v824_v28 = vmul.f32 %v1123_v2, %v809_v20  ;;  %v1402_v29 = vadd.f32 %v1124_v14, %v822_v21  ;;  %v1404_v30 = vadd.f32 %v1124_v14, %v826_v22 }
  0xdf   : > { %v808_v31 = vadd.f32 %v803_v59, %v796_v23  ;;  %v812_v32 = vadd.f32 %v803_v59, %v800_v24  ;;  %v794_v33 = vadd.f32 %v772_v48, %v660_v25  ;;  %v798_v34 = vadd.f32 %v780_v54, %v676_v26 }
  0xe0   : > { %v835_v35 = vadd.f32 %v1124_v14, %v820_v27  ;;  %v1406_v36 = vadd.f32 %v1124_v14, %v824_v28  ;;  %v1127_v37 = vmul.f32 -1.442695, %v1402_v29  ;;  %v1131_v38 = vmul.f32 -1.442695, %v1404_v30 }
  0xe1   : > { %v823_v39 = vmul.f32 %v1123_v2, %v808_v31  ;;  %v827_v40 = vmul.f32 %v1123_v2, %v812_v32  ;;  %v806_v41 = vadd.f32 %v803_v59, %v794_v33  ;;  %v810_v42 = vadd.f32 %v803_v59, %v798_v34 }
  0xe2   : > { %v1125_v43 = vmul.f32 -1.442695, %v835_v35  ;;  %1200 = vpow2.f32 %v1127_v37  ;;  %v1129_v44 = vmul.f32 -1.442695, %v1406_v36  ;;  %v529_v11 = vunpack.c.l.bf16 %v1358_v7 }
  0xe3   : > { %1202 = vpow2.f32 %v1131_v38  ;;  %v1411_v45 = vadd.f32 %v1124_v14, %v823_v39  ;;  %v1413_v46 = vadd.f32 %v1124_v14, %v827_v40  ;;  %v821_v47 = vmul.f32 %v1123_v2, %v806_v41 }
  0xe4   : > { %1204 = vpow2.f32 %v1125_v43  ;;  %v825_v48 = vmul.f32 %v1123_v2, %v810_v42  ;;  %v533_v13 = vunpack.c.l.bf16 %v1364_v10  ;;  %v527_v15 = vunpack.c.l.bf16 %v1354_v5 }
  0xe5   : > { %1206 = vpow2.f32 %v1129_v44  ;;  %v1128_v49 = vmul.f32 -1.442695, %v1411_v45  ;;  %v1132_v50 = vmul.f32 -1.442695, %v1413_v46  ;;  %v1417_v51 = vadd.f32 %v1124_v14, %v821_v47 }
  0xe6   : > { %v1419_v52 = vadd.f32 %v1124_v14, %v825_v48  ;;  %v531_v18 = vunpack.c.l.bf16 %v1356_v6  ;;  %v530_v23 = vunpack.c.h.bf16 %v1358_v7  ;;  %v534_v27 = vunpack.c.h.bf16 %v1364_v10 }
  0xe7   : > { %1208 = vpow2.f32 %v1128_v49  ;;  %v1126_v53 = vmul.f32 -1.442695, %v1417_v51  ;;  %v528_v31 = vunpack.c.h.bf16 %v1354_v5 }
  0xe8   : > { %1210 = vpow2.f32 %v1132_v50  ;;  %v1130_v54 = vmul.f32 -1.442695, %v1419_v52 }
  0xe9   : > { %1212 = vpow2.f32 %v1126_v53 }
  0xea   : > { %1214 = vpow2.f32 %v1130_v54 }
  0xef   : > { %v1201_v55 = vpop.eup %1200 }
  0xf0   : > { %v1203_v56 = vpop.eup %1202  ;;  %v869_v57 = vadd.f32 1.0, %v1201_v55 }
  0xf1   : > { %v1205_v58 = vpop.eup %1204  ;;  %v873_v59 = vadd.f32 1.0, %v1203_v56 }
  0xf2   : > { %v1207_v60 = vpop.eup %1206  ;;  %v867_v61 = vadd.f32 1.0, %v1205_v58  ;;  %1216 = vrcp.f32 %v869_v57 }
  0xf3   : > { %v871_v62 = vadd.f32 1.0, %v1207_v60  ;;  %1218 = vrcp.f32 %v873_v59 }
  0xf4   : > { %v1209_v63 = vpop.eup %1208  ;;  %1220 = vrcp.f32 %v867_v61 }
  0xf5   : > { %v1211_v0 = vpop.eup %1210  ;;  %1222 = vrcp.f32 %v871_v62  ;;  %v870_v1 = vadd.f32 1.0, %v1209_v63 }
  0xf6   : > { %v1213_v2 = vpop.eup %1212  ;;  %v874_v3 = vadd.f32 1.0, %v1211_v0 }
  0xf7   : > { %v1215_v4 = vpop.eup %1214  ;;  %1224 = vrcp.f32 %v870_v1  ;;  %v868_v8 = vadd.f32 1.0, %v1213_v2 }
  0xf8   : > { %1226 = vrcp.f32 %v874_v3  ;;  %v872_v9 = vadd.f32 1.0, %v1215_v4 }
  0xf9   : > { %1228 = vrcp.f32 %v868_v8 }
  0xfa   : > { %1230 = vrcp.f32 %v872_v9 }
  0xff   : > { %v1217_v12 = vpop.eup %1216 }
 0x100   : > { %v1219_v14 = vpop.eup %1218  ;;  %v893_v16 = vmul.f32 %v1217_v12, %v1402_v29 }
 0x101   : > { %v1221_v17 = vpop.eup %1220  ;;  %v897_v19 = vmul.f32 %v1219_v14, %v1404_v30 }
 0x102   : > { %v1223_v20 = vpop.eup %1222  ;;  %v891_v21 = vmul.f32 %v1221_v17, %v835_v35  ;;  %v901_v22 = vadd.f32 %v893_v16, %v529_v11  ;;  %v532_v35 = vunpack.c.h.bf16 %v1356_v6 }
 0x103   : > { %v895_v24 = vmul.f32 %v1223_v20, %v1406_v36  ;;  %v905_v25 = vadd.f32 %v897_v19, %v533_v13 }
 0x104   : > { %v1225_v26 = vpop.eup %1224  ;;  %v899_v28 = vadd.f32 %v891_v21, %v527_v15  ;;  %v909_v29 = vpack.c.bf16 %v901_v22, %v901_v22 }
 0x105   : > { %v1227_v30 = vpop.eup %1226  ;;  %v903_v32 = vadd.f32 %v895_v24, %v531_v18  ;;  %v913_v33 = vpack.c.bf16 %v905_v25, %v905_v25  ;;  %v894_v7 = vmul.f32 %v1225_v26, %v1411_v45 }
 0x106   : > { %v1229_v34 = vpop.eup %1228  ;;  %v907_v36 = vpack.c.bf16 %v899_v28, %v899_v28  ;;  %918 = vst.msk [vmem:[%s1434_s29 + $0x8] sm:$0xf] %vm915_vm1, %v909_v29  ;;  %v898_v10 = vmul.f32 %v1227_v30, %v1413_v46 }
 0x107   : > { %v1231_v37 = vpop.eup %1230  ;;  %v911_v38 = vpack.c.bf16 %v903_v32, %v903_v32  ;;  %922 = vst.msk [vmem:[%s1434_s29 + $0x18] sm:$0xf] %vm915_vm1, %v913_v33  ;;  %v902_v5 = vadd.f32 %v894_v7, %v530_v23  ;;  %v892_v39 = vmul.f32 %v1229_v34, %v1417_v51 }
 0x108   : > { %916 = vst.msk [vmem:[%s1434_s29] sm:$0xf] %vm915_vm1, %v907_v36  ;;  %v906_v40 = vadd.f32 %v898_v10, %v534_v27  ;;  %v896_v6 = vmul.f32 %v1231_v37, %v1419_v52 }
 0x109   : > { %920 = vst.msk [vmem:[%s1434_s29 + $0x10] sm:$0xf] %vm915_vm1, %v911_v38  ;;  %v910_v41 = vpack.c.bf16 %v902_v5, %v902_v5  ;;  %v900_v42 = vadd.f32 %v892_v39, %v528_v31 }
 0x10a   : > { %v914_v43 = vpack.c.bf16 %v906_v40, %v906_v40  ;;  %v904_v44 = vadd.f32 %v896_v6, %v532_v35 }
 0x10b   : > { %919 = vst.msk [vmem:[%s1434_s29 + $0xc] sm:$0xf] %vm915_vm1, %v910_v41  ;;  %v908_v45 = vpack.c.bf16 %v900_v42, %v900_v42 }
 0x10c   : > { %923 = vst.msk [vmem:[%s1434_s29 + $0x1c] sm:$0xf] %vm915_vm1, %v914_v43  ;;  %v912_v46 = vpack.c.bf16 %v904_v44, %v904_v44 }
 0x10d   : > { %917 = vst.msk [vmem:[%s1434_s29 + $0x4] sm:$0xf] %vm915_vm1, %v908_v45 }
 0x10e   : > { %921 = vst.msk [vmem:[%s1434_s29 + $0x14] sm:$0xf] %vm915_vm1, %v912_v46 }
 0x10f PF: > { %s22_s19 = sadd.s32 1, %s1254_s19   ;;  %s1482_s17 = smov %s1250_s18 }
 0x110   : > { %p19_p5 = scmp.ge.s32.totalorder %s22_s19, 4   ;;  %s1483_s18 = smov %s1485_s20 }
 0x112   :  { %21 = sbr.rel (!%p19_p5) target bundleno = 2 (0x2), region = 112 }

// kernel: nonautoregressive_policy_forward.13
= control target key start
LH: loop header
LB: loop body
LE: loop exit
PB: predicated region body
PF: predicated region fallthrough
CT: control target
= control target key end

     0   :  { %s859_s12 = smov 0   ;;  %s861_s13 = smov 0   ;;  %s1009_s0 = inlined_call_operand.vmem [shape: f32[2,8,8], index: 0, kind: input, shape index: {}]   ;;  %s1010_s1 = inlined_call_operand.vmem [shape: f32[2,8,8], index: 1, kind: input, shape index: {}]   ;;  %s1011_s2 = inlined_call_operand.vmem [shape: s32[2,8,8], index: 2, kind: output, shape index: {0}]   ;;  %s1012_s3 = inlined_call_operand.vmem [shape: f32[2,8,3], index: 3, kind: output, shape index: {1}]  }
   0x1   :  { %s863_s14 = smov 0  }
   0x2 LB: > { %s26_s15 = sadd.s32 1, %s797_s13  ;;  %p628_p0 = scmp.ge.s32.totalorder %s801_s14, 1  ;;  %s801_s14 = sphi %s863_s14, %s14_s14   ;;  %s797_s13 = sphi %s861_s13, %s1022_s13   ;;  %s793_s12 = sphi %s859_s12, %s1021_s12  }
   0x3   : > { %p28_p1 = scmp.ge.s32.totalorder %s26_s15, 2  ;;  %p164_p2 = scmp.lt.s32.totalorder %s801_s14, 3 }
   0x5   : > { %s1024_s15 = smov (%p28_p1, %s26_s15), 0  ;;  %p165_p3 = pnand %p628_p0, %p164_p2 }
   0x6   : > { %p200_p4 = scmp.lt.s32.totalorder (!%p165_p3), %s793_s12, 1  ;;  %s831_s26 = smov (!%p165_p3), 8  }
   0x7   : > { %168 = sbr.rel (%p165_p3) target bundleno = 1377 (0x561), region = 28  ;;  %s922_s30 = smov (!%p165_p3), 1  }
   0xc   : > { %s1026_s12 = smov (!%p200_p4, %s793_s12), 1  ;;  %v270_v2 = vlaneseq  ;;  %v832_v5 = vmov 0.0   ;;  %vm266_vm2 = vcmask 64512   ;;  %v910_v17 = vmov 0.0  }
   0xd   : > { %s877_s16 = sshll.u32 %s1026_s12, 3  ;;  %v912_v18 = vmov 0.0   ;;  %v914_v19 = vmov 0.0  }
   0xe   : > { %s207_s19 = scalar_lea.vmem %s1010_s1, %s877_s16  ;;  %s214_s22 = scalar_lea.vmem %s1011_s2, %s877_s16  ;;  %v896_v3 = vand.u32 127, %v270_v2  ;;  %v273_v4 = vshrl.u32 %v270_v2, 7 }
   0xf   : > { %s221_s25 = scalar_lea.vmem %s1012_s3, %s877_s16  ;;  %v261_v0 = vld [vmem:[%s207_s19] sm:$0xff]  ;;  %s203_s29 = scalar_lea.vmem %s1009_s0, %s877_s16 }
  0x10   : > { %263 = vrot.lane.b32.xlu0 %v261_v0, %s831_s26  ;;  %v223_v1 = vld [vmem:[%s203_s29] sm:$0xff]  ;;  %vm276_vm0 = vcmp.eq.s32.totalorder %v896_v3, %v273_v4  ;;  %vm279_vm1 = vcmp.eq.s32.totalorder %v896_v3, 0 }
  0x11   : > { %v901_v6 = vsel %vm276_vm0, 1.0, %v832_v5   ;;  %v280_v7 = vsel %vm279_vm1, %v273_v4, 0  }
  0x12   : > { %v1013_v20 = vmov %v901_v6  ;;  %v1014_v21 = vmov %v901_v6 }
  0x2e   : > { %224 = vxpose.xlu0.b32.start.end [1/1] (short) (narrow) %v223_v1, 8 }
  0x82   : > { %v264_v8 = vpop.permute.xlu0 %263 }
  0xaa   : > { %v240_v9 = vpop.trf.xlu0 }
  0xab   : > { %v256_v10 = vadd.f32 %v240_v9, %v223_v1 }
  0xad   : > { %v257_v11 = vmul.f32 0.5, %v256_v10 }
  0xaf   : > { %v258_v12 = vadd.f32 1e-10, %v257_v11 }
  0xb1   : > { %743 = vlog2.f32 %v258_v12 }
  0xbe   : > { %v744_v13 = vpop.eup %743 }
  0xbf   : > { %v260_v14 = vmul.f32 0.6931472, %v744_v13 }
  0xc1   : > { %v904_v15 = vsel %vm266_vm2, %v260_v14, %v264_v8 }
  0xc2   : > { %v268_v16 = vpack.c.bf16 %v904_v15, %v904_v15 }
  0xc3 LB: >> { %vm297_vm3 = vcmask 1043456   ;;  %v833_v22 = vmov 0.0   ;;  %vm834_vm4 = vmmov 0   ;;  %v293_v24 = vpack.c.bf16 %v821_v20, %v821_v20  ;;  %s835_s4 = smov 8   ;;  %s836_s5 = smov 120   ;;  %s829_s30 = sphi %s922_s30, %s286_s30   ;;  %v825_v21 = vphi %v1014_v21, %v1020_v21   ;;  %v821_v20 = vphi %v1013_v20, %v1019_v20   ;;  %v817_v19 = vphi %v914_v19, %v1018_v19   ;;  %v813_v18 = vphi %v912_v18, %v1017_v18   ;;  %v809_v17 = vphi %v910_v17, %v1016_v17   ;;  %v805_v7 = vphi %v280_v7, %v1015_v7  }
  0xc4   : >> { %643 = vmatprep.subr.bf16.mxu0 %v833_v22  ;;  %v944_v23 = vsel %vm297_vm3, %v268_v16, 0  ;;  %645 = vmatprep.mubr.msk.bf16.mxu0 %vm834_vm4, %v833_v22  ;;  %vm341_vm5 = vcmp.gt.f32.partialorder %v825_v21, 0.0  ;;  %v404_v45 = vstv %s829_s30  ;;  %s286_s30 = sadd.s32 1, %s829_s30  }
  0xc5   : >> { %644 = vmatpush3.bf16.msra.mxu0 %v944_v23  ;;  %vm405_vm8 = vcmp.eq.s32.totalorder %v896_v3, %v404_v45  ;;  %p283_p5 = scmp.ge.s32.totalorder %s286_s30, 8  }
  0xc6   : > { %649 = vmatprep.subr.bf16.mxu0 (%p283_p5), %v832_v5  ;;  %vm837_vm10 = vmmov (%p283_p5), 0   ;;  %s838_s8 = smov (%p283_p5), 120   ;;  %vm471_vm11 = vcmask (%p283_p5), 7168   ;;  %vm473_vm12 = vcmask (%p283_p5), 15360   ;;  %vm475_vm13 = vcmask (%p283_p5), 23552  }
  0xc8   : >> { %646 = vmatmul.mubr.msk.bf16.vlgmr.msra.gmra.mxu0 %vm266_vm2, %v293_v24 }
  0xc9   : > { %650 = vmatpush3.bf16.msra.mxu0 (%p283_p5), %v944_v23  ;;  %651 = vmatprep.mubr.msk.bf16.mxu0 (%p283_p5), %vm837_vm10, %v832_v5 }
 0x188   : >> { %v335_v25 = vpop.f32.mrf.mxu0 }
 0x189   : >> { %v342_v26 = vsel %vm341_vm5, -1e+30, %v335_v25 }
 0x18a   : >> { %v647_v27 = vpop.f32.mrf.mxu0  ;;  %v343_v28 = vsel %vm266_vm2, %v342_v26, -inf }
 0x18b   : >> { %344 = vmax.xlane.f32.xlu0 %v343_v28 }
 0x18c   : >> { %v338_v29 = vpop.f32.mrf.mxu0 }
 0x18e   : >> { %v648_v30 = vpop.f32.mrf.mxu0 }
 0x214   : >> { %v345_v31 = vpop.xlane.xlu0 %344 }
 0x215   : >> { %v346_v32 = vsub.f32 %v342_v26, %v345_v31  ;;  %vm356_vm6 = vcmp.ge.f32.partialorder %v342_v26, %v345_v31 }
 0x216   : >> { %v357_v33 = vsel %vm356_vm6, %v896_v3, 8 }
 0x217   : >> { %v347_v34 = vmul.f32 1.442695, %v346_v32  ;;  %v358_v35 = vsel %vm266_vm2, %v357_v33, 2147483647 }
 0x218   : >> { %v360_v36 = vshra.s32 %v358_v35, 16  ;;  %v359_v40 = vand.u32 65535, %v358_v35 }
 0x219   : >> { %745 = vpow2.f32 %v347_v34 }
 0x21a   : >> { %v362_v37 = vcvt.s32.f32 %v360_v36  ;;  %v361_v42 = vcvt.s32.f32 %v359_v40 }
 0x21c   : >> { %363 = vmin.xlane.f32.xlu0 %v362_v37 }
 0x226   : >> { %v746_v38 = vpop.eup %745 }
 0x227   : >> { %v349_v39 = vsel %vm266_vm2, %v746_v38, 0.0 }
 0x228   : >> { %350 = vadd.xlane.f32.xlu0 %v349_v39 }
 0x2a5   : >> { %v364_v41 = vpop.xlane.xlu0 %363 }
 0x2a6   : >> { %vm365_vm7 = vcmp.eq.f32.partialorder %v362_v37, %v364_v41  ;;  %v370_v44 = vcvt.f32.s32 %v364_v41 }
 0x2a7   : >> { %v366_v43 = vsel %vm365_vm7, %v361_v42, inf }
 0x2a8   : >> { %367 = vmin.xlane.f32.xlu1 %v366_v43  ;;  %v371_v47 = vshll.u32 %v370_v44, 16 }
 0x2b1   : >> { %v351_v54 = vpop.xlane.xlu0 %350 }
 0x2b2   : >> { %747 = vlog2.f32 %v351_v54 }
 0x2bf   : >> { %v748_v55 = vpop.eup %747 }
 0x2c0   : >> { %v353_v56 = vmul.f32 0.6931472, %v748_v55 }
 0x2c2   : >> { %v354_v57 = vadd.f32 %v353_v56, %v345_v31 }
 0x2c4   : >> { %v355_v58 = vsub.f32 %v342_v26, %v354_v57 }
 0x2c6   : >> { %v381_v63 = vmul.f32 1.442695, %v355_v58 }
 0x2c8   : >> { %749 = vpow2.f32 %v381_v63 }
 0x2d5   : >> { %v750_v0 = vpop.eup %749 }
 0x2d6   : >> { %v383_v1 = vsub.f32 0.0, %v750_v0 }
 0x2d8   : >> { %v384_v2 = vmul.f32 %v383_v1, %v355_v58 }
 0x2da   : >> { %v385_v4 = vsel %vm341_vm5, 0.0, %v384_v2 }
 0x331   : >> { %v368_v46 = vpop.xlane.xlu1 %367 }
 0x332   : >> { %v369_v48 = vcvt.f32.s32 %v368_v46 }
 0x334   : >> { %v372_v49 = vadd.s32 %v371_v47, %v369_v48 }
 0x336   : >> { %v406_v50 = vsel %vm405_vm8, %v372_v49, 0  ;;  %vm373_vm9 = vcmp.eq.s32.totalorder %v896_v3, %v372_v49 }
 0x337   : >> { %v407_v51 = vadd.s32 %v805_v7, %v406_v50   ;;  %v635_v52 = vsel %vm373_vm9, 1.0, %v833_v22   ;;  %v386_v7 = vsel %vm266_vm2, %v385_v4, 0.0 }
 0x338   : >> { %391 = vrot.lane.b32.xlu1 %v635_v52, %s835_s4  ;;  %v403_v53 = vmax.f32 %v825_v21, %v635_v52   ;;  %v376_v59 = vmul.f32 %v635_v52, %v355_v58  ;;  %v1019_v20 = vmov %v635_v52 }
 0x339   : > { %469 = vst.msk [vmem:[%s214_s22] sm:$0xff] (%p283_p5), %vm266_vm2, %v407_v51 }
 0x33a   : >> { %v377_v60 = vsel %vm266_vm2, %v376_v59, 0.0  ;;  %v1020_v21 = vmov %v403_v53 }
 0x33b   : > { %v408_v21 = vpack.c.bf16 (%p283_p5), %v635_v52, %v635_v52 }
 0x33d   : > { %652 = vmatmul.mubr.msk.bf16.vlgmr.msra.gmra.mxu0 (%p283_p5), %vm266_vm2, %v408_v21 }
 0x35c   : >> { %378 = vadd.xlane.f32.xlu1 %v377_v60 }
 0x3aa   : >> { %v392_v61 = vpop.permute.xlu1 %391 }
 0x3ab   : >> { %v394_v62 = vmul.f32 %v392_v61, %v335_v25 }
 0x3ad   : >> { %396 = vrot.lane.b32.xlu0 %v394_v62, %s836_s5 }
 0x3cc   : >> { %387 = vadd.xlane.f32.xlu0 %v386_v7  ;;  %v1015_v7 = vmov %v407_v51 }
 0x3e2   : > { %457 = vrot.lane.b32.xlu0 (%p283_p5), %v901_v6, %s831_s26 }
 0x3e5   : >> { %v379_v8 = vpop.xlane.xlu1 %378 }
 0x3e6   : >> { %v380_v9 = vadd.f32 %v817_v19, %v379_v8  }
 0x3e8   : >> { %v1018_v19 = vmov %v380_v9 }
 0x3fd   : > { %v450_v15 = vpop.f32.mrf.mxu0 (%p283_p5) }
 0x41f   : >> { %v397_v10 = vpop.permute.xlu0 %396 }
 0x420   : >> { %v399_v11 = vsel %vm266_vm2, %v397_v10, 0.0 }
 0x421   : >> { %400 = vadd.xlane.f32.xlu1 %v399_v11 }
 0x455   : >> { %v388_v12 = vpop.xlane.xlu0 %387 }
 0x456   : >> { %v389_v13 = vadd.f32 %v813_v18, %v388_v12  }
 0x458   : >> { %v1017_v18 = vmov %v389_v13 }
 0x459   : > { %v458_v3 = vpop.permute.xlu0 (%p283_p5), %457 }
 0x45a   : > { %v460_v16 = vmul.f32 (%p283_p5), %v458_v3, %v450_v15 }
 0x45c   : > { %462 = vrot.lane.b32.xlu0 (%p283_p5), %v460_v16, %s838_s8 }
 0x4a9   : > { %285 = sbr.rel (!%p283_p5) target bundleno = 195 (0xc3), region = 80 }
 0x4aa   : >> { %v401_v14 = vpop.xlane.xlu1 %400 }
 0x4ab   : >> { %v402_v22 = vadd.f32 %v809_v17, %v401_v14  }
 0x4ad   : >> { %v1016_v17 = vmov %v402_v22 }
 0x4ae   : > { %v653_v17 = vpop.f32.mrf.mxu0 }
 0x4b0   : > { %v453_v6 = vpop.f32.mrf.mxu0 }
 0x4b2   : > { %v654_v18 = vpop.f32.mrf.mxu0 }
 0x4ce   : > { %v463_v19 = vpop.permute.xlu0 %462 }
 0x4cf   : > { %v465_v20 = vsel %vm266_vm2, %v463_v19, 0.0 }
 0x4d0   : > { %466 = vadd.xlane.f32.xlu1 %v465_v20 }
 0x559   : > { %v467_v24 = vpop.xlane.xlu1 %466 }
 0x55a   : > { %v468_v23 = vadd.f32 %v467_v24, %v402_v22 }
 0x55c   : > { %v470_v5 = vsub.f32 0.0, %v468_v23 }
 0x55e   : > { %v472_v25 = vsel %vm471_vm11, %v380_v9, %v470_v5 }
 0x55f   : > { %v474_v26 = vsel %vm473_vm12, %v472_v25, %v389_v13 }
 0x560   : > { %476 = vst.msk [vmem:[%s221_s25] sm:$0xff] %vm475_vm13, %v474_v26 }
 0x561 PF: > { %s14_s14 = sadd.s32 1, %s801_s14   ;;  %s1021_s12 = smov %s797_s13 }
 0x562   : > { %p11_p6 = scmp.ge.s32.totalorder %s14_s14, 4   ;;  %s1022_s13 = smov %s1024_s15 }
 0x564   :  { %13 = sbr.rel (!%p11_p6) target bundleno = 2 (0x2), region = 91 }

// kernel: nonautoregressive_policy_forward.12
= control target key start
LH: loop header
LB: loop body
LE: loop exit
PB: predicated region body
PF: predicated region fallthrough
CT: control target
= control target key end

     0   :  { %s2472_s0 = inlined_call_operand.vmem [shape: bf16[2,8,8,32], index: 0, kind: input, shape index: {}]   ;;  %s2473_s1 = inlined_call_operand.vmem [shape: f32[2,8,128], index: 1, kind: input, shape index: {}]   ;;  %s2474_s2 = inlined_call_operand.vmem [shape: f32[2,8,32], index: 2, kind: input, shape index: {}]   ;;  %s2475_s3 = inlined_call_operand.vmem [shape: f32[2,8,32], index: 3, kind: input, shape index: {}]   ;;  %s2476_s4 = inlined_call_operand.vmem [shape: bf16[32,32], index: 4, kind: input, shape index: {}]   ;;  %s2477_s5 = inlined_call_operand.vmem [shape: f32[1,32], index: 5, kind: input, shape index: {}]   ;;  %s2478_s6 = inlined_call_operand.vmem [shape: f32[1,32], index: 6, kind: input, shape index: {}]   ;;  %s2479_s7 = inlined_call_operand.vmem [shape: f32[1,32], index: 7, kind: input, shape index: {}]   ;;  %s2480_s8 = inlined_call_operand.vmem [shape: f32[1,32], index: 8, kind: input, shape index: {}]   ;;  %s2481_s9 = inlined_call_operand.vmem [shape: f32[1,32], index: 9, kind: input, shape index: {}]   ;;  %s2482_s10 = inlined_call_operand.vmem [shape: bf16[32,32], index: 10, kind: input, shape index: {}]   ;;  %s2483_s11 = inlined_call_operand.vmem [shape: f32[1,32], index: 11, kind: input, shape index: {}]   ;;  %s2484_s12 = inlined_call_operand.vmem [shape: bf16[32,32], index: 12, kind: input, shape index: {}]   ;;  %s2485_s13 = inlined_call_operand.vmem [shape: f32[1,32], index: 13, kind: input, shape index: {}]   ;;  %s2486_s14 = inlined_call_operand.vmem [shape: f32[1,32], index: 14, kind: input, shape index: {}]   ;;  %s2487_s15 = inlined_call_operand.<no memory space> [shape: f32[1,1], index: 15, kind: input, shape index: {}]   ;;  %s2488_s16 = inlined_call_operand.hbm [shape: f32[2,8,32], index: 16, kind: output, shape index: {0}]   ;;  %s2489_s17 = inlined_call_operand.vmem [shape: f32[2,8,8], index: 17, kind: output, shape index: {1}]  }
   0x1   :  { %2493 = sst [smem:[#allocation10_spill]] %s2472_s0  ;;  %v23_v0 = vstv %s2487_s15 }
   0x2   :  { %2494 = sst [smem:[#allocation11_spill]] %s2473_s1  ;;  %24 = vst [vmem:[#allocation2] sm:$0x1] %v23_v0 }
   0x3   :  { %2495 = sst [smem:[#allocation12_spill]] %s2475_s3 }
   0x4   :  { %2496 = sst [smem:[#allocation13_spill]] %s2476_s4 }
   0x5   :  { %2497 = sst [smem:[#allocation14_spill]] %s2477_s5 }
   0x6   :  { %2498 = sst [smem:[#allocation15_spill]] %s2478_s6 }
   0x7   :  { %25 = vsyncpa [#allocation4], 0 }
   0x8   :  { %27 = vsyncpa [#allocation4 + $0x1], 0  ;;  %s2240_s26 = smov 0   ;;  %s2242_s27 = smov 0  }
   0x9   :  { %s2244_s28 = smov 0   ;;  %s2246_s29 = smov 0  }
   0xa   :  { %s2248_s0 = smov 0   ;;  %s2250_s30 = smov 0  }
   0xb LB: > { %2499 = sst [smem:[#allocation6_spill]] %s2128_s28  ;;  %s1718_s15 = sadd.s32 4294967295, %s2140_s30   ;;  %s2140_s30 = sphi %s2250_s30, %s33_s30   ;;  %s2136_s0 = sphi %s2248_s0, %s2514_s0   ;;  %s2132_s29 = sphi %s2246_s29, %s2513_s29   ;;  %s2128_s28 = sphi %s2244_s28, %s2512_s28   ;;  %s2124_s27 = sphi %s2242_s27, %s2516_s27   ;;  %s2120_s26 = sphi %s2240_s26, %s2515_s26  }
   0xc   : > { %2500 = sst [smem:[#allocation7_spill]] %s2136_s0  ;;  %s1719_s18 = sadd.s32 4294967294, %s2140_s30  }
   0xd   : > { %s45_s19 = sadd.s32 1, %s2136_s0  ;;  %s416_s1 = sadd.s32 1, %s2128_s28 }
   0xe   : > { %p47_p0 = scmp.ge.s32.totalorder %s45_s19, 2  ;;  %p426_p1 = scmp.ne.s32.totalorder %s2128_s28, %s2124_s27 }
   0xf   : > { %p427_p2 = scmp.eq.s32.totalorder %s1718_s15, 1  ;;  %p432_p3 = scmp.ne.s32.totalorder %s2124_s27, %s2120_s26 }
  0x10   : > { %s2518_s19 = smov (%p47_p0, %s45_s19), 0  ;;  %p433_p5 = scmp.eq.s32.totalorder %s1719_s18, 1 }
  0x11   : > { %2501 = sst [smem:[#allocation8_spill]] %s2518_s19  ;;  %p2280_p4 = por %p427_p2, %p426_p1 }
  0x12   : > { %s411_s21 = ssub.s32 %s2136_s0, %s2518_s19  ;;  %p1722_p6 = scmp.ge.s32.totalorder %s2140_s30, 1 }
  0x13   : > { %p414_p7 = scmp.eq.s32.totalorder %s411_s21, 0  ;;  %p2287_p8 = por %p433_p5, %p432_p3 }
  0x14   : > { %p555_p9 = scmp.lt.s32.totalorder %s2140_s30, 3 }
  0x15   : > { %s2293_s23 = scalar_select %p414_p7, %s2128_s28, %s416_s1  }
  0x16   : > { %p556_p10 = pnand %p1722_p6, %p555_p9 }
  0x17   : > { %2504 = sst [smem:[#allocation9_spill]] %s2293_s23  ;;  %p637_p11 = scmp.lt.s32.totalorder (!%p556_p10), %s2132_s29, 1 }
  0x18   : > { %559 = sbr.rel (%p556_p10) target bundleno = 963 (0x3c3), region = 84  ;;  %s2505_s4 = sld [smem:[#allocation13_spill]] (!%p556_p10) }
  0x19   : > { %s2506_s18 = sld [smem:[#allocation10_spill]] (!%p556_p10) }
  0x1a   : > { %s2507_s23 = sld [smem:[#allocation11_spill]] (!%p556_p10) }
  0x1b   : > { %s2508_s5 = sld [smem:[#allocation14_spill]] (!%p556_p10) }
  0x1c   : > { %s2509_s3 = sld [smem:[#allocation12_spill]] (!%p556_p10) }
  0x1d   : > { %v845_v2 = vlaneseq  ;;  %s638_s21 = scalar_select %p637_p11, %s2132_s29, 1  ;;  %v2142_v6 = vmov 1966171168   ;;  %vm718_vm0 = vcmask 261120   ;;  %v1924_v38 = vld [vmem:[%s2482_s10 + $0x8] sm:$0xff]   ;;  %v1925_v39 = vld [vmem:[%s2482_s10] sm:$0xff]  }
  0x1e   : > { %v1917_v1 = vld [vmem:[%s2505_s4 + $0x8] sm:$0xff]   ;;  %v1918_v3 = vld [vmem:[%s2505_s4] sm:$0xff]   ;;  %v843_v7 = vunpack.c.l.s4 %v2142_v6  ;;  %s2510_s6 = sld [smem:[#allocation15_spill]] }
  0x1f   : > { %1817 = vmatprep.subr.bf16.mxu0 %v1917_v1  ;;  %1853 = vmatprep.subr.bf16.mxu1 %v1917_v1  ;;  %v846_v4 = vshrl.u32 %v845_v2, 7  ;;  %v1494_v5 = vand.u32 127, %v845_v2  ;;  %s1798_s1 = sshll.u32 %s638_s21, 5  ;;  %s2303_s24 = sshll.u32 %s638_s21, 3  ;;  %v1744_v59 = vld [vmem:[%s2480_s8] ss:$0 sm:$0xff] }
  0x20   : > { %1818 = vmatpush3.bf16.msra.mxu0 %v1917_v1  ;;  %1855 = vmatpush3.bf16.msra.mxu1 %v1917_v1  ;;  %s644_s4 = scalar_lea.vmem %s2506_s18, %s1798_s1  ;;  %s649_s28 = scalar_lea.vmem %s2507_s23, %s2303_s24  ;;  %v844_v12 = vunpack.c.0.s8 %v843_v7 }
  0x21   : > { %1819 = vmatprep.subr.bf16.mxu0 %v1918_v3  ;;  %1854 = vmatprep.subr.bf16.mxu1 %v1918_v3  ;;  %v2305_v8 = vsub.s32 %v1494_v5, %v846_v4  ;;  %v2310_v9 = vld [vmem:[%s644_s4] sm:$0xff]   ;;  %v2312_v10 = vld [vmem:[%s644_s4 + $0x10] sm:$0xff]   ;;  %v2314_v11 = vld [vmem:[%s644_s4 + $0x8] sm:$0xff]   ;;  %v892_v17 = vsub.s32 0, %v846_v4  ;;  %s624_s18 = sand.u32 1, %s2124_s27   ;;  %s656_s0 = scalar_lea.vmem %s2474_s2, %s2303_s24 }
  0x22   : > { %v2320_v13 = vld [vmem:[%s644_s4 + $0x18] sm:$0xff]   ;;  %1821 = vmatprep.mubr.msk.bf16.mxu0 %vm718_vm0, %v2310_v9  ;;  %v691_v14 = vld [vmem:[%s649_s28] sm:$0xff]  ;;  %1825 = vmatprep.mubr.msk.bf16.mxu1 %vm718_vm0, %v2312_v10  ;;  %v847_v15 = vsub.s32 %v844_v12, %v846_v4  ;;  %s2143_s4 = smov 64   ;;  %s2144_s28 = smov 32  }
  0x23   : > { %v841_v18 = vcombine.high %v691_v14, %v691_v14  ;;  %v1733_v46 = vld [vmem:[%s2508_s5] ss:$0 sm:$0xff]  ;;  %s663_s23 = scalar_lea.vmem %s2509_s3, %s2303_s24  ;;  %s1723_s19 = sshll.u32 %s624_s18, 3 }
  0x24   : > { %1820 = vmatpush3.bf16.msra.mxu0 %v1918_v3  ;;  %1856 = vmatpush3.bf16.msra.mxu1 %v1918_v3  ;;  %v848_v16 = vrot.slane %v691_v14, %v847_v15  ;;  %v1745_v3 = vld [vmem:[%s2481_s9] ss:$0 sm:$0xff]  ;;  %s626_s15 = scalar_lea.vmem [#allocation3], %s1723_s19  ;;  %s1545_s5 = scalar_lea.sflag [#allocation4], %s624_s18 }
  0x25   : > { %v855_v24 = vrot.slane %v841_v18, %v847_v15  ;;  %1829 = vmatprep.subr.bf16.mxu1 %v1924_v38  ;;  %s1566_s3 = sshll.u32 %s626_s15, 4  ;;  %s1567_s3 = int_to_ptr.vmem [resolvable:$true] %s1566_s3 }
  0x26   : > { %v864_v19 = vrot.slane %v848_v16, %v847_v15  ;;  %v856_v20 = vcombine.high %v848_v16, %v848_v16 }
  0x27   : > { %1822 = vmatmul.mubr.msk.bf16.vlgmr.msra.gmra.mxu0 %vm718_vm0, %v2314_v11  ;;  %1826 = vmatmul.mubr.msk.bf16.vlgmr.msra.gmra.mxu1 %vm718_vm0, %v2320_v13  ;;  %v857_v28 = vcombine.high %v855_v24, %v855_v24  ;;  %v871_v30 = vrot.slane %v855_v24, %v847_v15 }
  0x28   : > { %v893_v21 = vrot.slane %v864_v19, %v892_v17  ;;  %v886_v22 = vcombine.high %v864_v19, %v864_v19  ;;  %v878_v23 = vrot.slane %v856_v20, %v847_v15  ;;  %1830 = vmatpush3.bf16.msra.mxu1 %v1924_v38 }
  0x29   : > { %v885_v31 = vrot.slane %v857_v28, %v847_v15  ;;  %v909_v32 = vrot.slane %v871_v30, %v892_v17  ;;  %v887_v33 = vcombine.high %v871_v30, %v871_v30  ;;  %1831 = vmatprep.subr.bf16.mxu1 %v1925_v39 }
  0x2a   : > { %922 = vrot.lane.b32.xlu0 %v893_v21, %s2143_s4  ;;  %v901_v25 = vrot.slane %v886_v22, %v892_v17  ;;  %v897_v26 = vrot.slane %v878_v23, %v892_v17  ;;  %v888_v27 = vcombine.high %v878_v23, %v878_v23 }
  0x2b   : > { %v913_v34 = vrot.slane %v885_v31, %v892_v17  ;;  %v889_v35 = vcombine.high %v885_v31, %v885_v31  ;;  %v917_v36 = vrot.slane %v887_v33, %v892_v17 }
  0x2c   : > { %926 = vrot.lane.b32.xlu1 %v901_v25, %s2143_s4  ;;  %v905_v29 = vrot.slane %v888_v27, %v892_v17  ;;  %1832 = vmatpush3.bf16.msra.mxu1 %v1925_v39 }
  0x2d   : > { %v921_v37 = vrot.slane %v889_v35, %v892_v17 }
  0x2e   : > { %924 = vrot.lane.b32.xlu0 %v897_v26, %s2143_s4 }
  0x30   : > { %928 = vrot.lane.b32.xlu1 %v905_v29, %s2143_s4 }
  0x32   : > { %955 = vrot.lane.b32.xlu0 %v691_v14, %s2144_s28 }
  0x34   : > { %930 = vrot.lane.b32.xlu1 %v909_v32, %s2143_s4 }
  0x36   : > { %932 = vrot.lane.b32.xlu0 %v913_v34, %s2143_s4 }
  0x38   : > { %934 = vrot.lane.b32.xlu1 %v917_v36, %s2143_s4 }
  0x3a   : > { %936 = vrot.lane.b32.xlu0 %v921_v37, %s2143_s4  ;;  %s2146_s4 = smov [#allocation3]  }
  0x3b   : > { %s2068_s28 = sshll.u32 %s2146_s4, 4  ;;  %s2069_s28 = int_to_ptr.vmem [resolvable:$false] %s2068_s28 }
  0x3c   : > { %p2071_p1 = scmp.lt.s32.totalorder %s1567_s3, %s2069_s28 }
  0x9c   : > { %v923_v40 = vpop.permute.xlu0 %922 }
  0x9e   : > { %v927_v41 = vpop.permute.xlu1 %926 }
  0xa0   : > { %v925_v42 = vpop.permute.xlu0 %924 }
  0xa2   : > { %v929_v43 = vpop.permute.xlu1 %928 }
  0xa4   : > { %v956_v45 = vpop.permute.xlu0 %955 }
  0xa6   : > { %v931_v44 = vpop.permute.xlu1 %930 }
  0xa8   : > { %v933_v48 = vpop.permute.xlu0 %932 }
  0xaa   : > { %v935_v47 = vpop.permute.xlu1 %934 }
  0xac   : > { %v937_v2 = vpop.permute.xlu0 %936 }
  0xe7   : > { %v1823_v49 = vpop.f32.mrf.mxu0  ;;  %v1827_v50 = vpop.f32.mrf.mxu1 }
  0xe8   : > { %v818_v51 = vadd.f32 %v1823_v49, %v1733_v46  ;;  %v834_v52 = vadd.f32 %v1827_v50, %v1733_v46 }
  0xe9   : > { %v809_v53 = vpop.f32.mrf.mxu0  ;;  %v825_v54 = vpop.f32.mrf.mxu1 }
  0xea   : > { %v948_v55 = vadd.f32 %v927_v41, %v818_v51  ;;  %v952_v56 = vadd.f32 %v935_v47, %v834_v52  ;;  %v810_v57 = vadd.f32 %v1733_v46, %v809_v53  ;;  %v826_v58 = vadd.f32 %v1733_v46, %v825_v54 }
  0xeb   : > { %v1824_v60 = vpop.f32.mrf.mxu0  ;;  %v1828_v61 = vpop.f32.mrf.mxu1 }
  0xec   : > { %v960_v62 = vadd.f32 %v956_v45, %v948_v55  ;;  %v964_v63 = vadd.f32 %v956_v45, %v952_v56  ;;  %v946_v0 = vadd.f32 %v923_v40, %v810_v57  ;;  %v950_v1 = vadd.f32 %v931_v44, %v826_v58 }
  0xed   : > { %v821_v4 = vadd.f32 %v1824_v60, %v1733_v46  ;;  %v837_v5 = vadd.f32 %v1828_v61, %v1733_v46  ;;  %v812_v6 = vpop.f32.mrf.mxu0  ;;  %v828_v7 = vpop.f32.mrf.mxu1 }
  0xee   : > { %v975_v12 = vmul.f32 %v1744_v59, %v960_v62  ;;  %v979_v14 = vmul.f32 %v1744_v59, %v964_v63  ;;  %v958_v15 = vadd.f32 %v956_v45, %v946_v0  ;;  %v962_v16 = vadd.f32 %v956_v45, %v950_v1 }
  0xef   : > { %v949_v17 = vadd.f32 %v929_v43, %v821_v4  ;;  %v953_v18 = vadd.f32 %v937_v2, %v837_v5  ;;  %v813_v19 = vadd.f32 %v1733_v46, %v812_v6  ;;  %v829_v20 = vadd.f32 %v1733_v46, %v828_v7 }
  0xf0   : > { %v2345_v21 = vadd.f32 %v1745_v3, %v975_v12  ;;  %v2347_v22 = vadd.f32 %v1745_v3, %v979_v14  ;;  %v973_v23 = vmul.f32 %v1744_v59, %v958_v15  ;;  %v977_v24 = vmul.f32 %v1744_v59, %v962_v16 }
  0xf1   : > { %v961_v25 = vadd.f32 %v956_v45, %v949_v17  ;;  %v965_v26 = vadd.f32 %v956_v45, %v953_v18  ;;  %v947_v27 = vadd.f32 %v925_v42, %v813_v19  ;;  %v951_v28 = vadd.f32 %v933_v48, %v829_v20 }
  0xf2   : > { %v1748_v29 = vmul.f32 -1.442695, %v2345_v21  ;;  %v988_v30 = vadd.f32 %v1745_v3, %v973_v23  ;;  %v2350_v31 = vadd.f32 %v1745_v3, %v977_v24  ;;  %v1752_v36 = vmul.f32 -1.442695, %v2347_v22 }
  0xf3   : > { %v976_v32 = vmul.f32 %v1744_v59, %v961_v25  ;;  %v980_v33 = vmul.f32 %v1744_v59, %v965_v26  ;;  %v959_v34 = vadd.f32 %v956_v45, %v947_v27  ;;  %v963_v35 = vadd.f32 %v956_v45, %v951_v28 }
  0xf4   : > { %1932 = vpow2.f32 %v1748_v29  ;;  %v1746_v37 = vmul.f32 -1.442695, %v988_v30  ;;  %v1750_v38 = vmul.f32 -1.442695, %v2350_v31  ;;  %v683_v5 = vunpack.c.h.bf16 %v2314_v11 }
  0xf5   : > { %v991_v39 = vadd.f32 %v1745_v3, %v976_v32  ;;  %v2354_v40 = vadd.f32 %v1745_v3, %v980_v33  ;;  %v974_v41 = vmul.f32 %v1744_v59, %v959_v34  ;;  %v978_v42 = vmul.f32 %v1744_v59, %v963_v35 }
  0xf6   : > { %1934 = vpow2.f32 %v1746_v37  ;;  %v680_v6 = vunpack.c.l.bf16 %v2310_v9  ;;  %v681_v7 = vunpack.c.h.bf16 %v2310_v9  ;;  %v685_v16 = vunpack.c.h.bf16 %v2312_v10 }
  0xf7   : > { %1936 = vpow2.f32 %v1750_v38  ;;  %v1749_v43 = vmul.f32 -1.442695, %v991_v39  ;;  %v1753_v44 = vmul.f32 -1.442695, %v2354_v40  ;;  %v989_v46 = vadd.f32 %v1745_v3, %v974_v41 }
  0xf8   : > { %1938 = vpow2.f32 %v1752_v36  ;;  %v993_v47 = vadd.f32 %v1745_v3, %v978_v42  ;;  %v682_v17 = vunpack.c.l.bf16 %v2314_v11  ;;  %v684_v20 = vunpack.c.l.bf16 %v2312_v10 }
  0xf9   : > { %1940 = vpow2.f32 %v1749_v43  ;;  %v1747_v45 = vmul.f32 -1.442695, %v989_v46  ;;  %v687_v11 = vunpack.c.h.bf16 %v2320_v13 }
  0xfa   : > { %1942 = vpow2.f32 %v1753_v44  ;;  %v1751_v48 = vmul.f32 -1.442695, %v993_v47 }
  0xfb   : > { %1944 = vpow2.f32 %v1747_v45 }
  0xfc   : > { %1946 = vpow2.f32 %v1751_v48 }
 0x101   : > { %v1933_v49 = vpop.eup %1932 }
 0x102   : > { %v1022_v50 = vadd.f32 1.0, %v1933_v49 }
 0x103   : > { %v1935_v51 = vpop.eup %1934 }
 0x104   : > { %v1937_v52 = vpop.eup %1936  ;;  %v1020_v53 = vadd.f32 1.0, %v1935_v51  ;;  %1948 = vrcp.f32 %v1022_v50 }
 0x105   : > { %v1939_v54 = vpop.eup %1938  ;;  %v1024_v55 = vadd.f32 1.0, %v1937_v52 }
 0x106   : > { %v1941_v56 = vpop.eup %1940  ;;  %1950 = vrcp.f32 %v1020_v53  ;;  %v1026_v0 = vadd.f32 1.0, %v1939_v54 }
 0x107   : > { %v1943_v57 = vpop.eup %1942  ;;  %v1023_v58 = vadd.f32 1.0, %v1941_v56  ;;  %1952 = vrcp.f32 %v1024_v55 }
 0x108   : > { %v1945_v59 = vpop.eup %1944  ;;  %v1027_v62 = vadd.f32 1.0, %v1943_v57 }
 0x109   : > { %v1947_v60 = vpop.eup %1946  ;;  %1954 = vrcp.f32 %v1023_v58  ;;  %v1021_v61 = vadd.f32 1.0, %v1945_v59 }
 0x10a   : > { %v1025_v63 = vadd.f32 1.0, %v1947_v60 }
 0x10b   : > { %1956 = vrcp.f32 %v1021_v61 }
 0x10c   : > { %1958 = vrcp.f32 %v1025_v63 }
 0x10d   : > { %1960 = vrcp.f32 %v1027_v62 }
 0x10e   : > { %1962 = vrcp.f32 %v1026_v0 }
 0x111   : > { %v1949_v1 = vpop.eup %1948 }
 0x112   : > { %v1046_v18 = vmul.f32 %v1949_v1, %v2345_v21 }
 0x113   : > { %v1951_v2 = vpop.eup %1950 }
 0x114   : > { %v1953_v3 = vpop.eup %1952  ;;  %v1044_v12 = vmul.f32 %v1951_v2, %v988_v30  ;;  %v1054_v29 = vadd.f32 %v1046_v18, %v682_v17 }
 0x115   : > { %v1048_v23 = vmul.f32 %v1953_v3, %v2350_v31  ;;  %v686_v31 = vunpack.c.l.bf16 %v2320_v13  ;;  %v1927_v13 = vld [vmem:[%s2484_s12] sm:$0xff]  }
 0x116   : > { %v1955_v4 = vpop.eup %1954  ;;  %v1052_v28 = vadd.f32 %v1044_v12, %v680_v6 }
 0x117   : > { %v1047_v14 = vmul.f32 %v1955_v4, %v991_v39  ;;  %v1056_v34 = vadd.f32 %v1048_v23, %v684_v20 }
 0x118   : > { %v1957_v15 = vpop.eup %1956 }
 0x119   : > { %v1959_v19 = vpop.eup %1958  ;;  %v1045_v24 = vmul.f32 %v1957_v15, %v989_v46  ;;  %v1055_v25 = vadd.f32 %v1047_v14, %v683_v5 }
 0x11a   : > { %v1049_v26 = vmul.f32 %v1959_v19, %v993_v47  ;;  %v1961_v27 = vpop.eup %1960 }
 0x11b   : > { %v1053_v9 = vadd.f32 %v1045_v24, %v681_v7  ;;  %v1963_v32 = vpop.eup %1962  ;;  %v1051_v21 = vmul.f32 %v1961_v27, %v2354_v40  ;;  %v1066_v35 = vpack.c.bf16 %v1055_v25, %v1054_v29  ;;  %v1926_v40 = vld [vmem:[%s2484_s12 + $0x8] sm:$0xff]  }
 0x11c   : > { %v1057_v30 = vadd.f32 %v1049_v26, %v685_v16  ;;  %v1050_v36 = vmul.f32 %v1963_v32, %v2347_v22  ;;  %1841 = vmatprep.subr.bf16.mxu0 %v1926_v40  ;;  %v1754_v22 = vld [vmem:[%s2483_s11] ss:$0 sm:$0xff] }
 0x11d   : > { %v1065_v33 = vpack.c.bf16 %v1053_v9, %v1052_v28  ;;  %v1059_v37 = vadd.f32 %v1051_v21, %v687_v11  ;;  %1842 = vmatpush3.bf16.msra.mxu0 %v1926_v40  ;;  %v2145_v40 = vmov 0  }
 0x11e   : > { %v1067_v10 = vpack.c.bf16 %v1057_v30, %v1056_v34  ;;  %v1058_v38 = vadd.f32 %v1050_v36, %v686_v31  ;;  %1843 = vmatprep.subr.bf16.mxu0 %v1927_v13  ;;  %1916 = vset.pattern.permute.xlu0 %v2145_v40 }
 0x11f   : > { %1833 = vmatprep.mubr.msk.bf16.mxu1 %vm718_vm0, %v1065_v33 }
 0x120   : > { %1834 = vmatmul.mubr.msk.bf16.vlgmr.msra.gmra.mxu1 %vm718_vm0, %v1066_v35  ;;  %v1068_v39 = vpack.c.bf16 %v1059_v37, %v1058_v38 }
 0x121   : > { %1837 = vmatprep.mubr.msk.bf16.mxu1 %vm718_vm0, %v1067_v10  ;;  %1844 = vmatpush3.bf16.msra.mxu0 %v1927_v13  ;;  %v1769_v13 = vld [vmem:[%s2485_s13] ss:$0 sm:$0xff] }
 0x128   : > { %1838 = vmatmul.mubr.msk.bf16.gmra.mxu1 %vm718_vm0, %v1068_v39 }
 0x1e0   : > { %v1835_v41 = vpop.f32.mrf.mxu1 }
 0x1e1   : > { %v1142_v42 = vadd.f32 %v1835_v41, %v1754_v22 }
 0x1e2   : > { %v1133_v43 = vpop.f32.mrf.mxu1 }
 0x1e3   : > { %v1763_v44 = vmul.f32 -1.442695, %v1142_v42  ;;  %v1134_v46 = vadd.f32 %v1754_v22, %v1133_v43 }
 0x1e4   : > { %v1836_v47 = vpop.f32.mrf.mxu1 }
 0x1e5   : > { %v1761_v45 = vmul.f32 -1.442695, %v1134_v46  ;;  %v1145_v48 = vadd.f32 %v1836_v47, %v1754_v22  ;;  %1964 = vpow2.f32 %v1763_v44 }
 0x1e6   : > { %v1136_v49 = vpop.f32.mrf.mxu1 }
 0x1e7   : > { %1966 = vpow2.f32 %v1761_v45  ;;  %v1764_v50 = vmul.f32 -1.442695, %v1145_v48  ;;  %v1137_v51 = vadd.f32 %v1754_v22, %v1136_v49 }
 0x1e8   : > { %v1839_v52 = vpop.f32.mrf.mxu1 }
 0x1e9   : > { %1968 = vpow2.f32 %v1764_v50  ;;  %v1762_v53 = vmul.f32 -1.442695, %v1137_v51  ;;  %v1158_v54 = vadd.f32 %v1839_v52, %v1754_v22 }
 0x1ea   : > { %v1149_v55 = vpop.f32.mrf.mxu1 }
 0x1eb   : > { %1970 = vpow2.f32 %v1762_v53  ;;  %v1767_v56 = vmul.f32 -1.442695, %v1158_v54  ;;  %v1150_v57 = vadd.f32 %v1754_v22, %v1149_v55 }
 0x1ec   : > { %v1840_v58 = vpop.f32.mrf.mxu1 }
 0x1ed   : > { %v1765_v59 = vmul.f32 -1.442695, %v1150_v57  ;;  %v1161_v60 = vadd.f32 %v1840_v58, %v1754_v22  ;;  %1972 = vpow2.f32 %v1767_v56 }
 0x1ee   : > { %v1152_v61 = vpop.f32.mrf.mxu1 }
 0x1ef   : > { %1974 = vpow2.f32 %v1765_v59  ;;  %v1768_v62 = vmul.f32 -1.442695, %v1161_v60  ;;  %v1153_v63 = vadd.f32 %v1754_v22, %v1152_v61 }
 0x1f1   : > { %1976 = vpow2.f32 %v1768_v62  ;;  %v1766_v0 = vmul.f32 -1.442695, %v1153_v63 }
 0x1f2   : > { %v1965_v1 = vpop.eup %1964 }
 0x1f3   : > { %1978 = vpow2.f32 %v1766_v0  ;;  %v1190_v5 = vadd.f32 1.0, %v1965_v1 }
 0x1f4   : > { %v1967_v2 = vpop.eup %1966 }
 0x1f5   : > { %v1188_v3 = vadd.f32 1.0, %v1967_v2 }
 0x1f6   : > { %v1969_v4 = vpop.eup %1968 }
 0x1f7   : > { %v1191_v6 = vadd.f32 1.0, %v1969_v4  ;;  %1980 = vrcp.f32 %v1188_v3 }
 0x1f8   : > { %v1971_v7 = vpop.eup %1970 }
 0x1f9   : > { %1982 = vrcp.f32 %v1191_v6  ;;  %v1189_v12 = vadd.f32 1.0, %v1971_v7 }
 0x1fa   : > { %1984 = vrcp.f32 %v1190_v5  ;;  %v1973_v14 = vpop.eup %1972 }
 0x1fb   : > { %1986 = vrcp.f32 %v1189_v12  ;;  %v1194_v18 = vadd.f32 1.0, %v1973_v14 }
 0x1fc   : > { %v1975_v15 = vpop.eup %1974 }
 0x1fd   : > { %v1192_v16 = vadd.f32 1.0, %v1975_v15 }
 0x1fe   : > { %v1977_v17 = vpop.eup %1976 }
 0x1ff   : > { %v1195_v19 = vadd.f32 1.0, %v1977_v17  ;;  %1988 = vrcp.f32 %v1192_v16 }
 0x200   : > { %v1979_v20 = vpop.eup %1978 }
 0x201   : > { %1990 = vrcp.f32 %v1195_v19  ;;  %v1193_v23 = vadd.f32 1.0, %v1979_v20 }
 0x202   : > { %1992 = vrcp.f32 %v1194_v18 }
 0x203   : > { %1994 = vrcp.f32 %v1193_v23 }
 0x204   : > { %v1981_v24 = vpop.eup %1980 }
 0x205   : > { %v1212_v9 = vmul.f32 %v1981_v24, %v1134_v46  ;;  %v1784_v24 = vld [vmem:[%s2486_s14] ss:$0 sm:$0xff] }
 0x206   : > { %v1983_v25 = vpop.eup %1982 }
 0x207   : > { %v1985_v26 = vpop.eup %1984  ;;  %v1215_v28 = vmul.f32 %v1983_v25, %v1145_v48 }
 0x208   : > { %v1987_v27 = vpop.eup %1986  ;;  %v1214_v30 = vmul.f32 %v1985_v26, %v1142_v42 }
 0x209   : > { %v1213_v29 = vmul.f32 %v1987_v27, %v1137_v51 }
 0x20a   : > { %v1226_v33 = vpack.c.bf16 %v1215_v28, %v1214_v30 }
 0x20b   : > { %v1225_v32 = vpack.c.bf16 %v1213_v29, %v1212_v9 }
 0x20c   : > { %v1989_v34 = vpop.eup %1988 }
 0x20d   : > { %1845 = vmatprep.mubr.msk.bf16.mxu0 %vm718_vm0, %v1225_v32  ;;  %v1216_v31 = vmul.f32 %v1989_v34, %v1150_v57 }
 0x20e   : > { %v1991_v11 = vpop.eup %1990  ;;  %1846 = vmatmul.mubr.msk.bf16.vlgmr.msra.gmra.mxu0 %vm718_vm0, %v1226_v33 }
 0x20f   : > { %v1993_v21 = vpop.eup %1992  ;;  %v1219_v10 = vmul.f32 %v1991_v11, %v1161_v60 }
 0x210   : > { %v1995_v35 = vpop.eup %1994  ;;  %v1218_v37 = vmul.f32 %v1993_v21, %v1158_v54 }
 0x211   : > { %v1217_v36 = vmul.f32 %v1995_v35, %v1153_v63 }
 0x212   : > { %v1228_v39 = vpack.c.bf16 %v1219_v10, %v1218_v37 }
 0x213   : > { %v1227_v38 = vpack.c.bf16 %v1217_v36, %v1216_v31 }
 0x215   : > { %1849 = vmatprep.mubr.msk.bf16.mxu0 %vm718_vm0, %v1227_v38 }
 0x216   : > { %1850 = vmatmul.mubr.msk.bf16.gmra.mxu0 %vm718_vm0, %v1228_v39 }
 0x2ce   : > { %v1847_v22 = vpop.f32.mrf.mxu0 }
 0x2cf   : > { %v1302_v41 = vadd.f32 %v1847_v22, %v1769_v13 }
 0x2d0   : > { %v1293_v42 = vpop.f32.mrf.mxu0 }
 0x2d1   : > { %v1778_v43 = vmul.f32 -1.442695, %v1302_v41  ;;  %v1294_v44 = vadd.f32 %v1769_v13, %v1293_v42 }
 0x2d2   : > { %v1848_v46 = vpop.f32.mrf.mxu0 }
 0x2d3   : > { %1996 = vpow2.f32 %v1778_v43  ;;  %v1776_v47 = vmul.f32 -1.442695, %v1294_v44  ;;  %v1305_v45 = vadd.f32 %v1848_v46, %v1769_v13 }
 0x2d4   : > { %v1296_v48 = vpop.f32.mrf.mxu0 }
 0x2d5   : > { %1998 = vpow2.f32 %v1776_v47  ;;  %v1779_v49 = vmul.f32 -1.442695, %v1305_v45  ;;  %v1297_v50 = vadd.f32 %v1769_v13, %v1296_v48 }
 0x2d6   : > { %v1851_v51 = vpop.f32.mrf.mxu0 }
 0x2d7   : > { %2000 = vpow2.f32 %v1779_v49  ;;  %v1777_v52 = vmul.f32 -1.442695, %v1297_v50  ;;  %v1318_v53 = vadd.f32 %v1851_v51, %v1769_v13  ;;  %v692_v51 = vld [vmem:[%s663_s23] sm:$0xff]  ;;  %s1795_s23 = sshll.u32 %s2132_s29, 7  ;;  %s2070_s29 = scalar_lea.vmem %s2069_s28, 256 }
 0x2d8   : > { %v1309_v54 = vpop.f32.mrf.mxu0  ;;  %s2419_s25 = scalar_lea.hbm %s2488_s16, %s1795_s23 }
 0x2d9   : > { %2002 = vpow2.f32 %v1777_v52  ;;  %v1782_v55 = vmul.f32 -1.442695, %v1318_v53  ;;  %v1310_v56 = vadd.f32 %v1769_v13, %v1309_v54  ;;  %v1730_v52 = vld [vmem:[%s2510_s6] ss:$0 sm:$0xff]  ;;  %s2064_s6 = scalar_lea.vmem %s1567_s3, 128 }
 0x2da   : > { %v1852_v57 = vpop.f32.mrf.mxu0  ;;  %v1731_v54 = vld [vmem:[%s2479_s7] ss:$0 sm:$0xff]  ;;  %p2065_p12 = scmp.ne.s32.totalorder %s1567_s3, %s2064_s6  ;;  %p2072_p2 = scmp.lt.s32.totalorder %s2070_s29, %s2064_s6 }
 0x2db   : > { %2004 = vpow2.f32 %v1782_v55  ;;  %v1780_v58 = vmul.f32 -1.442695, %v1310_v56  ;;  %v1321_v59 = vadd.f32 %v1852_v57, %v1769_v13 }
 0x2dc   : > { %v1312_v60 = vpop.f32.mrf.mxu0  ;;  %p2066_p13 = pnand %p2065_p12, %p2280_p4  ;;  %p2073_p3 = por %p2072_p2, %p2071_p1 }
 0x2dd   : > { %2006 = vpow2.f32 %v1780_v58  ;;  %v1783_v61 = vmul.f32 -1.442695, %v1321_v59  ;;  %v1313_v62 = vadd.f32 %v1769_v13, %v1312_v60  ;;  %v709_v60 = vld [vmem:[%s656_s0] sm:$0xff] }
 0x2de   : > { %p2067_p0 = pneg %p2066_p13 }
 0x2df   : > { %2008 = vpow2.f32 %v1783_v61  ;;  %v1781_v63 = vmul.f32 -1.442695, %v1313_v62 }
 0x2e0   : > { %v1997_v0 = vpop.eup %1996  ;;  %p2074_p5 = pnand %p2073_p3, %p2067_p0 }
 0x2e1   : > { %v1350_v1 = vadd.f32 1.0, %v1997_v0  ;;  %2010 = vpow2.f32 %v1781_v63 }
 0x2e2   : > { %v1999_v2 = vpop.eup %1998 }
 0x2e3   : > { %2012 = vrcp.f32 %v1350_v1  ;;  %v1348_v3 = vadd.f32 1.0, %v1999_v2 }
 0x2e4   : > { %v2001_v4 = vpop.eup %2000 }
 0x2e5   : > { %2014 = vrcp.f32 %v1348_v3  ;;  %v1351_v5 = vadd.f32 1.0, %v2001_v4 }
 0x2e6   : > { %v2003_v6 = vpop.eup %2002 }
 0x2e7   : > { %2016 = vrcp.f32 %v1351_v5  ;;  %v1349_v7 = vadd.f32 1.0, %v2003_v6 }
 0x2e8   : > { %v2005_v12 = vpop.eup %2004 }
 0x2e9   : > { %2018 = vrcp.f32 %v1349_v7  ;;  %v1354_v14 = vadd.f32 1.0, %v2005_v12 }
 0x2ea   : > { %v2007_v15 = vpop.eup %2006 }
 0x2eb   : > { %2020 = vrcp.f32 %v1354_v14  ;;  %v1352_v16 = vadd.f32 1.0, %v2007_v15 }
 0x2ec   : > { %v2009_v17 = vpop.eup %2008 }
 0x2ed   : > { %2022 = vrcp.f32 %v1352_v16  ;;  %v1355_v18 = vadd.f32 1.0, %v2009_v17 }
 0x2ee   : > { %v2011_v19 = vpop.eup %2010 }
 0x2ef   : > { %2024 = vrcp.f32 %v1355_v18  ;;  %v1353_v20 = vadd.f32 1.0, %v2011_v19 }
 0x2f0   : > { %v2013_v23 = vpop.eup %2012 }
 0x2f1   : > { %v1374_v25 = vmul.f32 %v2013_v23, %v1302_v41  ;;  %2026 = vrcp.f32 %v1353_v20 }
 0x2f2   : > { %v2015_v26 = vpop.eup %2014 }
 0x2f3   : > { %v1372_v27 = vmul.f32 %v2015_v26, %v1294_v44  ;;  %v1390_v28 = vmul.f32 %v1784_v24, %v1374_v25 }
 0x2f4   : > { %v2017_v9 = vpop.eup %2016 }
 0x2f5   : > { %v1375_v29 = vmul.f32 %v2017_v9, %v1305_v45  ;;  %v1402_v30 = vsel %vm718_vm0, %v1390_v28, 0.0  ;;  %v1388_v32 = vmul.f32 %v1784_v24, %v1372_v27 }
 0x2f6   : > { %v2019_v33 = vpop.eup %2018  ;;  %1403 = vadd.xlane.f32.xlu0 %v1402_v30 }
 0x2f7   : > { %v1373_v34 = vmul.f32 %v2019_v33, %v1297_v50  ;;  %v1396_v11 = vsel %vm718_vm0, %v1388_v32, 0.0  ;;  %v1391_v21 = vmul.f32 %v1784_v24, %v1375_v29  ;;  %v1785_v50 = vld [vmem:[#allocation2] ss:$0 sm:$0xff] }
 0x2f8   : > { %v2021_v35 = vpop.eup %2020  ;;  %1397 = vadd.xlane.f32.xlu1 %v1396_v11 }
 0x2f9   : > { %v1378_v10 = vmul.f32 %v2021_v35, %v1318_v53  ;;  %v1389_v31 = vmul.f32 %v1784_v24, %v1373_v34  ;;  %v1405_v39 = vsel %vm718_vm0, %v1391_v21, 0.0  ;;  %v700_v53 = vmul.f32 %v1730_v52, %v692_v51 }
 0x2fa   : > { %v2023_v36 = vpop.eup %2022 }
 0x2fb   : > { %v1376_v37 = vmul.f32 %v2023_v36, %v1310_v56  ;;  %v1399_v38 = vsel %vm718_vm0, %v1389_v31, 0.0  ;;  %v1394_v40 = vmul.f32 %v1784_v24, %v1378_v10  ;;  %v708_v55 = vadd.f32 %v1731_v54, %v700_v53 }
 0x2fc   : > { %v2025_v13 = vpop.eup %2024  ;;  %1400 = vadd.xlane.f32.xlu0 %v1399_v38  ;;  %1406 = vadd.xlane.f32.xlu1 %v1405_v39 }
 0x2fd   : > { %v1379_v41 = vmul.f32 %v2025_v13, %v1321_v59  ;;  %v1414_v43 = vsel %vm718_vm0, %v1394_v40, 0.0  ;;  %v1392_v44 = vmul.f32 %v1784_v24, %v1376_v37  ;;  %v1732_v56 = vmul.f32 -1.442695, %v708_v55 }
 0x2fe   : > { %v2027_v22 = vpop.eup %2026 }
 0x2ff   : > { %v1377_v42 = vmul.f32 %v2027_v22, %v1313_v62  ;;  %v1408_v47 = vsel %vm718_vm0, %v1392_v44, 0.0  ;;  %v1395_v48 = vmul.f32 %v1784_v24, %v1379_v41  ;;  %2028 = vpow2.f32 %v1732_v56 }
 0x300   : > { %1415 = vadd.xlane.f32.xlu0 %v1414_v43 }
 0x301   : > { %v1393_v46 = vmul.f32 %v1784_v24, %v1377_v42  ;;  %v1417_v49 = vsel %vm718_vm0, %v1395_v48, 0.0 }
 0x303   : > { %v1411_v45 = vsel %vm718_vm0, %v1393_v46, 0.0 }
 0x304   : > { %1409 = vadd.xlane.f32.xlu0 %v1408_v47  ;;  %1412 = vadd.xlane.f32.xlu1 %v1411_v45 }
 0x308   : > { %1418 = vadd.xlane.f32.xlu1 %v1417_v49 }
 0x30c   : > { %v2029_v57 = vpop.eup %2028 }
 0x30d   : > { %v713_v58 = vadd.f32 1.0, %v2029_v57 }
 0x30f   : > { %2030 = vrcp.f32 %v713_v58 }
 0x31a   : > { %1426 = vperm.xlu0 %1916, %v1785_v50  }
 0x31c   : > { %v2031_v59 = vpop.eup %2030 }
 0x31d   : > { %v716_v61 = vmul.f32 %v2031_v59, %v708_v55 }
 0x31f   : > { %v717_v62 = vadd.f32 %v716_v61, %v709_v60 }
 0x321   : > { %719 = vst.msk [vmem:[%s626_s15] sm:$0xff] %vm718_vm0, %v717_v62 }
 0x322   : > { %2077 = shalt.err (!%p2074_p5)
}
 0x323   : > { %s2078_s0 = scalar_lea.hbm %s2419_s25, 128  ;;  %s2082_s23 = scalar_lea.hbm %s2488_s16, 256 }
 0x324   : > { %p2079_p6 = scmp.ne.s32.totalorder %s2419_s25, %s2078_s0  ;;  %p2083_p10 = scmp.lt.s32.totalorder %s2419_s25, %s2488_s16 }
 0x325   : > { %p2084_p11 = scmp.lt.s32.totalorder %s2082_s23, %s2078_s0 }
 0x326   : > { %p2080_p7 = pnand %p2079_p6, %p2280_p4 }
 0x327   : > { %p2085_p12 = por %p2084_p11, %p2083_p10 }
 0x328   : > { %p2081_p9 = pneg %p2080_p7 }
 0x32a   : > { %p2086_p13 = pnand %p2085_p12, %p2081_p9 }
 0x32c   : > { %2089 = shalt.err (!%p2086_p13)
}
 0x32d   : > { %1857 = dma.vmem_to_hbm [thread:$0]  (%p2280_p4), %s1567_s3, 128, %s2419_s25, %s1545_s5   ;;  %vm1527_vm1 = vcmask 1041409   ;;  %vm1529_vm2 = vcmask 1042434   ;;  %vm1531_vm3 = vcmask 1043459   ;;  %vm1533_vm4 = vcmask 1044484  }
 0x32e   : > { %vm1535_vm5 = vcmask 1045509   ;;  %vm1537_vm6 = vcmask 1046534   ;;  %vm1539_vm7 = vcmask 1047559   ;;  %s670_s6 = scalar_lea.vmem %s2489_s17, %s2303_s24  ;;  %vm1542_vm8 = vcmask 64512  }
 0x37f   : > { %v1404_v63 = vpop.xlane.xlu0 %1403 }
 0x381   : > { %v1398_v1 = vpop.xlane.xlu1 %1397 }
 0x385   : > { %v1401_v0 = vpop.xlane.xlu0 %1400  ;;  %v1407_v3 = vpop.xlane.xlu1 %1406 }
 0x389   : > { %v1416_v2 = vpop.xlane.xlu0 %1415 }
 0x38d   : > { %v1410_v4 = vpop.xlane.xlu0 %1409  ;;  %v1413_v5 = vpop.xlane.xlu1 %1412 }
 0x391   : > { %v1419_v18 = vpop.xlane.xlu1 %1418 }
 0x395   : > { %v1427_v6 = vpop.permute.xlu0 %1426 }
 0x396   : > { %v1429_v7 = vadd.f32 %v1427_v6, %v1398_v1  ;;  %v1430_v12 = vadd.f32 %v1427_v6, %v1401_v0  ;;  %v1431_v14 = vadd.f32 %v1427_v6, %v1404_v63  ;;  %v1432_v15 = vadd.f32 %v1427_v6, %v1407_v3 }
 0x397   : > { %v1433_v16 = vadd.f32 %v1427_v6, %v1410_v4  ;;  %v1434_v17 = vadd.f32 %v1427_v6, %v1413_v5  ;;  %v1435_v19 = vadd.f32 %v1427_v6, %v1416_v2  ;;  %v1436_v25 = vadd.f32 %v1427_v6, %v1419_v18 }
 0x398   : > { %v1786_v20 = vmul.f32 -1.442695, %v1429_v7  ;;  %v1787_v23 = vmul.f32 -1.442695, %v1430_v12  ;;  %v1788_v24 = vmul.f32 -1.442695, %v1431_v14 }
 0x399   : > { %v1789_v26 = vmul.f32 -1.442695, %v1432_v15  ;;  %v1790_v27 = vmul.f32 -1.442695, %v1433_v16  ;;  %v1791_v28 = vmul.f32 -1.442695, %v1434_v17 }
 0x39a   : > { %2032 = vpow2.f32 %v1786_v20  ;;  %v1792_v9 = vmul.f32 -1.442695, %v1435_v19  ;;  %v1793_v29 = vmul.f32 -1.442695, %v1436_v25 }
 0x39b   : > { %2034 = vpow2.f32 %v1787_v23 }
 0x39c   : > { %2036 = vpow2.f32 %v1788_v24 }
 0x39d   : > { %2038 = vpow2.f32 %v1789_v26 }
 0x39e   : > { %2040 = vpow2.f32 %v1790_v27 }
 0x39f   : > { %2042 = vpow2.f32 %v1791_v28 }
 0x3a0   : > { %2044 = vpow2.f32 %v1792_v9 }
 0x3a1   : > { %2046 = vpow2.f32 %v1793_v29 }
 0x3a7   : > { %v2033_v30 = vpop.eup %2032 }
 0x3a8   : > { %v2035_v32 = vpop.eup %2034  ;;  %v1461_v33 = vadd.f32 1.0, %v2033_v30 }
 0x3a9   : > { %v2037_v34 = vpop.eup %2036  ;;  %v1462_v11 = vadd.f32 1.0, %v2035_v32 }
 0x3aa   : > { %v2039_v21 = vpop.eup %2038  ;;  %v1463_v35 = vadd.f32 1.0, %v2037_v34  ;;  %2048 = vrcp.f32 %v1461_v33 }
 0x3ab   : > { %v2041_v10 = vpop.eup %2040  ;;  %v1464_v31 = vadd.f32 1.0, %v2039_v21  ;;  %2050 = vrcp.f32 %v1462_v11 }
 0x3ac   : > { %v2043_v36 = vpop.eup %2042  ;;  %v1465_v37 = vadd.f32 1.0, %v2041_v10  ;;  %2052 = vrcp.f32 %v1463_v35 }
 0x3ad   : > { %v2045_v38 = vpop.eup %2044  ;;  %v1466_v39 = vadd.f32 1.0, %v2043_v36  ;;  %2054 = vrcp.f32 %v1464_v31 }
 0x3ae   : > { %v2047_v40 = vpop.eup %2046  ;;  %v1467_v13 = vadd.f32 1.0, %v2045_v38  ;;  %2056 = vrcp.f32 %v1465_v37 }
 0x3af   : > { %v1468_v22 = vadd.f32 1.0, %v2047_v40  ;;  %2058 = vrcp.f32 %v1466_v39 }
 0x3b0   : > { %2060 = vrcp.f32 %v1467_v13 }
 0x3b1   : > { %2062 = vrcp.f32 %v1468_v22 }
 0x3b7   : > { %v2049_v41 = vpop.eup %2048 }
 0x3b8   : > { %v2051_v42 = vpop.eup %2050  ;;  %v1498_v43 = vrot.slane %v2049_v41, %v2305_v8 }
 0x3b9   : > { %v2053_v44 = vpop.eup %2052  ;;  %v1502_v46 = vrot.slane %v2051_v42, %v2305_v8 }
 0x3ba   : > { %v2055_v47 = vpop.eup %2054  ;;  %v1506_v45 = vrot.slane %v2053_v44, %v2305_v8 }
 0x3bb   : > { %v2057_v48 = vpop.eup %2056  ;;  %v1510_v49 = vrot.slane %v2055_v47, %v2305_v8  ;;  %v1528_v50 = vsel %vm1527_vm1, %v1502_v46, %v1498_v43 }
 0x3bc   : > { %v2059_v51 = vpop.eup %2058  ;;  %v1514_v52 = vrot.slane %v2057_v48, %v2305_v8  ;;  %v1530_v53 = vsel %vm1529_vm2, %v1506_v45, %v1528_v50 }
 0x3bd   : > { %v2061_v54 = vpop.eup %2060  ;;  %v1518_v55 = vrot.slane %v2059_v51, %v2305_v8  ;;  %v1532_v56 = vsel %vm1531_vm3, %v1510_v49, %v1530_v53 }
 0x3be   : > { %v2063_v57 = vpop.eup %2062  ;;  %v1522_v58 = vrot.slane %v2061_v54, %v2305_v8  ;;  %v1534_v59 = vsel %vm1533_vm4, %v1514_v52, %v1532_v56 }
 0x3bf   : > { %v1526_v60 = vrot.slane %v2063_v57, %v2305_v8  ;;  %v1536_v61 = vsel %vm1535_vm5, %v1518_v55, %v1534_v59 }
 0x3c0   : > { %v1538_v62 = vsel %vm1537_vm6, %v1522_v58, %v1536_v61 }
 0x3c1   : > { %v1540_v63 = vsel %vm1539_vm7, %v1526_v60, %v1538_v62 }
 0x3c2   : > { %1543 = vst.msk [vmem:[%s670_s6] sm:$0xff] %vm1542_vm8, %v1540_v63 }
 0x3c3 PF: > { %p1863_p4 = scmp.ge.s32.totalorder %s2140_s30, 2  ;;  %s1581_s20 = sand.u32 1, %s2120_s26  }
 0x3c4   : > { %s1582_s25 = scalar_lea.sflag [#allocation4], %s1581_s20 }
 0x3c5   : > { %p1860_p0 = pnand %p1863_p4, %p2287_p8 }
 0x3c7   : > { %p1861_p1 = pneg %p1860_p0 }
 0x3c9   : > { %2115 = dma.done.wait (%p1861_p1), %s1582_s25, 128  }
 0x3ca   : > { %2117 = vsyncadd (%p1861_p1), %s1582_s25, 4294967168  ;;  %s33_s30 = sadd.s32 1, %s2140_s30   ;;  %s2511_s24 = sld [smem:[#allocation6_spill]] }
 0x3cb   : > { %p30_p2 = scmp.ge.s32.totalorder %s33_s30, 4   ;;  %s2512_s28 = sld [smem:[#allocation9_spill]] }
 0x3cc   : > { %s2513_s29 = sld [smem:[#allocation7_spill]]  ;;  %s2515_s26 = smov %s2124_s27 }
 0x3cd   : > { %s2514_s0 = sld [smem:[#allocation8_spill]]  ;;  %32 = sbr.rel (!%p30_p2) target bundleno = 11 (0xb), region = 141 }
 0x3d0   : > { %s2516_s27 = smov %s2511_s24 }
 0x3d2   :  { %1597 = vsyncpa [#allocation4], 1 }
 0x3d3   :  { %1599 = vsyncpa [#allocation4 + $0x1], 1 }

</bundles_post_ra>
